<compile_context>
chip_gen: v7x
topology: tpu7x:2x2x1
jax: 0.10.0
libtpu: 0.0.40
codegen_flags: <defaults>
</compile_context>

<pallas_src>
import math

import jax
import jax.numpy as jnp
from jax.experimental import pallas as pl
from jax.experimental.pallas import tpu as pltpu


_VMEM_LIMIT = 32 * 1024 * 1024  # safe on v5e/v6e/v7x; usage here is far below


# --------------------------------------------------------------------------
# Kernel A: x-path gate pre-activations for the whole sequence (parallel).
# --------------------------------------------------------------------------
def _xconv_kernel(xcol_ref, wx_ref, b_ref, gx_ref):
    # xcol_ref: (1, 1, HW, KH*KW*Cin) bf16   wx_ref: (KH*KW*Cin, 4*hid) bf16
    # b_ref:    (1, 4*hid) f32               gx_ref: (1, 1, HW, 4*hid) f32
    acc = jnp.dot(xcol_ref[0, 0], wx_ref[...],
                  preferred_element_type=jnp.float32)
    gx_ref[0, 0] = acc + b_ref[...]


def conv_x_all_steps(x_col, wx, b):
    B, T, HW, Kx = x_col.shape
    C4 = wx.shape[1]
    return pl.pallas_call(
        _xconv_kernel,
        out_shape=jax.ShapeDtypeStruct((B, T, HW, C4), jnp.float32),
        grid=(B, T),
        in_specs=[
            pl.BlockSpec((1, 1, HW, Kx), lambda b_, t: (b_, t, 0, 0)),
            pl.BlockSpec((Kx, C4), lambda b_, t: (0, 0)),      # resident
            pl.BlockSpec((1, C4), lambda b_, t: (0, 0)),       # resident
        ],
        out_specs=pl.BlockSpec((1, 1, HW, C4), lambda b_, t: (b_, t, 0, 0)),
        compiler_params=pltpu.CompilerParams(
            dimension_semantics=("parallel", "parallel"),
            vmem_limit_bytes=_VMEM_LIMIT),
    )(x_col, wx, b)


# --------------------------------------------------------------------------
# Kernel B: the recurrence, time fused into the grid, state resident in VMEM.
# --------------------------------------------------------------------------
def _make_recurrent_kernel(H, W, hid, KH, KW):
    HW = H * W
    ph, pw = KH // 2, KW // 2

    def kernel(gx_ref, wh_ref, hseq_ref, c_ref, hpad_ref):
        # gx_ref:   (1, 1, HW, 4*hid) f32   (x-path pre-activations + bias)
        # wh_ref:   (KH*KW*hid, 4*hid) bf16 (VMEM-resident across all t)
        # hseq_ref: (1, 1, HW, hid) f32     (per-step h output)
        # c_ref:    (1, HW, hid) f32        (resident accumulator = cell state)
        # hpad_ref: (H+2*ph, W+2*pw, hid) f32 scratch (zero-padded h halo)
        t = pl.program_id(1)

        @pl.when(t == 0)
        def _init():
            hpad_ref[...] = jnp.zeros_like(hpad_ref)
            c_ref[...] = jnp.zeros_like(c_ref)

        # im2col of the current hidden state -> ONE fused-K matmul on the MXU.
        patches = [hpad_ref[kh:kh + H, kw:kw + W, :]
                   for kh in range(KH) for kw in range(KW)]
        hcol = jnp.concatenate(patches, axis=-1).reshape(HW, KH * KW * hid)
        acc = gx_ref[0, 0] + jnp.dot(hcol.astype(jnp.bfloat16), wh_ref[...],
                                     preferred_element_type=jnp.float32)

        # Gate math in f32; i/f/o sigmoid fused into one 3*hid-wide op.
        ifo = jax.nn.sigmoid(acc[:, :3 * hid])
        g_g = jnp.tanh(acc[:, 3 * hid:])
        i_g = ifo[:, 0 * hid:1 * hid]
        f_g = ifo[:, 1 * hid:2 * hid]
        o_g = ifo[:, 2 * hid:3 * hid]

        c_next = f_g * c_ref[0] + i_g * g_g
        h_next = o_g * jnp.tanh(c_next)

        c_ref[0] = c_next
        hseq_ref[0, 0] = h_next
        # Write new h into the interior of the halo buffer (border stays 0).
        hpad_ref[ph:ph + H, pw:pw + W, :] = h_next.reshape(H, W, hid)

    return kernel


def convlstm_recurrence(gx, wh, H, W, hid, KH, KW):
    B, T, HW, C4 = gx.shape
    Kh = KH * KW * hid
    ph, pw = KH // 2, KW // 2
    kernel = _make_recurrent_kernel(H, W, hid, KH, KW)
    h_seq, c_last = pl.pallas_call(
        kernel,
        out_shape=(jax.ShapeDtypeStruct((B, T, HW, hid), jnp.float32),
                   jax.ShapeDtypeStruct((B, HW, hid), jnp.float32)),
        grid=(B, T),
        in_specs=[
            pl.BlockSpec((1, 1, HW, C4), lambda b_, t: (b_, t, 0, 0)),
            pl.BlockSpec((Kh, C4), lambda b_, t: (0, 0)),      # resident weight
        ],
        out_specs=(
            pl.BlockSpec((1, 1, HW, hid), lambda b_, t: (b_, t, 0, 0)),
            pl.BlockSpec((1, HW, hid), lambda b_, t: (b_, 0, 0)),  # c state
        ),
        scratch_shapes=[
            pltpu.VMEM((H + 2 * ph, W + 2 * pw, hid), jnp.float32)],
        compiler_params=pltpu.CompilerParams(
            dimension_semantics=("parallel", "arbitrary"),
            vmem_limit_bytes=_VMEM_LIMIT),
    )(gx, wh)
    return h_seq, c_last


# --------------------------------------------------------------------------
# Parameters & full forward (matches the PyTorch ConvLSTM module semantics).
# --------------------------------------------------------------------------
def init_convlstm_params(key, input_dim, hidden_dims, kernel_sizes):
    """nn.Conv2d-style uniform init; weight split into x-path and h-path."""
    params = []
    cur_in = input_dim
    for hid, (KH, KW) in zip(hidden_dims, kernel_sizes):
        Cc = cur_in + hid
        fan_in = Cc * KH * KW
        bound = 1.0 / math.sqrt(fan_in)
        key, w_key, b_key = jax.random.split(key, 3)
        w = jax.random.uniform(w_key, (KH, KW, Cc, 4 * hid),
                               minval=-bound, maxval=bound, dtype=jnp.float32)
        b = jax.random.uniform(b_key, (1, 4 * hid),
                               minval=-bound, maxval=bound, dtype=jnp.float32)
        wx = w[:, :, :cur_in, :].reshape(KH * KW * cur_in, 4 * hid)
        wh = w[:, :, cur_in:, :].reshape(KH * KW * hid, 4 * hid)
        params.append((wx.astype(jnp.bfloat16), wh.astype(jnp.bfloat16), b))
        cur_in = hid
    return params


def _convlstm_forward(x, params, hidden_dims, kernel_sizes,
                      batch_first=True, return_all_layers=False):
    if not batch_first:
        x = jnp.transpose(x, (1, 0, 2, 3, 4))
    B, T, _, H, W = x.shape

    seq = jnp.transpose(x, (0, 1, 3, 4, 2))   # NCHW -> NHWC, once per call
    layer_outputs = []
    last_states = []

    for li, (wx, wh, b) in enumerate(params):
        hid = hidden_dims[li]
        KH, KW = kernel_sizes[li]
        ph, pw = KH // 2, KW // 2
        Cin = seq.shape[-1]

        # im2col over the whole sequence -> one big parallel x-path matmul.
        pad = jnp.pad(seq, ((0, 0), (0, 0), (ph, ph), (pw, pw), (0, 0)))
        cols = [pad[:, :, kh:kh + H, kw:kw + W, :]
                for kh in range(KH) for kw in range(KW)]
        x_col = jnp.concatenate(cols, axis=-1)
        x_col = x_col.reshape(B, T, H * W, KH * KW * Cin).astype(jnp.bfloat16)

        gx = conv_x_all_steps(x_col, wx, b)                 # (B, T, HW, 4*hid)
        h_seq, c_last = convlstm_recurrence(gx, wh, H, W, hid, KH, KW)

        seq = h_seq.reshape(B, T, H, W, hid)                # next layer's input
        layer_outputs.append(seq)
        last_states.append((seq[:, -1], c_last.reshape(B, H, W, hid)))

    if not return_all_layers:
        layer_outputs = layer_outputs[-1:]
        last_states = last_states[-1:]

    # Convert back to the PyTorch convention only for returned tensors.
    layer_output_list = [jnp.transpose(o, (0, 1, 4, 2, 3)) for o in layer_outputs]
    last_state_list = [(jnp.transpose(h, (0, 3, 1, 2)),
                        jnp.transpose(c, (0, 3, 1, 2))) for h, c in last_states]
    return layer_output_list, last_state_list


convlstm_forward = jax.jit(
    _convlstm_forward,
    static_argnames=("hidden_dims", "kernel_sizes", "batch_first",
                     "return_all_layers"))


if __name__ == "__main__":
    # ConvLSTM(input_dim=4, hidden_dim=32, kernel_size=(3,3), num_layers=2,
    #          batch_first=True, bias=True, return_all_layers=False)
    B, T, C, H, W = 2, 8, 4, 16, 16
    hidden_dims = (32, 32)
    kernel_sizes = ((3, 3), (3, 3))

    key = jax.random.PRNGKey(0)
    key, xkey = jax.random.split(key)
    x = jax.random.normal(xkey, (B, T, C, H, W), dtype=jnp.float32)

    params = init_convlstm_params(key, C, hidden_dims, kernel_sizes)

    layer_outputs, last_states = convlstm_forward(
        x, params, hidden_dims=hidden_dims, kernel_sizes=kernel_sizes,
        batch_first=True, return_all_layers=False)

    jax.block_until_ready(layer_outputs[-1])
    jax.block_until_ready(last_states[-1][0])
    jax.block_until_ready(last_states[-1][1])

    assert layer_outputs[-1].shape == (B, T, hidden_dims[-1], H, W)
    assert last_states[-1][0].shape == (B, hidden_dims[-1], H, W)
    assert last_states[-1][1].shape == (B, hidden_dims[-1], H, W)
    assert bool(jnp.all(jnp.isfinite(layer_outputs[-1])))
    print("KERNEL_OK")
</pallas_src>

<mosaic_0001>
module attributes {stable_mosaic.version = 11 : i64} {
  func.func @_xconv_kernel(%arg0: i32, %arg1: i32, %arg2: memref<1x1x256x36xbf16, #tpu.memory_space<vmem>>, %arg3: memref<36x128xbf16, #tpu.memory_space<vmem>>, %arg4: memref<1x128xf32, #tpu.memory_space<vmem>>, %arg5: memref<1x1x256x128xf32, #tpu.memory_space<vmem>>) attributes {dimension_semantics = [#tpu.dimension_semantics<parallel>, #tpu.dimension_semantics<parallel>], iteration_bounds = array<i64: 2, 8>, scalar_prefetch = 0 : i64, scratch_operands = 0 : i64, tpu.core_type = #tpu.core_type<tc>, window_params = [{transform_indices = @transform_0, window_bounds = array<i64: 1, 1, 256, 36>}, {pipeline_mode = #tpu.pipeline_mode<synchronous>, transform_indices = @transform_1, window_bounds = array<i64: 36, 128>}, {pipeline_mode = #tpu.pipeline_mode<synchronous>, transform_indices = @transform_2, window_bounds = array<i64: 1, 128>}, {transform_indices = @transform_3, window_bounds = array<i64: 1, 1, 256, 128>}]} {
    %c0 = arith.constant 0 : index
    %c0_0 = arith.constant 0 : index
    %c0_1 = arith.constant 0 : index
    %c0_2 = arith.constant 0 : index
    %0 = vector.load %arg2[%c0, %c0_0, %c0_1, %c0_2] : memref<1x1x256x36xbf16, #tpu.memory_space<vmem>>, vector<1x1x256x36xbf16>
    %1 = vector.shape_cast %0 : vector<1x1x256x36xbf16> to vector<256x36xbf16>
    %c0_3 = arith.constant 0 : index
    %c0_4 = arith.constant 0 : index
    %2 = vector.load %arg3[%c0_3, %c0_4] : memref<36x128xbf16, #tpu.memory_space<vmem>>, vector<36x128xbf16>
    %cst = arith.constant dense<0.000000e+00> : vector<256x128xf32>
    %3 = tpu.matmul %1, %2, %cst {dimension_numbers = #tpu.dot_dimension_numbers<[1], [0], [0], [1], [0, 0, 1, 1], [], []>} : vector<256x36xbf16>, vector<36x128xbf16>, vector<256x128xf32> -> vector<256x128xf32>
    %c0_5 = arith.constant 0 : index
    %c0_6 = arith.constant 0 : index
    %4 = vector.load %arg4[%c0_5, %c0_6] : memref<1x128xf32, #tpu.memory_space<vmem>>, vector<1x128xf32>
    %5 = vector.broadcast %4 : vector<1x128xf32> to vector<256x128xf32>
    %6 = arith.addf %3, %5 : vector<256x128xf32>
    %c0_7 = arith.constant 0 : index
    %c0_8 = arith.constant 0 : index
    %c0_9 = arith.constant 0 : index
    %c0_10 = arith.constant 0 : index
    %7 = vector.load %arg5[%c0_7, %c0_8, %c0_9, %c0_10] : memref<1x1x256x128xf32, #tpu.memory_space<vmem>>, vector<1x1x256x128xf32>
    %8 = vector.shape_cast %7 : vector<1x1x256x128xf32> to vector<256x128xf32>
    %9 = vector.shape_cast %6 : vector<256x128xf32> to vector<1x1x256x128xf32>
    tpu.vector_store %arg5[%c0_7, %c0_8, %c0_9, %c0_10], %9 {strides = array<i32>} : memref<1x1x256x128xf32, #tpu.memory_space<vmem>>, vector<1x1x256x128xf32>,
    return
  }
  func.func @transform_0(%arg0: i32, %arg1: i32) -> (i32, i32, i32, i32) {
    %c0_i32 = arith.constant 0 : i32
    %c0_i32_0 = arith.constant 0 : i32
    %c0_i32_1 = arith.constant 0 : i32
    return %arg0, %arg1, %c0_i32, %c0_i32_0 : i32, i32, i32, i32
  }
  func.func @transform_1(%arg0: i32, %arg1: i32) -> (i32, i32) {
    %c0_i32 = arith.constant 0 : i32
    %c0_i32_0 = arith.constant 0 : i32
    %c0_i32_1 = arith.constant 0 : i32
    return %c0_i32, %c0_i32_0 : i32, i32
  }
  func.func @transform_2(%arg0: i32, %arg1: i32) -> (i32, i32) {
    %c0_i32 = arith.constant 0 : i32
    %c0_i32_0 = arith.constant 0 : i32
    %c0_i32_1 = arith.constant 0 : i32
    return %c0_i32, %c0_i32_0 : i32, i32
  }
  func.func @transform_3(%arg0: i32, %arg1: i32) -> (i32, i32, i32, i32) {
    %c0_i32 = arith.constant 0 : i32
    %c0_i32_0 = arith.constant 0 : i32
    %c0_i32_1 = arith.constant 0 : i32
    return %arg0, %arg1, %c0_i32, %c0_i32_0 : i32, i32, i32, i32
  }
}

module attributes {stable_mosaic.version = 11 : i64} {
  func.func @kernel(%arg0: i32, %arg1: i32, %arg2: memref<1x1x256x128xf32, #tpu.memory_space<vmem>>, %arg3: memref<288x128xbf16, #tpu.memory_space<vmem>>, %arg4: memref<1x1x256x32xf32, #tpu.memory_space<vmem>>, %arg5: memref<1x256x32xf32, #tpu.memory_space<vmem>>, %arg6: memref<18x18x32xf32, #tpu.memory_space<vmem>>) attributes {dimension_semantics = [#tpu.dimension_semantics<parallel>, #tpu.dimension_semantics<arbitrary>], iteration_bounds = array<i64: 2, 8>, scalar_prefetch = 0 : i64, scratch_operands = 1 : i64, tpu.core_type = #tpu.core_type<tc>, window_params = [{transform_indices = @transform_0, window_bounds = array<i64: 1, 1, 256, 128>}, {pipeline_mode = #tpu.pipeline_mode<synchronous>, transform_indices = @transform_1, window_bounds = array<i64: 288, 128>}, {transform_indices = @transform_2, window_bounds = array<i64: 1, 1, 256, 32>}, {transform_indices = @transform_3, window_bounds = array<i64: 1, 256, 32>}]} {
    %c0_i32 = arith.constant 0 : i32
    %0 = arith.cmpi eq, %arg1, %c0_i32 : i32
    %1 = arith.extui %0 : i1 to i32
    %c0_i32_0 = arith.constant 0 : i32
    %2 = arith.cmpi ne, %1, %c0_i32_0 : i32
    scf.if %2 {
      %cst_45 = arith.constant 0.000000e+00 : f32
      %46 = vector.broadcast %cst_45 : f32 to vector<18x18x32xf32>
      %c0_46 = arith.constant 0 : index
      %c0_47 = arith.constant 0 : index
      %c0_48 = arith.constant 0 : index
      %47 = vector.load %arg6[%c0_46, %c0_47, %c0_48] : memref<18x18x32xf32, #tpu.memory_space<vmem>>, vector<18x18x32xf32>
      tpu.vector_store %arg6[%c0_46, %c0_47, %c0_48], %46 {strides = array<i32>} : memref<18x18x32xf32, #tpu.memory_space<vmem>>, vector<18x18x32xf32>,
      %cst_49 = arith.constant 0.000000e+00 : f32
      %48 = vector.broadcast %cst_49 : f32 to vector<1x256x32xf32>
      %c0_50 = arith.constant 0 : index
      %c0_51 = arith.constant 0 : index
      %c0_52 = arith.constant 0 : index
      %49 = vector.load %arg5[%c0_50, %c0_51, %c0_52] : memref<1x256x32xf32, #tpu.memory_space<vmem>>, vector<1x256x32xf32>
      tpu.vector_store %arg5[%c0_50, %c0_51, %c0_52], %48 {strides = array<i32>} : memref<1x256x32xf32, #tpu.memory_space<vmem>>, vector<1x256x32xf32>,
    } else {
    }
    %c0 = arith.constant 0 : index
    %c0_1 = arith.constant 0 : index
    %c0_2 = arith.constant 0 : index
    %3 = vector.load %arg6[%c0, %c0_1, %c0_2] : memref<18x18x32xf32, #tpu.memory_space<vmem>>, vector<16x16x32xf32>
    %c0_3 = arith.constant 0 : index
    %c1 = arith.constant 1 : index
    %c0_4 = arith.constant 0 : index
    %4 = vector.load %arg6[%c0_3, %c1, %c0_4] : memref<18x18x32xf32, #tpu.memory_space<vmem>>, vector<16x16x32xf32>
    %c0_5 = arith.constant 0 : index
    %c2 = arith.constant 2 : index
    %c0_6 = arith.constant 0 : index
    %5 = vector.load %arg6[%c0_5, %c2, %c0_6] : memref<18x18x32xf32, #tpu.memory_space<vmem>>, vector<16x16x32xf32>
    %c1_7 = arith.constant 1 : index
    %c0_8 = arith.constant 0 : index
    %c0_9 = arith.constant 0 : index
    %6 = vector.load %arg6[%c1_7, %c0_8, %c0_9] : memref<18x18x32xf32, #tpu.memory_space<vmem>>, vector<16x16x32xf32>
    %c1_10 = arith.constant 1 : index
    %c1_11 = arith.constant 1 : index
    %c0_12 = arith.constant 0 : index
    %7 = vector.load %arg6[%c1_10, %c1_11, %c0_12] : memref<18x18x32xf32, #tpu.memory_space<vmem>>, vector<16x16x32xf32>
    %c1_13 = arith.constant 1 : index
    %c2_14 = arith.constant 2 : index
    %c0_15 = arith.constant 0 : index
    %8 = vector.load %arg6[%c1_13, %c2_14, %c0_15] : memref<18x18x32xf32, #tpu.memory_space<vmem>>, vector<16x16x32xf32>
    %c2_16 = arith.constant 2 : index
    %c0_17 = arith.constant 0 : index
    %c0_18 = arith.constant 0 : index
    %9 = vector.load %arg6[%c2_16, %c0_17, %c0_18] : memref<18x18x32xf32, #tpu.memory_space<vmem>>, vector<16x16x32xf32>
    %c2_19 = arith.constant 2 : index
    %c1_20 = arith.constant 1 : index
    %c0_21 = arith.constant 0 : index
    %10 = vector.load %arg6[%c2_19, %c1_20, %c0_21] : memref<18x18x32xf32, #tpu.memory_space<vmem>>, vector<16x16x32xf32>
    %c2_22 = arith.constant 2 : index
    %c2_23 = arith.constant 2 : index
    %c0_24 = arith.constant 0 : index
    %11 = vector.load %arg6[%c2_22, %c2_23, %c0_24] : memref<18x18x32xf32, #tpu.memory_space<vmem>>, vector<16x16x32xf32>
    %12 = tpu.concatenate %3, %4, %5, %6, %7, %8, %9, %10, %11 in 2 : vector<16x16x32xf32>, vector<16x16x32xf32>, vector<16x16x32xf32>, vector<16x16x32xf32>, vector<16x16x32xf32>, vector<16x16x32xf32>, vector<16x16x32xf32>, vector<16x16x32xf32>, vector<16x16x32xf32> -> vector<16x16x288xf32>
    %13 = vector.shape_cast %12 : vector<16x16x288xf32> to vector<256x288xf32>
    %c0_25 = arith.constant 0 : index
    %c0_26 = arith.constant 0 : index
    %c0_27 = arith.constant 0 : index
    %c0_28 = arith.constant 0 : index
    %14 = vector.load %arg2[%c0_25, %c0_26, %c0_27, %c0_28] : memref<1x1x256x128xf32, #tpu.memory_space<vmem>>, vector<1x1x256x128xf32>
    %15 = vector.shape_cast %14 : vector<1x1x256x128xf32> to vector<256x128xf32>
    %16 = arith.truncf %13 : vector<256x288xf32> to vector<256x288xbf16>
    %c0_29 = arith.constant 0 : index
    %c0_30 = arith.constant 0 : index
    %17 = vector.load %arg3[%c0_29, %c0_30] : memref<288x128xbf16, #tpu.memory_space<vmem>>, vector<288x128xbf16>
    %cst = arith.constant dense<0.000000e+00> : vector<256x128xf32>
    %18 = tpu.matmul %16, %17, %cst {dimension_numbers = #tpu.dot_dimension_numbers<[1], [0], [0], [1], [0, 0, 1, 1], [], []>} : vector<256x288xbf16>, vector<288x128xbf16>, vector<256x128xf32> -> vector<256x128xf32>
    %19 = arith.addf %15, %18 : vector<256x128xf32>
    %20 = vector.extract_strided_slice %19 {offsets = [0, 0], sizes = [256, 96], strides = [1, 1]} : vector<256x128xf32> to vector<256x96xf32>
    %21 = arith.negf %20 : vector<256x96xf32>
    %22 = math.exp %21 : vector<256x96xf32>
    %cst_31 = arith.constant 1.000000e+00 : f32
    %23 = vector.broadcast %cst_31 : f32 to vector<256x96xf32>
    %24 = arith.addf %23, %22 : vector<256x96xf32>
    %25 = arith.divf %23, %24 : vector<256x96xf32>
    %26 = vector.extract_strided_slice %19 {offsets = [0, 96], sizes = [256, 32], strides = [1, 1]} : vector<256x128xf32> to vector<256x32xf32>
    %27 = math.tanh %26 : vector<256x32xf32>
    %28 = vector.extract_strided_slice %25 {offsets = [0, 0], sizes = [256, 32], strides = [1, 1]} : vector<256x96xf32> to vector<256x32xf32>
    %29 = vector.extract_strided_slice %25 {offsets = [0, 32], sizes = [256, 32], strides = [1, 1]} : vector<256x96xf32> to vector<256x32xf32>
    %30 = vector.extract_strided_slice %25 {offsets = [0, 64], sizes = [256, 32], strides = [1, 1]} : vector<256x96xf32> to vector<256x32xf32>
    %c0_32 = arith.constant 0 : index
    %c0_33 = arith.constant 0 : index
    %c0_34 = arith.constant 0 : index
    %31 = vector.load %arg5[%c0_32, %c0_33, %c0_34] : memref<1x256x32xf32, #tpu.memory_space<vmem>>, vector<1x256x32xf32>
    %32 = vector.shape_cast %31 : vector<1x256x32xf32> to vector<256x32xf32>
    %33 = arith.mulf %29, %32 : vector<256x32xf32>
    %34 = arith.mulf %28, %27 : vector<256x32xf32>
    %35 = arith.addf %33, %34 : vector<256x32xf32>
    %36 = math.tanh %35 : vector<256x32xf32>
    %37 = arith.mulf %30, %36 : vector<256x32xf32>
    %c0_35 = arith.constant 0 : index
    %c0_36 = arith.constant 0 : index
    %c0_37 = arith.constant 0 : index
    %38 = vector.load %arg5[%c0_35, %c0_36, %c0_37] : memref<1x256x32xf32, #tpu.memory_space<vmem>>, vector<1x256x32xf32>
    %39 = vector.shape_cast %38 : vector<1x256x32xf32> to vector<256x32xf32>
    %40 = vector.shape_cast %35 : vector<256x32xf32> to vector<1x256x32xf32>
    tpu.vector_store %arg5[%c0_35, %c0_36, %c0_37], %40 {strides = array<i32>} : memref<1x256x32xf32, #tpu.memory_space<vmem>>, vector<1x256x32xf32>,
    %c0_38 = arith.constant 0 : index
    %c0_39 = arith.constant 0 : index
    %c0_40 = arith.constant 0 : index
    %c0_41 = arith.constant 0 : index
    %41 = vector.load %arg4[%c0_38, %c0_39, %c0_40, %c0_41] : memref<1x1x256x32xf32, #tpu.memory_space<vmem>>, vector<1x1x256x32xf32>
    %42 = vector.shape_cast %41 : vector<1x1x256x32xf32> to vector<256x32xf32>
    %43 = vector.shape_cast %37 : vector<256x32xf32> to vector<1x1x256x32xf32>
    tpu.vector_store %arg4[%c0_38, %c0_39, %c0_40, %c0_41], %43 {strides = array<i32>} : memref<1x1x256x32xf32, #tpu.memory_space<vmem>>, vector<1x1x256x32xf32>,
    %44 = vector.shape_cast %37 : vector<256x32xf32> to vector<16x16x32xf32>
    %c1_42 = arith.constant 1 : index
    %c1_43 = arith.constant 1 : index
    %c0_44 = arith.constant 0 : index
    %45 = vector.load %arg6[%c1_42, %c1_43, %c0_44] : memref<18x18x32xf32, #tpu.memory_space<vmem>>, vector<16x16x32xf32>
    tpu.vector_store %arg6[%c1_42, %c1_43, %c0_44], %44 {strides = array<i32>} : memref<18x18x32xf32, #tpu.memory_space<vmem>>, vector<16x16x32xf32>,
    return
  }
  func.func @transform_0(%arg0: i32, %arg1: i32) -> (i32, i32, i32, i32) {
    %c0_i32 = arith.constant 0 : i32
    %c0_i32_0 = arith.constant 0 : i32
    %c0_i32_1 = arith.constant 0 : i32
    return %arg0, %arg1, %c0_i32, %c0_i32_0 : i32, i32, i32, i32
  }
  func.func @transform_1(%arg0: i32, %arg1: i32) -> (i32, i32) {
    %c0_i32 = arith.constant 0 : i32
    %c0_i32_0 = arith.constant 0 : i32
    %c0_i32_1 = arith.constant 0 : i32
    return %c0_i32, %c0_i32_0 : i32, i32
  }
  func.func @transform_2(%arg0: i32, %arg1: i32) -> (i32, i32, i32, i32) {
    %c0_i32 = arith.constant 0 : i32
    %c0_i32_0 = arith.constant 0 : i32
    %c0_i32_1 = arith.constant 0 : i32
    return %arg0, %arg1, %c0_i32, %c0_i32_0 : i32, i32, i32, i32
  }
  func.func @transform_3(%arg0: i32, %arg1: i32) -> (i32, i32, i32) {
    %c0_i32 = arith.constant 0 : i32
    %c0_i32_0 = arith.constant 0 : i32
    %c0_i32_1 = arith.constant 0 : i32
    return %arg0, %c0_i32, %c0_i32_0 : i32, i32, i32
  }
}

module attributes {stable_mosaic.version = 11 : i64} {
  func.func @_xconv_kernel(%arg0: i32, %arg1: i32, %arg2: memref<1x1x256x288xbf16, #tpu.memory_space<vmem>>, %arg3: memref<288x128xbf16, #tpu.memory_space<vmem>>, %arg4: memref<1x128xf32, #tpu.memory_space<vmem>>, %arg5: memref<1x1x256x128xf32, #tpu.memory_space<vmem>>) attributes {dimension_semantics = [#tpu.dimension_semantics<parallel>, #tpu.dimension_semantics<parallel>], iteration_bounds = array<i64: 2, 8>, scalar_prefetch = 0 : i64, scratch_operands = 0 : i64, tpu.core_type = #tpu.core_type<tc>, window_params = [{transform_indices = @transform_0, window_bounds = array<i64: 1, 1, 256, 288>}, {pipeline_mode = #tpu.pipeline_mode<synchronous>, transform_indices = @transform_1, window_bounds = array<i64: 288, 128>}, {pipeline_mode = #tpu.pipeline_mode<synchronous>, transform_indices = @transform_2, window_bounds = array<i64: 1, 128>}, {transform_indices = @transform_3, window_bounds = array<i64: 1, 1, 256, 128>}]} {
    %c0 = arith.constant 0 : index
    %c0_0 = arith.constant 0 : index
    %c0_1 = arith.constant 0 : index
    %c0_2 = arith.constant 0 : index
    %0 = vector.load %arg2[%c0, %c0_0, %c0_1, %c0_2] : memref<1x1x256x288xbf16, #tpu.memory_space<vmem>>, vector<1x1x256x288xbf16>
    %1 = vector.shape_cast %0 : vector<1x1x256x288xbf16> to vector<256x288xbf16>
    %c0_3 = arith.constant 0 : index
    %c0_4 = arith.constant 0 : index
    %2 = vector.load %arg3[%c0_3, %c0_4] : memref<288x128xbf16, #tpu.memory_space<vmem>>, vector<288x128xbf16>
    %cst = arith.constant dense<0.000000e+00> : vector<256x128xf32>
    %3 = tpu.matmul %1, %2, %cst {dimension_numbers = #tpu.dot_dimension_numbers<[1], [0], [0], [1], [0, 0, 1, 1], [], []>} : vector<256x288xbf16>, vector<288x128xbf16>, vector<256x128xf32> -> vector<256x128xf32>
    %c0_5 = arith.constant 0 : index
    %c0_6 = arith.constant 0 : index
    %4 = vector.load %arg4[%c0_5, %c0_6] : memref<1x128xf32, #tpu.memory_space<vmem>>, vector<1x128xf32>
    %5 = vector.broadcast %4 : vector<1x128xf32> to vector<256x128xf32>
    %6 = arith.addf %3, %5 : vector<256x128xf32>
    %c0_7 = arith.constant 0 : index
    %c0_8 = arith.constant 0 : index
    %c0_9 = arith.constant 0 : index
    %c0_10 = arith.constant 0 : index
    %7 = vector.load %arg5[%c0_7, %c0_8, %c0_9, %c0_10] : memref<1x1x256x128xf32, #tpu.memory_space<vmem>>, vector<1x1x256x128xf32>
    %8 = vector.shape_cast %7 : vector<1x1x256x128xf32> to vector<256x128xf32>
    %9 = vector.shape_cast %6 : vector<256x128xf32> to vector<1x1x256x128xf32>
    tpu.vector_store %arg5[%c0_7, %c0_8, %c0_9, %c0_10], %9 {strides = array<i32>} : memref<1x1x256x128xf32, #tpu.memory_space<vmem>>, vector<1x1x256x128xf32>,
    return
  }
  func.func @transform_0(%arg0: i32, %arg1: i32) -> (i32, i32, i32, i32) {
    %c0_i32 = arith.constant 0 : i32
    %c0_i32_0 = arith.constant 0 : i32
    %c0_i32_1 = arith.constant 0 : i32
    return %arg0, %arg1, %c0_i32, %c0_i32_0 : i32, i32, i32, i32
  }
  func.func @transform_1(%arg0: i32, %arg1: i32) -> (i32, i32) {
    %c0_i32 = arith.constant 0 : i32
    %c0_i32_0 = arith.constant 0 : i32
    %c0_i32_1 = arith.constant 0 : i32
    return %c0_i32, %c0_i32_0 : i32, i32
  }
  func.func @transform_2(%arg0: i32, %arg1: i32) -> (i32, i32) {
    %c0_i32 = arith.constant 0 : i32
    %c0_i32_0 = arith.constant 0 : i32
    %c0_i32_1 = arith.constant 0 : i32
    return %c0_i32, %c0_i32_0 : i32, i32
  }
  func.func @transform_3(%arg0: i32, %arg1: i32) -> (i32, i32, i32, i32) {
    %c0_i32 = arith.constant 0 : i32
    %c0_i32_0 = arith.constant 0 : i32
    %c0_i32_1 = arith.constant 0 : i32
    return %arg0, %arg1, %c0_i32, %c0_i32_0 : i32, i32, i32, i32
  }
}

</mosaic_0001>

<bundles_post_ra>
// kernel: _convlstm_forward.4
= control target key start
LH: loop header
LB: loop body
LE: loop exit
PB: predicated region body
PF: predicated region fallthrough
CT: control target
= control target key end

     0   :  { %s921_s12 = smov 0   ;;  %s923_s13 = smov 0   ;;  %s1090_s0 = inlined_call_operand.vmem [shape: bf16[2,8,256,36], index: 0, kind: input, shape index: {}]   ;;  %s1091_s1 = inlined_call_operand.vmem [shape: bf16[36,128], index: 1, kind: input, shape index: {}]   ;;  %s1092_s2 = inlined_call_operand.vmem [shape: f32[1,128], index: 2, kind: input, shape index: {}]   ;;  %s1093_s3 = inlined_call_operand.vmem [shape: f32[2,8,256,128], index: 3, kind: output, shape index: {}]  }
   0x1   :  { %s925_s14 = smov 0   ;;  %s927_s15 = smov 0  }
   0x2   :  { %s929_s16 = smov 0  }
   0x3 LB: > { %s22_s17 = sadd.s32 1, %s891_s14  ;;  %s25_s18 = sadd.s32 1, %s895_s15  ;;  %s899_s16 = sphi %s929_s16, %s13_s16   ;;  %s895_s15 = sphi %s927_s15, %s1097_s15   ;;  %s891_s14 = sphi %s925_s14, %s1096_s14   ;;  %s887_s13 = sphi %s923_s13, %s1095_s13   ;;  %s883_s12 = sphi %s921_s12, %s1094_s12  }
   0x4   : > { %p23_p0 = scmp.ge.s32.totalorder %s22_s17, 8  ;;  %p692_p1 = scmp.ge.s32.totalorder %s899_s16, 1 }
   0x5   : > { %p157_p2 = scmp.lt.s32.totalorder %s899_s16, 17 }
   0x6   : > { %s1099_s17 = smov (%p23_p0, %s22_s17), 0  ;;  %s1101_s18 = smov (!%p23_p0, %s25_s18), %s895_s15 }
   0x7   : > { %p158_p3 = pnand %p692_p1, %p157_p2  ;;  %p27_p4 = scmp.ge.s32.totalorder %s1101_s18, 2 }
   0x8   : > { %v842_v0 = vld [vmem:[%s1091_s1] sm:$0xff] (!%p158_p3)   ;;  %v843_v1 = vld [vmem:[%s1091_s1 + $0x8] sm:$0xff] (!%p158_p3)   ;;  %p189_p5 = scmp.lt.s32.totalorder (!%p158_p3), %s887_s13, 1  ;;  %p191_p6 = scmp.lt.s32.totalorder (!%p158_p3), %s883_s12, 7  ;;  %vm396_vm0 = vcmask (!%p158_p3), 1041408   ;;  %vm347_vm1 = vcmask (!%p158_p3), 293888  }
   0x9   : > { %s1103_s18 = smov (%p27_p4, %s1101_s18), 0  ;;  %161 = sbr.rel (%p158_p3) target bundleno = 266 (0x10a), region = 32 }
   0xa   : > { %756 = vmatprep.subr.bf16.mxu0 (!%p158_p3), %v842_v0  ;;  %794 = vmatprep.subr.bf16.mxu1 (!%p158_p3), %v842_v0  ;;  %v844_v2 = vld [vmem:[%s1091_s1 + $0x10] ss:$0 sps:$4 sm:$0x33] (!%p158_p3)   ;;  %v1004_v20 = vld [vmem:[%s1092_s2] ss:$0 sm:$0xff] (!%p158_p3) }
   0xb   : > { %757 = vmatpush3.bf16.msra.mxu0 (!%p158_p3), %v842_v0  ;;  %797 = vmatpush3.bf16.msra.mxu1 (!%p158_p3), %v842_v0  ;;  %v398_v3 = vsel (!%p158_p3), %vm396_vm0, %v844_v2, 0 }
   0xc   : > { %758 = vmatprep.subr.bf16.mxu0 (!%p158_p3), %v843_v1  ;;  %795 = vmatprep.subr.bf16.mxu1 (!%p158_p3), %v843_v1 }
   0xf   : > { %759 = vmatpush3.bf16.msra.mxu0 (!%p158_p3), %v843_v1  ;;  %798 = vmatpush3.bf16.msra.mxu1 (!%p158_p3), %v843_v1 }
  0x10   : > { %s1105_s13 = smov (!%p189_p5, %s887_s13), 1  ;;  %s1107_s12 = smov (!%p191_p6, %s883_s12), 7  ;;  %800 = vmatprep.subr.msk.bf16.mxu0 %vm396_vm0, %v844_v2  ;;  %801 = vmatprep.subr.msk.bf16.mxu1 %vm396_vm0, %v844_v2 }
  0x11   : > { %s694_s25 = sshll.u32 %s1105_s13, 8  ;;  %s693_s26 = sshll.u32 %s1107_s12, 5 }
  0x12   : > { %s960_s27 = sadd.s32 %s694_s25, %s693_s26 }
  0x13   : > { %s695_s28 = sshll.u32 %s960_s27, 2  ;;  %761 = vmatpush3.bf16.msra.mxu0 %v398_v3  ;;  %799 = vmatpush3.bf16.msra.mxu1 %v398_v3  ;;  %s698_s5 = sshll.u32 %s960_s27, 3 }
  0x14   : > { %s966_s4 = scalar_lea.vmem %s1090_s0, %s695_s28  ;;  %s1009_s10 = scalar_lea.vmem %s1093_s3, %s698_s5 }
  0x15   : > { %v845_v4 = vld [vmem:[%s966_s4] sm:$0xff]   ;;  %v847_v6 = vld [vmem:[%s966_s4 + $0x8] sm:$0xff]   ;;  %v849_v8 = vld [vmem:[%s966_s4 + $0x10] sm:$0xff]  }
  0x16   : > { %v846_v5 = vld [vmem:[%s966_s4 + $0x40] sm:$0xff]   ;;  %762 = vmatprep.mubr.msk.bf16.mxu0 %vm347_vm1, %v845_v4  ;;  %v848_v7 = vld [vmem:[%s966_s4 + $0x48] sm:$0xff]   ;;  %v850_v9 = vld [vmem:[%s966_s4 + $0x50] sm:$0xff]  }
  0x17   : > { %778 = vmatprep.mubr.msk.bf16.mxu1 %vm347_vm1, %v846_v5  ;;  %763 = vmatmul.mubr.msk.bf16.vlgmr.msra.gmra.mrb[0].mxu0 %vm347_vm1, %v847_v6  ;;  %v851_v10 = vld [vmem:[%s966_s4 + $0x18] sm:$0xff]   ;;  %v853_v12 = vld [vmem:[%s966_s4 + $0x20] sm:$0xff]   ;;  %v855_v14 = vld [vmem:[%s966_s4 + $0x28] sm:$0xff]  }
  0x18   : > { %779 = vmatmul.mubr.msk.bf16.vlgmr.msra.gmra.mrb[0].mxu1 %vm347_vm1, %v848_v7  ;;  %766 = vmatprep.mubr.msk.bf16.mxu0 %vm347_vm1, %v849_v8  ;;  %v852_v11 = vld [vmem:[%s966_s4 + $0x58] sm:$0xff]   ;;  %v854_v13 = vld [vmem:[%s966_s4 + $0x60] sm:$0xff]   ;;  %v856_v15 = vld [vmem:[%s966_s4 + $0x68] sm:$0xff]  }
  0x19   : > { %782 = vmatprep.mubr.msk.bf16.mxu1 %vm347_vm1, %v850_v9  ;;  %v857_v16 = vld [vmem:[%s966_s4 + $0x30] sm:$0xff]   ;;  %v859_v18 = vld [vmem:[%s966_s4 + $0x38] sm:$0xff]  }
  0x1a   : > { %v858_v17 = vld [vmem:[%s966_s4 + $0x70] sm:$0xff]   ;;  %v860_v19 = vld [vmem:[%s966_s4 + $0x78] sm:$0xff]  }
  0x1f   : > { %767 = vmatmul.mubr.msk.bf16.gmra.mrb[4].mxu0 %vm347_vm1, %v851_v10 }
  0x20   : > { %783 = vmatmul.mubr.msk.bf16.gmra.mrb[4].mxu1 %vm347_vm1, %v852_v11  ;;  %770 = vmatprep.mubr.msk.bf16.mxu0 %vm347_vm1, %v853_v12 }
  0x21   : > { %786 = vmatprep.mubr.msk.bf16.mxu1 %vm347_vm1, %v854_v13 }
  0x27   : > { %771 = vmatmul.mubr.msk.bf16.gmra.mrb[8].mxu0 %vm347_vm1, %v855_v14 }
  0x28   : > { %787 = vmatmul.mubr.msk.bf16.gmra.mrb[8].mxu1 %vm347_vm1, %v856_v15  ;;  %774 = vmatprep.mubr.msk.bf16.mxu0 %vm347_vm1, %v857_v16 }
  0x29   : > { %790 = vmatprep.mubr.msk.bf16.mxu1 %vm347_vm1, %v858_v17 }
  0x2f   : > { %775 = vmatmul.mubr.msk.bf16.gmra.mrb[12].mxu0 %vm347_vm1, %v859_v18 }
  0x30   : > { %791 = vmatmul.mubr.msk.bf16.gmra.mrb[12].mxu1 %vm347_vm1, %v860_v19 }
  0xea   : > { %v764_v21 = vpop.f32.mrb[0].mxu0 }
  0xeb   : > { %v443_v22 = vadd.f32 %v764_v21, %v1004_v20  ;;  %v780_v23 = vpop.f32.mrb[0].mxu1  ;;  %v434_v24 = vpop.f32.mrb[1].mxu0 }
  0xec   : > { %v507_v25 = vadd.f32 %v780_v23, %v1004_v20  ;;  %v435_v26 = vadd.f32 %v1004_v20, %v434_v24  ;;  %v498_v27 = vpop.f32.mrb[1].mxu1  ;;  %v765_v28 = vpop.f32.mrb[2].mxu0 }
  0xed   : > { %563 = vst [vmem:[%s1009_s10 + $0x10] sm:$0xff] %v443_v22  ;;  %v499_v29 = vadd.f32 %v1004_v20, %v498_v27  ;;  %v446_v30 = vadd.f32 %v765_v28, %v1004_v20  ;;  %v781_v31 = vpop.f32.mrb[2].mxu1  ;;  %v437_v32 = vpop.f32.mrb[3].mxu0 }
  0xee   : > { %579 = vst [vmem:[%s1009_s10 + $0x90] sm:$0xff] %v507_v25  ;;  %561 = vst [vmem:[%s1009_s10] sm:$0xff] %v435_v26  ;;  %v510_v33 = vadd.f32 %v781_v31, %v1004_v20  ;;  %v438_v34 = vadd.f32 %v1004_v20, %v437_v32  ;;  %v501_v35 = vpop.f32.mrb[3].mxu1 }
  0xef   : > { %577 = vst [vmem:[%s1009_s10 + $0x80] sm:$0xff] %v499_v29  ;;  %564 = vst [vmem:[%s1009_s10 + $0x18] sm:$0xff] %v446_v30  ;;  %v502_v36 = vadd.f32 %v1004_v20, %v501_v35 }
  0xf0   : > { %580 = vst [vmem:[%s1009_s10 + $0x98] sm:$0xff] %v510_v33  ;;  %562 = vst [vmem:[%s1009_s10 + $0x8] sm:$0xff] %v438_v34 }
  0xf1   : > { %578 = vst [vmem:[%s1009_s10 + $0x88] sm:$0xff] %v502_v36 }
  0xf2   : > { %v768_v37 = vpop.f32.mrb[4].mxu0 }
  0xf3   : > { %v459_v38 = vadd.f32 %v768_v37, %v1004_v20  ;;  %v784_v39 = vpop.f32.mrb[4].mxu1  ;;  %v450_v40 = vpop.f32.mrb[5].mxu0 }
  0xf4   : > { %v523_v41 = vadd.f32 %v784_v39, %v1004_v20  ;;  %v451_v42 = vadd.f32 %v1004_v20, %v450_v40  ;;  %v514_v43 = vpop.f32.mrb[5].mxu1  ;;  %v769_v44 = vpop.f32.mrb[6].mxu0 }
  0xf5   : > { %567 = vst [vmem:[%s1009_s10 + $0x30] sm:$0xff] %v459_v38  ;;  %v515_v45 = vadd.f32 %v1004_v20, %v514_v43  ;;  %v462_v46 = vadd.f32 %v769_v44, %v1004_v20  ;;  %v785_v47 = vpop.f32.mrb[6].mxu1  ;;  %v453_v48 = vpop.f32.mrb[7].mxu0 }
  0xf6   : > { %583 = vst [vmem:[%s1009_s10 + $0xb0] sm:$0xff] %v523_v41  ;;  %565 = vst [vmem:[%s1009_s10 + $0x20] sm:$0xff] %v451_v42  ;;  %v526_v49 = vadd.f32 %v785_v47, %v1004_v20  ;;  %v454_v50 = vadd.f32 %v1004_v20, %v453_v48  ;;  %v517_v51 = vpop.f32.mrb[7].mxu1 }
  0xf7   : > { %581 = vst [vmem:[%s1009_s10 + $0xa0] sm:$0xff] %v515_v45  ;;  %568 = vst [vmem:[%s1009_s10 + $0x38] sm:$0xff] %v462_v46  ;;  %v518_v52 = vadd.f32 %v1004_v20, %v517_v51 }
  0xf8   : > { %584 = vst [vmem:[%s1009_s10 + $0xb8] sm:$0xff] %v526_v49  ;;  %566 = vst [vmem:[%s1009_s10 + $0x28] sm:$0xff] %v454_v50 }
  0xf9   : > { %582 = vst [vmem:[%s1009_s10 + $0xa8] sm:$0xff] %v518_v52 }
  0xfa   : > { %v772_v53 = vpop.f32.mrb[8].mxu0 }
  0xfb   : > { %v475_v54 = vadd.f32 %v772_v53, %v1004_v20  ;;  %v788_v55 = vpop.f32.mrb[8].mxu1  ;;  %v466_v56 = vpop.f32.mrb[9].mxu0 }
  0xfc   : > { %v539_v57 = vadd.f32 %v788_v55, %v1004_v20  ;;  %v467_v58 = vadd.f32 %v1004_v20, %v466_v56  ;;  %v530_v59 = vpop.f32.mrb[9].mxu1  ;;  %v773_v60 = vpop.f32.mrb[10].mxu0 }
  0xfd   : > { %571 = vst [vmem:[%s1009_s10 + $0x50] sm:$0xff] %v475_v54  ;;  %v531_v61 = vadd.f32 %v1004_v20, %v530_v59  ;;  %v478_v62 = vadd.f32 %v773_v60, %v1004_v20  ;;  %v789_v63 = vpop.f32.mrb[10].mxu1  ;;  %v469_v0 = vpop.f32.mrb[11].mxu0 }
  0xfe   : > { %587 = vst [vmem:[%s1009_s10 + $0xd0] sm:$0xff] %v539_v57  ;;  %569 = vst [vmem:[%s1009_s10 + $0x40] sm:$0xff] %v467_v58  ;;  %v542_v1 = vadd.f32 %v789_v63, %v1004_v20  ;;  %v470_v2 = vadd.f32 %v1004_v20, %v469_v0  ;;  %v533_v3 = vpop.f32.mrb[11].mxu1 }
  0xff   : > { %585 = vst [vmem:[%s1009_s10 + $0xc0] sm:$0xff] %v531_v61  ;;  %572 = vst [vmem:[%s1009_s10 + $0x58] sm:$0xff] %v478_v62  ;;  %v534_v4 = vadd.f32 %v1004_v20, %v533_v3 }
 0x100   : > { %588 = vst [vmem:[%s1009_s10 + $0xd8] sm:$0xff] %v542_v1  ;;  %570 = vst [vmem:[%s1009_s10 + $0x48] sm:$0xff] %v470_v2 }
 0x101   : > { %586 = vst [vmem:[%s1009_s10 + $0xc8] sm:$0xff] %v534_v4 }
 0x102   : > { %v776_v5 = vpop.f32.mrb[12].mxu0 }
 0x103   : > { %v491_v6 = vadd.f32 %v776_v5, %v1004_v20  ;;  %v792_v7 = vpop.f32.mrb[12].mxu1  ;;  %v482_v8 = vpop.f32.mrb[13].mxu0 }
 0x104   : > { %v555_v9 = vadd.f32 %v792_v7, %v1004_v20  ;;  %v483_v10 = vadd.f32 %v1004_v20, %v482_v8  ;;  %v546_v11 = vpop.f32.mrb[13].mxu1  ;;  %v777_v12 = vpop.f32.mrb[14].mxu0 }
 0x105   : > { %575 = vst [vmem:[%s1009_s10 + $0x70] sm:$0xff] %v491_v6  ;;  %v547_v13 = vadd.f32 %v1004_v20, %v546_v11  ;;  %v494_v14 = vadd.f32 %v777_v12, %v1004_v20  ;;  %v793_v15 = vpop.f32.mrb[14].mxu1  ;;  %v485_v16 = vpop.f32.mrb[15].mxu0 }
 0x106   : > { %591 = vst [vmem:[%s1009_s10 + $0xf0] sm:$0xff] %v555_v9  ;;  %573 = vst [vmem:[%s1009_s10 + $0x60] sm:$0xff] %v483_v10  ;;  %v558_v17 = vadd.f32 %v793_v15, %v1004_v20  ;;  %v486_v18 = vadd.f32 %v1004_v20, %v485_v16  ;;  %v549_v19 = vpop.f32.mrb[15].mxu1 }
 0x107   : > { %589 = vst [vmem:[%s1009_s10 + $0xe0] sm:$0xff] %v547_v13  ;;  %576 = vst [vmem:[%s1009_s10 + $0x78] sm:$0xff] %v494_v14  ;;  %v550_v21 = vadd.f32 %v1004_v20, %v549_v19 }
 0x108   : > { %592 = vst [vmem:[%s1009_s10 + $0xf8] sm:$0xff] %v558_v17  ;;  %574 = vst [vmem:[%s1009_s10 + $0x68] sm:$0xff] %v486_v18 }
 0x109   : > { %590 = vst [vmem:[%s1009_s10 + $0xe8] sm:$0xff] %v550_v21 }
 0x10a PF: > { %s13_s16 = sadd.s32 1, %s899_s16   ;;  %s1094_s12 = smov %s891_s14 }
 0x10b   : > { %p10_p7 = scmp.ge.s32.totalorder %s13_s16, 18   ;;  %s1095_s13 = smov %s895_s15 }
 0x10c   : > { %s1096_s14 = smov %s1099_s17  ;;  %s1097_s15 = smov %s1103_s18 }
 0x10d   :  { %12 = sbr.rel (!%p10_p7) target bundleno = 3 (0x3), region = 62 }

// kernel: _convlstm_forward.5
= control target key start
LH: loop header
LB: loop body
LE: loop exit
PB: predicated region body
PF: predicated region fallthrough
CT: control target
= control target key end

     0   :  { %9 = vsyncpa [#allocation4], 0  ;;  %s6718_s0 = inlined_call_operand.vmem [shape: f32[2,8,256,128], index: 0, kind: input, shape index: {}]   ;;  %s6719_s1 = inlined_call_operand.vmem [shape: bf16[288,128], index: 1, kind: input, shape index: {}]   ;;  %s6720_s2 = inlined_call_operand.vmem [shape: f32[2,8,256,32], index: 2, kind: output, shape index: {0}]   ;;  %s6721_s3 = inlined_call_operand.hbm [shape: f32[2,256,32], index: 3, kind: output, shape index: {1}]  }
   0x1   :  { %11 = vsyncpa [#allocation4 + $0x1], 0  ;;  %s4850_s12 = smov 0   ;;  %s4852_s13 = smov 0  }
   0x2   :  { %s4854_s14 = smov 0   ;;  %s4856_s15 = smov 0  }
   0x3   :  { %s4858_s16 = smov 0   ;;  %s4860_s17 = smov 0  }
   0x4   :  { %s4862_s18 = smov 0   ;;  %s4864_s19 = smov 0  }
   0x5 LB: > { %s3619_s20 = sadd.s32 4294967295, %s4821_s19   ;;  %s3620_s21 = sadd.s32 4294967294, %s4821_s19   ;;  %s4821_s19 = sphi %s4864_s19, %s17_s19   ;;  %s4817_s18 = sphi %s4862_s18, %s6811_s18   ;;  %s4813_s17 = sphi %s4860_s17, %s6810_s17   ;;  %s4809_s16 = sphi %s4858_s16, %s6809_s16   ;;  %s4805_s15 = sphi %s4856_s15, %s6808_s15   ;;  %s4801_s14 = sphi %s4854_s14, %s6807_s14   ;;  %s4797_s13 = sphi %s4852_s13, %s6806_s13   ;;  %s4793_s12 = sphi %s4850_s12, %s6805_s12  }
   0x6   : > { %s26_s22 = sadd.s32 1, %s4813_s17  ;;  %s29_s23 = sadd.s32 1, %s4817_s18 }
   0x7   : > { %p27_p0 = scmp.ge.s32.totalorder %s26_s22, 8  ;;  %p123_p1 = scmp.ne.s32.totalorder %s4801_s14, %s4797_s13 }
   0x8   : > { %p124_p2 = scmp.eq.s32.totalorder %s3619_s20, 15  ;;  %p129_p4 = scmp.ne.s32.totalorder %s4797_s13, %s4793_s12 }
   0x9   : > { %s6813_s22 = smov (%p27_p0, %s26_s22), 0  ;;  %s6815_s23 = smov (!%p27_p0, %s29_s23), %s4817_s18 }
   0xa   : > { %p4899_p3 = por %p124_p2, %p123_p1  ;;  %p31_p5 = scmp.ge.s32.totalorder %s6815_s23, 2 }
   0xb   : > { %p130_p6 = scmp.eq.s32.totalorder %s3620_s21, 15  ;;  %p3623_p7 = scmp.ge.s32.totalorder %s4821_s19, 1 }
   0xc   : > { %p163_p8 = scmp.lt.s32.totalorder %s4821_s19, 17  ;;  %s6817_s23 = smov (%p31_p5, %s6815_s23), 0 }
   0xd   : > { %6748 = sst [smem:[#allocation6_spill]] %s6817_s23  ;;  %p4909_p9 = por %p130_p6, %p129_p4 }
   0xe   : > { %p164_p10 = pnand %p3623_p7, %p163_p8  ;;  %s110_s26 = ssub.s32 %s4817_s18, %s6817_s23 }
   0xf   : > { %s113_s27 = sadd.s32 1, %s4801_s14  ;;  %p111_p11 = scmp.eq.s32.totalorder %s110_s26, 0 }
  0x10   : > { %167 = sbr.rel (%p164_p10) target bundleno = 1169 (0x491), region = 28 }
  0x11   : > { %s4917_s28 = scalar_select %p111_p11, %s4801_s14, %s113_s27  }
  0x17   : > { %s197_s29 = sand.u32 1, %s4797_s13   ;;  %p200_p12 = scmp.lt.s32.totalorder %s4809_s16, 1 }
  0x18   : > { %s3624_s30 = sshll.u32 %s197_s29, 8  ;;  %p202_p13 = scmp.lt.s32.totalorder %s4805_s15, 7 }
  0x19   : > { %s201_s4 = scalar_select %p200_p12, %s4809_s16, 1 }
  0x1a   : > { %s203_s5 = scalar_select %p202_p13, %s4805_s15, 7 }
  0x1b   : > { %s3626_s6 = sshll.u32 %s201_s4, 8  ;;  %s4936_s23 = scalar_lea.vmem [#allocation3], %s3624_s30 }
  0x1c   : > { %s3625_s7 = sshll.u32 %s203_s5, 5  ;;  %p3631_p0 = scmp.ne.s32.totalorder %s4805_s15, 0 }
  0x1d   : > { %s206_s8 = sadd.s32 %s3626_s6, %s3625_s7  ;;  %vm223_vm0 = vcmask (!%p3631_p0), 261120   ;;  %vm226_vm1 = vcmask (!%p3631_p0), 254976   ;;  %v4823_v0 = vmov (!%p3631_p0), 0.0  }
  0x1e   : > { %s3627_s9 = sshll.u32 %s206_s8, 3  ;;  %222 = sbr.rel (%p3631_p0) target bundleno = 73 (0x49), region = 32  ;;  %224 = vst.msk [vmem:[#allocation2] sm:$0xff] (!%p3631_p0), %vm223_vm0, %v4823_v0  ;;  %225 = vst.msk [vmem:[#allocation2 + $0x8] sm:$0xff] (!%p3631_p0), %vm223_vm0, %v4823_v0 }
  0x1f   : > { %s4929_s20 = scalar_lea.vmem %s6718_s0, %s3627_s9  ;;  %s4934_s27 = scalar_lea.vmem %s6720_s2, %s3627_s9  ;;  %228 = vst.msk [vmem:[#allocation2 + $0x18] sm:$0xff] (!%p3631_p0), %vm223_vm0, %v4823_v0  ;;  %229 = vst.msk [vmem:[#allocation2 + $0x20] sm:$0xff] (!%p3631_p0), %vm223_vm0, %v4823_v0 }
  0x20   : > { %231 = vst.msk [vmem:[#allocation2 + $0x30] sm:$0xff] (!%p3631_p0), %vm223_vm0, %v4823_v0  ;;  %232 = vst.msk [vmem:[#allocation2 + $0x38] sm:$0xff] (!%p3631_p0), %vm223_vm0, %v4823_v0 }
  0x21   : > { %234 = vst.msk [vmem:[#allocation2 + $0x48] sm:$0xff] (!%p3631_p0), %vm223_vm0, %v4823_v0  ;;  %235 = vst.msk [vmem:[#allocation2 + $0x50] sm:$0xff] (!%p3631_p0), %vm223_vm0, %v4823_v0 }
  0x22   : > { %237 = vst.msk [vmem:[#allocation2 + $0x60] sm:$0xff] (!%p3631_p0), %vm223_vm0, %v4823_v0  ;;  %238 = vst.msk [vmem:[#allocation2 + $0x68] sm:$0xff] (!%p3631_p0), %vm223_vm0, %v4823_v0 }
  0x23   : > { %240 = vst.msk [vmem:[#allocation2 + $0x78] sm:$0xff] (!%p3631_p0), %vm223_vm0, %v4823_v0  ;;  %241 = vst.msk [vmem:[#allocation2 + $0x80] sm:$0xff] (!%p3631_p0), %vm223_vm0, %v4823_v0 }
  0x24   : > { %243 = vst.msk [vmem:[#allocation2 + $0x90] sm:$0xff] (!%p3631_p0), %vm223_vm0, %v4823_v0  ;;  %244 = vst.msk [vmem:[#allocation2 + $0x98] sm:$0xff] (!%p3631_p0), %vm223_vm0, %v4823_v0 }
  0x25   : > { %246 = vst.msk [vmem:[#allocation2 + $0xa8] sm:$0xff] %vm223_vm0, %v4823_v0  ;;  %247 = vst.msk [vmem:[#allocation2 + $0xb0] sm:$0xff] %vm223_vm0, %v4823_v0 }
  0x26   : > { %249 = vst.msk [vmem:[#allocation2 + $0xc0] sm:$0xff] %vm223_vm0, %v4823_v0  ;;  %250 = vst.msk [vmem:[#allocation2 + $0xc8] sm:$0xff] %vm223_vm0, %v4823_v0 }
  0x27   : > { %252 = vst.msk [vmem:[#allocation2 + $0xd8] sm:$0xff] %vm223_vm0, %v4823_v0  ;;  %253 = vst.msk [vmem:[#allocation2 + $0xe0] sm:$0xff] %vm223_vm0, %v4823_v0 }
  0x28   : > { %255 = vst.msk [vmem:[#allocation2 + $0xf0] sm:$0xff] %vm223_vm0, %v4823_v0  ;;  %256 = vst.msk [vmem:[#allocation2 + $0xf8] sm:$0xff] %vm223_vm0, %v4823_v0 }
  0x29   : > { %258 = vst.msk [vmem:[#allocation2 + $0x108] sm:$0xff] %vm223_vm0, %v4823_v0  ;;  %259 = vst.msk [vmem:[#allocation2 + $0x110] sm:$0xff] %vm223_vm0, %v4823_v0 }
  0x2a   : > { %261 = vst.msk [vmem:[#allocation2 + $0x120] sm:$0xff] %vm223_vm0, %v4823_v0  ;;  %262 = vst.msk [vmem:[#allocation2 + $0x128] sm:$0xff] %vm223_vm0, %v4823_v0 }
  0x2b   : > { %264 = vst.msk [vmem:[#allocation2 + $0x138] sm:$0xff] %vm223_vm0, %v4823_v0  ;;  %265 = vst.msk [vmem:[#allocation2 + $0x140] sm:$0xff] %vm223_vm0, %v4823_v0 }
  0x2c   : > { %267 = vst.msk [vmem:[#allocation2 + $0x150] sm:$0xff] %vm223_vm0, %v4823_v0  ;;  %268 = vst.msk [vmem:[#allocation2 + $0x158] sm:$0xff] %vm223_vm0, %v4823_v0 }
  0x2d   : > { %270 = vst.msk [vmem:[#allocation2 + $0x168] sm:$0xff] %vm223_vm0, %v4823_v0  ;;  %271 = vst.msk [vmem:[#allocation2 + $0x170] sm:$0xff] %vm223_vm0, %v4823_v0 }
  0x2e   : > { %273 = vst.msk [vmem:[#allocation2 + $0x180] sm:$0xff] %vm223_vm0, %v4823_v0  ;;  %274 = vst.msk [vmem:[#allocation2 + $0x188] sm:$0xff] %vm223_vm0, %v4823_v0 }
  0x2f   : > { %276 = vst.msk [vmem:[#allocation2 + $0x198] sm:$0xff] %vm223_vm0, %v4823_v0  ;;  %277 = vst.msk [vmem:[#allocation2 + $0x1a0] sm:$0xff] %vm223_vm0, %v4823_v0 }
  0x30   : > { %279 = vst.msk [vmem:[%s4936_s23] sm:$0xff] %vm223_vm0, %v4823_v0  ;;  %280 = vst.msk [vmem:[%s4936_s23 + $0x8] sm:$0xff] %vm223_vm0, %v4823_v0 }
  0x31   : > { %281 = vst.msk [vmem:[%s4936_s23 + $0x10] sm:$0xff] %vm223_vm0, %v4823_v0  ;;  %282 = vst.msk [vmem:[%s4936_s23 + $0x18] sm:$0xff] %vm223_vm0, %v4823_v0 }
  0x32   : > { %283 = vst.msk [vmem:[%s4936_s23 + $0x20] sm:$0xff] %vm223_vm0, %v4823_v0  ;;  %284 = vst.msk [vmem:[%s4936_s23 + $0x28] sm:$0xff] %vm223_vm0, %v4823_v0 }
  0x33   : > { %285 = vst.msk [vmem:[%s4936_s23 + $0x30] sm:$0xff] %vm223_vm0, %v4823_v0  ;;  %286 = vst.msk [vmem:[%s4936_s23 + $0x38] sm:$0xff] %vm223_vm0, %v4823_v0 }
  0x34   : > { %287 = vst.msk [vmem:[%s4936_s23 + $0x40] sm:$0xff] %vm223_vm0, %v4823_v0  ;;  %288 = vst.msk [vmem:[%s4936_s23 + $0x48] sm:$0xff] %vm223_vm0, %v4823_v0 }
  0x35   : > { %289 = vst.msk [vmem:[%s4936_s23 + $0x50] sm:$0xff] %vm223_vm0, %v4823_v0  ;;  %290 = vst.msk [vmem:[%s4936_s23 + $0x58] sm:$0xff] %vm223_vm0, %v4823_v0 }
  0x36   : > { %291 = vst.msk [vmem:[%s4936_s23 + $0x60] sm:$0xff] %vm223_vm0, %v4823_v0  ;;  %292 = vst.msk [vmem:[%s4936_s23 + $0x68] sm:$0xff] %vm223_vm0, %v4823_v0 }
  0x37   : > { %293 = vst.msk [vmem:[%s4936_s23 + $0x70] sm:$0xff] %vm223_vm0, %v4823_v0  ;;  %294 = vst.msk [vmem:[%s4936_s23 + $0x78] sm:$0xff] %vm223_vm0, %v4823_v0 }
  0x38   : > { %295 = vst.msk [vmem:[%s4936_s23 + $0x80] sm:$0xff] %vm223_vm0, %v4823_v0  ;;  %296 = vst.msk [vmem:[%s4936_s23 + $0x88] sm:$0xff] %vm223_vm0, %v4823_v0 }
  0x39   : > { %297 = vst.msk [vmem:[%s4936_s23 + $0x90] sm:$0xff] %vm223_vm0, %v4823_v0  ;;  %298 = vst.msk [vmem:[%s4936_s23 + $0x98] sm:$0xff] %vm223_vm0, %v4823_v0 }
  0x3a   : > { %299 = vst.msk [vmem:[%s4936_s23 + $0xa0] sm:$0xff] %vm223_vm0, %v4823_v0  ;;  %300 = vst.msk [vmem:[%s4936_s23 + $0xa8] sm:$0xff] %vm223_vm0, %v4823_v0 }
  0x3b   : > { %301 = vst.msk [vmem:[%s4936_s23 + $0xb0] sm:$0xff] %vm223_vm0, %v4823_v0  ;;  %302 = vst.msk [vmem:[%s4936_s23 + $0xb8] sm:$0xff] %vm223_vm0, %v4823_v0 }
  0x3c   : > { %303 = vst.msk [vmem:[%s4936_s23 + $0xc0] sm:$0xff] %vm223_vm0, %v4823_v0  ;;  %304 = vst.msk [vmem:[%s4936_s23 + $0xc8] sm:$0xff] %vm223_vm0, %v4823_v0 }
  0x3d   : > { %305 = vst.msk [vmem:[%s4936_s23 + $0xd0] sm:$0xff] %vm223_vm0, %v4823_v0  ;;  %306 = vst.msk [vmem:[%s4936_s23 + $0xd8] sm:$0xff] %vm223_vm0, %v4823_v0 }
  0x3e   : > { %307 = vst.msk [vmem:[%s4936_s23 + $0xe0] sm:$0xff] %vm223_vm0, %v4823_v0  ;;  %308 = vst.msk [vmem:[%s4936_s23 + $0xe8] sm:$0xff] %vm223_vm0, %v4823_v0 }
  0x3f   : > { %309 = vst.msk [vmem:[%s4936_s23 + $0xf0] sm:$0xff] %vm223_vm0, %v4823_v0  ;;  %310 = vst.msk [vmem:[%s4936_s23 + $0xf8] sm:$0xff] %vm223_vm0, %v4823_v0 }
  0x40   : > { %227 = vst.msk [vmem:[#allocation2 + $0x10] sm:$0x3] %vm226_vm1, %v4823_v0  ;;  %230 = vst.msk [vmem:[#allocation2 + $0x28] sm:$0x3] %vm226_vm1, %v4823_v0 }
  0x41   : > { %233 = vst.msk [vmem:[#allocation2 + $0x40] sm:$0x3] %vm226_vm1, %v4823_v0  ;;  %236 = vst.msk [vmem:[#allocation2 + $0x58] sm:$0x3] %vm226_vm1, %v4823_v0 }
  0x42   : > { %239 = vst.msk [vmem:[#allocation2 + $0x70] sm:$0x3] %vm226_vm1, %v4823_v0  ;;  %242 = vst.msk [vmem:[#allocation2 + $0x88] sm:$0x3] %vm226_vm1, %v4823_v0 }
  0x43   : > { %245 = vst.msk [vmem:[#allocation2 + $0xa0] sm:$0x3] %vm226_vm1, %v4823_v0  ;;  %248 = vst.msk [vmem:[#allocation2 + $0xb8] sm:$0x3] %vm226_vm1, %v4823_v0 }
  0x44   : > { %251 = vst.msk [vmem:[#allocation2 + $0xd0] sm:$0x3] %vm226_vm1, %v4823_v0  ;;  %254 = vst.msk [vmem:[#allocation2 + $0xe8] sm:$0x3] %vm226_vm1, %v4823_v0 }
  0x45   : > { %257 = vst.msk [vmem:[#allocation2 + $0x100] sm:$0x3] %vm226_vm1, %v4823_v0  ;;  %260 = vst.msk [vmem:[#allocation2 + $0x118] sm:$0x3] %vm226_vm1, %v4823_v0 }
  0x46   : > { %263 = vst.msk [vmem:[#allocation2 + $0x130] sm:$0x3] %vm226_vm1, %v4823_v0  ;;  %266 = vst.msk [vmem:[#allocation2 + $0x148] sm:$0x3] %vm226_vm1, %v4823_v0 }
  0x47   : > { %269 = vst.msk [vmem:[#allocation2 + $0x160] sm:$0x3] %vm226_vm1, %v4823_v0  ;;  %272 = vst.msk [vmem:[#allocation2 + $0x178] sm:$0x3] %vm226_vm1, %v4823_v0 }
  0x48   : > { %275 = vst.msk [vmem:[#allocation2 + $0x190] sm:$0x3] %vm226_vm1, %v4823_v0  ;;  %278 = vst.msk [vmem:[#allocation2 + $0x1a8] sm:$0x3] %vm226_vm1, %v4823_v0 }
  0x49 PF: > { %v343_v3 = vld [vmem:[#allocation2 + $0x1] sm:$0xff]  ;;  %v344_v5 = vld [vmem:[#allocation2 + $0x9] sm:$0xff]  ;;  %s4824_s15 = smov 32   ;;  %v361_v25 = vld [vmem:[#allocation2 + $0xd9] sm:$0xff]  ;;  %s4825_s30 = smov 64   ;;  %vm1369_vm2 = vcmask 261120  }
  0x4a   : > { %v3963_v8 = vpack.i.bf16 %v344_v5, %v343_v3  ;;  %v345_v9 = vld [vmem:[#allocation2 + $0x19] sm:$0xff]  ;;  %v346_v10 = vld [vmem:[#allocation2 + $0x21] sm:$0xff]  ;;  %v365_v31 = vld [vmem:[#allocation2 + $0x109] sm:$0xff]  ;;  %s4826_s6 = smov 96   ;;  %vm1402_vm3 = vcmask 523264   ;;  %vm1435_vm4 = vcmask 785408  }
  0x4b   : > { %v347_v1 = vld [vmem:[#allocation2 + $0x31] sm:$0xff]  ;;  %v348_v2 = vld [vmem:[#allocation2 + $0x39] sm:$0xff]  ;;  %v3968_v12 = vpack.i.bf16 %v346_v10, %v345_v9  ;;  %v362_v26 = vld [vmem:[#allocation2 + $0xe1] sm:$0xff]  ;;  %s3496_s26 = sshll.u32 %s4936_s23, 4  ;;  %s4827_s5 = smov [#allocation3]   ;;  %s6557_s26 = int_to_ptr.vmem [resolvable:$true] %s3496_s26 }
  0x4c   : > { %v5143_v4 = vpack.i.bf16 %v348_v2, %v347_v1  ;;  %v349_v6 = vld [vmem:[#allocation2 + $0x49] sm:$0xff]  ;;  %v350_v7 = vld [vmem:[#allocation2 + $0x51] sm:$0xff]  ;;  %3964 = vrot.lane.b32.xlu0 %v3963_v8, %s4824_s15  ;;  %v359_v27 = vld [vmem:[#allocation2 + $0xc1] sm:$0xff]  ;;  %v5167_v29 = vpack.i.bf16 %v362_v26, %v361_v25  ;;  %s4727_s4 = scalar_lea.vmem %s6557_s26, 4096 }
  0x4d   : > { %v5147_v11 = vpack.i.bf16 %v350_v7, %v349_v6  ;;  %v351_v15 = vld [vmem:[#allocation2 + $0x61] sm:$0xff]  ;;  %v352_v16 = vld [vmem:[#allocation2 + $0x69] sm:$0xff]  ;;  %v366_v32 = vld [vmem:[#allocation2 + $0x111] sm:$0xff]  ;;  %p4728_p1 = scmp.ne.s32.totalorder %s6557_s26, %s4727_s4 }
  0x4e   : > { %3974 = vrot.lane.b32.xlu1 %v5143_v4, %s4824_s15  ;;  %v353_v13 = vld [vmem:[#allocation2 + $0x79] sm:$0xff]  ;;  %v354_v14 = vld [vmem:[#allocation2 + $0x81] sm:$0xff]  ;;  %v5155_v18 = vpack.i.bf16 %v352_v16, %v351_v15  ;;  %v360_v28 = vld [vmem:[#allocation2 + $0xc9] sm:$0xff]  ;;  %v5175_v35 = vpack.i.bf16 %v366_v32, %v365_v31 }
  0x4f   : > { %v5152_v17 = vpack.i.bf16 %v354_v14, %v353_v13  ;;  %v355_v21 = vld [vmem:[#allocation2 + $0x91] sm:$0xff]  ;;  %v356_v22 = vld [vmem:[#allocation2 + $0x99] sm:$0xff]  ;;  %v5171_v30 = vpack.i.bf16 %v360_v28, %v359_v27  ;;  %v370_v38 = vld [vmem:[#allocation2 + $0x141] sm:$0xff]  ;;  %p4729_p2 = pnand %p4728_p1, %p4899_p3 }
  0x50   : > { %3969 = vrot.lane.b32.xlu0 %v3968_v12, %s4824_s15  ;;  %v357_v19 = vld [vmem:[#allocation2 + $0xa9] sm:$0xff]  ;;  %v358_v20 = vld [vmem:[#allocation2 + $0xb1] sm:$0xff]  ;;  %v5163_v24 = vpack.i.bf16 %v356_v22, %v355_v21  ;;  %v364_v34 = vld [vmem:[#allocation2 + $0xf9] sm:$0xff] }
  0x51   : > { %v5159_v23 = vpack.i.bf16 %v358_v20, %v357_v19  ;;  %v363_v33 = vld [vmem:[#allocation2 + $0xf1] sm:$0xff]  ;;  %v369_v37 = vld [vmem:[#allocation2 + $0x139] sm:$0xff]  ;;  %v367_v39 = vld [vmem:[#allocation2 + $0x121] sm:$0xff]  ;;  %p4730_p4 = pneg %p4729_p2 }
  0x52   : > { %3979 = vrot.lane.b32.xlu1 %v5147_v11, %s4824_s15  ;;  %v5179_v36 = vpack.i.bf16 %v364_v34, %v363_v33  ;;  %v368_v40 = vld [vmem:[#allocation2 + $0x129] sm:$0xff]  ;;  %v4028_v41 = vpack.i.bf16 %v370_v38, %v369_v37  ;;  %v374_v44 = vld [vmem:[#allocation2 + $0x171] sm:$0xff]  ;;  %v372_v46 = vld [vmem:[#allocation2 + $0x159] sm:$0xff] }
  0x53   : > { %v4023_v42 = vpack.i.bf16 %v368_v40, %v367_v39  ;;  %v373_v43 = vld [vmem:[#allocation2 + $0x169] sm:$0xff]  ;;  %v371_v45 = vld [vmem:[#allocation2 + $0x151] sm:$0xff]  ;;  %v377_v49 = vld [vmem:[#allocation2 + $0x1a] sm:$0xff] }
  0x54   : > { %3984 = vrot.lane.b32.xlu0 %v5155_v18, %s4824_s15  ;;  %v5186_v47 = vpack.i.bf16 %v374_v44, %v373_v43  ;;  %v5189_v48 = vpack.i.bf16 %v372_v46, %v371_v45  ;;  %v378_v50 = vld [vmem:[#allocation2 + $0x22] sm:$0xff]  ;;  %v376_v52 = vld [vmem:[#allocation2 + $0xa] sm:$0xff]  ;;  %v382_v56 = vld [vmem:[#allocation2 + $0x52] sm:$0xff] }
  0x55   : > { %v375_v51 = vld [vmem:[#allocation2 + $0x2] sm:$0xff]  ;;  %v5193_v53 = vpack.i.bf16 %v378_v50, %v377_v49  ;;  %v381_v55 = vld [vmem:[#allocation2 + $0x4a] sm:$0xff]  ;;  %v379_v57 = vld [vmem:[#allocation2 + $0x32] sm:$0xff] }
  0x56   : > { %3989 = vrot.lane.b32.xlu1 %v5152_v17, %s4824_s15  ;;  %v4043_v54 = vpack.i.bf16 %v376_v52, %v375_v51  ;;  %v380_v58 = vld [vmem:[#allocation2 + $0x3a] sm:$0xff]  ;;  %v386_v60 = vld [vmem:[#allocation2 + $0x82] sm:$0xff]  ;;  %v5199_v61 = vpack.i.bf16 %v382_v56, %v381_v55  ;;  %v384_v63 = vld [vmem:[#allocation2 + $0x6a] sm:$0xff] }
  0x57   : > { %v385_v59 = vld [vmem:[#allocation2 + $0x7a] sm:$0xff]  ;;  %v383_v62 = vld [vmem:[#allocation2 + $0x62] sm:$0xff]  ;;  %v5202_v0 = vpack.i.bf16 %v380_v58, %v379_v57  ;;  %v389_v3 = vld [vmem:[#allocation2 + $0xaa] sm:$0xff] }
  0x58   : > { %3994 = vrot.lane.b32.xlu0 %v5163_v24, %s4824_s15  ;;  %v4443_v1 = vld [vmem:[%s6719_s1 + $0x40] sm:$0xff]   ;;  %v390_v5 = vld [vmem:[#allocation2 + $0xb2] sm:$0xff]  ;;  %v5212_v6 = vpack.i.bf16 %v386_v60, %v385_v59  ;;  %v4445_v9 = vld [vmem:[%s6719_s1 + $0x48] sm:$0xff]   ;;  %v5219_v10 = vpack.i.bf16 %v384_v63, %v383_v62 }
  0x59   : > { %v4444_v2 = vld [vmem:[%s6719_s1] sm:$0xff]   ;;  %3704 = vmatprep.subr.bf16.mxu0 %v4443_v1  ;;  %3870 = vmatprep.subr.bf16.mxu1 %v4443_v1  ;;  %v387_v7 = vld [vmem:[#allocation2 + $0x92] sm:$0xff]  ;;  %v4446_v12 = vld [vmem:[%s6719_s1 + $0x8] sm:$0xff]   ;;  %v5226_v15 = vpack.i.bf16 %v390_v5, %v389_v3 }
  0x5a   : > { %3999 = vrot.lane.b32.xlu1 %v5159_v23, %s4824_s15  ;;  %v388_v8 = vld [vmem:[#allocation2 + $0x9a] sm:$0xff]  ;;  %3705 = vmatpush3.bf16.msra.mxu0 %v4444_v2  ;;  %v394_v14 = vld [vmem:[#allocation2 + $0xe2] sm:$0xff]  ;;  %v392_v19 = vld [vmem:[#allocation2 + $0xca] sm:$0xff] }
  0x5b   : > { %3878 = vmatpush3.bf16.msra.mxu1 %v4444_v2  ;;  %3706 = vmatprep.subr.bf16.mxu0 %v4445_v9  ;;  %v393_v13 = vld [vmem:[#allocation2 + $0xda] sm:$0xff]  ;;  %v391_v16 = vld [vmem:[#allocation2 + $0xc2] sm:$0xff]  ;;  %v4447_v20 = vld [vmem:[%s6719_s1 + $0x50] sm:$0xff]   ;;  %v5233_v21 = vpack.i.bf16 %v388_v8, %v387_v7 }
  0x5c   : > { %4004 = vrot.lane.b32.xlu0 %v5171_v30, %s4824_s15  ;;  %3871 = vmatprep.subr.bf16.mxu1 %v4445_v9  ;;  %v4448_v22 = vld [vmem:[%s6719_s1 + $0x10] sm:$0xff]   ;;  %v5240_v27 = vpack.i.bf16 %v394_v14, %v393_v13  ;;  %v396_v31 = vld [vmem:[#allocation2 + $0xfa] sm:$0xff]  ;;  %v5247_v33 = vpack.i.bf16 %v392_v19, %v391_v16  ;;  %v399_v43 = vld [vmem:[#allocation2 + $0x122] sm:$0xff] }
  0x5d   : > { %v397_v25 = vld [vmem:[#allocation2 + $0x10a] sm:$0xff]  ;;  %v398_v26 = vld [vmem:[#allocation2 + $0x112] sm:$0xff]  ;;  %v4451_v38 = vld [vmem:[%s6719_s1 + $0x60] sm:$0xff]  }
  0x5e   : > { %4009 = vrot.lane.b32.xlu1 %v5167_v29, %s4824_s15  ;;  %3707 = vmatpush3.bf16.msra.mxu0 %v4446_v12  ;;  %v395_v28 = vld [vmem:[#allocation2 + $0xf2] sm:$0xff]  ;;  %v5254_v37 = vpack.i.bf16 %v398_v26, %v397_v25  ;;  %v401_v40 = vld [vmem:[#allocation2 + $0x13a] sm:$0xff]  ;;  %v400_v44 = vld [vmem:[#allocation2 + $0x12a] sm:$0xff] }
  0x5f   : > { %3879 = vmatpush3.bf16.msra.mxu1 %v4446_v12  ;;  %3708 = vmatprep.subr.bf16.mxu0 %v4447_v20  ;;  %v4449_v32 = vld [vmem:[%s6719_s1 + $0x58] sm:$0xff]   ;;  %v5261_v39 = vpack.i.bf16 %v396_v31, %v395_v28  ;;  %v4453_v46 = vld [vmem:[%s6719_s1 + $0x68] sm:$0xff]   ;;  %v5273_v49 = vpack.i.bf16 %v400_v44, %v399_v43  ;;  %v4455_v57 = vld [vmem:[%s6719_s1 + $0x70] sm:$0xff]  }
  0x60   : > { %4014 = vrot.lane.b32.xlu0 %v5179_v36, %s4824_s15  ;;  %3872 = vmatprep.subr.bf16.mxu1 %v4447_v20  ;;  %v4450_v34 = vld [vmem:[%s6719_s1 + $0x18] sm:$0xff]   ;;  %v405_v50 = vld [vmem:[#allocation2 + $0x16a] sm:$0xff]  ;;  %v5295_v1 = vld [vmem:[#allocation2 + $0x20] sm:$0xff] }
  0x61   : > { %v406_v51 = vld [vmem:[#allocation2 + $0x172] sm:$0xff]  ;;  %v4454_v52 = vld [vmem:[%s6719_s1 + $0x28] sm:$0xff]   ;;  %v404_v55 = vld [vmem:[#allocation2 + $0x15a] sm:$0xff] }
  0x62   : > { %4019 = vrot.lane.b32.xlu1 %v5175_v35, %s4824_s15  ;;  %3709 = vmatpush3.bf16.msra.mxu0 %v4448_v22  ;;  %v5279_v56 = vpack.i.bf16 %v406_v51, %v405_v50  ;;  %v5286_v59 = vld [vmem:[#allocation2 + $0x30] sm:$0xff]  ;;  %v5288_v60 = vld [vmem:[#allocation2 + $0x38] sm:$0xff]  ;;  %v5326_v14 = vld [vmem:[#allocation2 + $0x140] sm:$0xff] }
  0x63   : > { %3880 = vmatpush3.bf16.msra.mxu1 %v4448_v22  ;;  %3710 = vmatprep.subr.bf16.mxu0 %v4449_v32  ;;  %v4456_v62 = vld [vmem:[%s6719_s1 + $0x30] sm:$0xff]   ;;  %v5293_v63 = vld [vmem:[#allocation2 + $0x18] sm:$0xff]  ;;  %v4128_v2 = vpack.i.bf16 %v5288_v60, %v5286_v59  ;;  %v5335_v16 = vld [vmem:[#allocation2 + $0x48] sm:$0xff] }
  0x64   : > { %4024 = vrot.lane.b32.xlu0 %v4023_v42, %s4824_s15  ;;  %3873 = vmatprep.subr.bf16.mxu1 %v4449_v32  ;;  %v4452_v42 = vld [vmem:[%s6719_s1 + $0x20] sm:$0xff]   ;;  %v4457_v3 = vld [vmem:[%s6719_s1 + $0x78] sm:$0xff]   ;;  %v4123_v5 = vpack.i.bf16 %v5295_v1, %v5293_v63  ;;  %v5315_v8 = vld [vmem:[#allocation2 + $0x150] sm:$0xff] }
  0x65   : > { %v4458_v7 = vld [vmem:[%s6719_s1 + $0x38] sm:$0xff]   ;;  %v5347_v20 = vld [vmem:[#allocation2 + $0x170] sm:$0xff]  ;;  %v5358_v25 = vld [vmem:[#allocation2 + $0x68] sm:$0xff] }
  0x66   : > { %4029 = vrot.lane.b32.xlu1 %v4028_v41, %s4824_s15  ;;  %3711 = vmatpush3.bf16.msra.mxu0 %v4450_v34  ;;  %v402_v41 = vld [vmem:[#allocation2 + $0x142] sm:$0xff]  ;;  %v5317_v9 = vld [vmem:[#allocation2 + $0x158] sm:$0xff] }
  0x67   : > { %3881 = vmatpush3.bf16.msra.mxu1 %v4450_v34  ;;  %3712 = vmatprep.subr.bf16.mxu0 %v4451_v38  ;;  %v4108_v45 = vpack.i.bf16 %v402_v41, %v401_v40  ;;  %v4153_v12 = vpack.i.bf16 %v5317_v9, %v5315_v8  ;;  %v5324_v13 = vld [vmem:[#allocation2 + $0x138] sm:$0xff]  ;;  %v5366_v28 = vld [vmem:[%s6719_s1 + $0x80] sm:$0xff]   ;;  %v534_v31 = vld [vmem:[#allocation2 + $0x188] sm:$0xff] }
  0x68   : > { %4034 = vrot.lane.b32.xlu0 %v5189_v48, %s4824_s15  ;;  %3874 = vmatprep.subr.bf16.mxu1 %v4451_v38  ;;  %v565_v34 = vld [vmem:[#allocation2 + $0x181] sm:$0xff]  ;;  %v566_v38 = vld [vmem:[#allocation2 + $0x189] sm:$0xff]  ;;  %v5380_v40 = vld [vmem:[#allocation2 + $0x78] sm:$0xff] }
  0x69   : > { %6750 = vst [vmem:[#allocation7_spill] sm:$0xff] %v5380_v40  ;;  %v5382_v41 = vld [vmem:[#allocation2 + $0x80] sm:$0xff]  ;;  %v535_v44 = vld [vmem:[#allocation2 + $0x198] sm:$0xff] }
  0x6a   : > { %4039 = vrot.lane.b32.xlu1 %v5186_v47, %s4824_s15  ;;  %3713 = vmatpush3.bf16.msra.mxu0 %v4452_v42  ;;  %6751 = vst [vmem:[#allocation8_spill] sm:$0xff] %v5382_v41 }
  0x6b   : > { %3882 = vmatpush3.bf16.msra.mxu1 %v4452_v42  ;;  %3714 = vmatprep.subr.bf16.mxu0 %v4453_v46  ;;  %v503_v42 = vld [vmem:[#allocation2 + $0x18a] sm:$0xff] }
  0x6c   : > { %4044 = vrot.lane.b32.xlu0 %v4043_v54, %s4825_s30  ;;  %v403_v54 = vld [vmem:[#allocation2 + $0x152] sm:$0xff]  ;;  %3875 = vmatprep.subr.bf16.mxu1 %v4453_v46 }
  0x6d   : > { %v4113_v58 = vpack.i.bf16 %v404_v55, %v403_v54  ;;  %v567_v54 = vld [vmem:[#allocation2 + $0x199] sm:$0xff]  ;;  %v568_v55 = vld [vmem:[#allocation2 + $0x1a1] sm:$0xff] }
  0x6e   : > { %4049 = vrot.lane.b32.xlu1 %v5193_v53, %s4825_s30  ;;  %3715 = vmatpush3.bf16.msra.mxu0 %v4454_v52 }
  0x6f   : > { %3883 = vmatpush3.bf16.msra.mxu1 %v4454_v52  ;;  %3716 = vmatprep.subr.bf16.mxu0 %v4455_v57 }
  0x70   : > { %4054 = vrot.lane.b32.xlu0 %v5202_v0, %s4825_s30  ;;  %3876 = vmatprep.subr.bf16.mxu1 %v4455_v57  ;;  %v5404_v57 = vld [vmem:[#allocation2 + $0x90] sm:$0xff] }
  0x71   : > { %6752 = vst [vmem:[#allocation9_spill] sm:$0xff] %v5404_v57 }
  0x72   : > { %4059 = vrot.lane.b32.xlu1 %v5199_v61, %s4825_s30  ;;  %3717 = vmatpush3.bf16.msra.mxu0 %v4456_v62 }
  0x73   : > { %3884 = vmatpush3.bf16.msra.mxu1 %v4456_v62  ;;  %3718 = vmatprep.subr.bf16.mxu0 %v4457_v3 }
  0x74   : > { %4064 = vrot.lane.b32.xlu0 %v5219_v10, %s4825_s30  ;;  %3877 = vmatprep.subr.bf16.mxu1 %v4457_v3 }
  0x76   : > { %4069 = vrot.lane.b32.xlu1 %v5212_v6, %s4825_s30  ;;  %3719 = vmatpush3.bf16.msra.mxu0 %v4458_v7 }
  0x77   : > { %3885 = vmatpush3.bf16.msra.mxu1 %v4458_v7 }
  0x78   : > { %4074 = vrot.lane.b32.xlu0 %v5233_v21, %s4825_s30  ;;  %3834 = vmatprep.subr.bf16.mxu1 %v5366_v28 }
  0x7a   : > { %4079 = vrot.lane.b32.xlu1 %v5226_v15, %s4825_s30 }
  0x7c   : > { %4084 = vrot.lane.b32.xlu0 %v5247_v33, %s4825_s30 }
  0x7e   : > { %4089 = vrot.lane.b32.xlu1 %v5240_v27, %s4825_s30 }
  0x80   : > { %4094 = vrot.lane.b32.xlu0 %v5261_v39, %s4825_s30 }
  0x82   : > { %4099 = vrot.lane.b32.xlu1 %v5254_v37, %s4825_s30 }
  0x84   : > { %4104 = vrot.lane.b32.xlu0 %v5273_v49, %s4825_s30 }
  0x86   : > { %4109 = vrot.lane.b32.xlu1 %v4108_v45, %s4825_s30 }
  0x88   : > { %4114 = vrot.lane.b32.xlu0 %v4113_v58, %s4825_s30 }
  0x8a   : > { %4119 = vrot.lane.b32.xlu1 %v5279_v56, %s4825_s30 }
  0x8c   : > { %4124 = vrot.lane.b32.xlu0 %v4123_v5, %s4826_s6 }
  0x8e   : > { %4129 = vrot.lane.b32.xlu1 %v4128_v2, %s4826_s6 }
  0x90   : > { %4134 = vrot.lane.b32.xlu0 %v5193_v53, %s4824_s15  ;;  %v5333_v53 = vpack.i.bf16 %v5326_v14, %v5324_v13 }
  0x92   : > { %4139 = vrot.lane.b32.xlu1 %v4128_v2, %s4825_s30 }
  0x94   : > { %4144 = vrot.lane.b32.xlu0 %v4108_v45, %s4824_s15  ;;  %v536_v45 = vld [vmem:[#allocation2 + $0x1a0] sm:$0xff] }
  0x95   : > { %v4268_v51 = vpack.i.bf16 %v536_v45, %v535_v44 }
  0x96   : > { %4149 = vrot.lane.b32.xlu1 %v5143_v4, %s4826_s6  ;;  %v5337_v4 = vld [vmem:[#allocation2 + $0x50] sm:$0xff] }
  0x97   : > { %v4173_v19 = vpack.i.bf16 %v5337_v4, %v5335_v16 }
  0x98   : > { %4154 = vrot.lane.b32.xlu0 %v4153_v12, %s4825_s30 }
  0x9a   : > { %4159 = vrot.lane.b32.xlu1 %v5189_v48, %s4826_s6  ;;  %v5345_v48 = vld [vmem:[#allocation2 + $0x168] sm:$0xff] }
  0x9b   : > { %v4188_v22 = vpack.i.bf16 %v5347_v20, %v5345_v48 }
  0x9c   : > { %4164 = vrot.lane.b32.xlu0 %v5333_v53, %s4826_s6 }
  0x9e   : > { %4169 = vrot.lane.b32.xlu1 %v5202_v0, %s4824_s15  ;;  %v5356_v0 = vld [vmem:[#allocation2 + $0x60] sm:$0xff] }
  0x9f   : > { %v4208_v26 = vpack.i.bf16 %v5358_v25, %v5356_v0 }
  0xa0   : > { %4174 = vrot.lane.b32.xlu0 %v4173_v19, %s4825_s30 }
  0xa2   : > { %4179 = vrot.lane.b32.xlu1 %v4113_v58, %s4824_s15  ;;  %v5406_v58 = vld [vmem:[#allocation2 + $0x98] sm:$0xff] }
  0xa3   : > { %6753 = vst [vmem:[#allocation10_spill] sm:$0xff] %v5406_v58  ;;  %v4288_v2 = vpack.i.bf16 %v5406_v58, %v5404_v57 }
  0xa4   : > { %4184 = vrot.lane.b32.xlu0 %v5147_v11, %s4826_s6  ;;  %v533_v11 = vld [vmem:[#allocation2 + $0x180] sm:$0xff] }
  0xa5   : > { %v4228_v32 = vpack.i.bf16 %v534_v31, %v533_v11 }
  0xa6   : > { %4189 = vrot.lane.b32.xlu1 %v4188_v22, %s4825_s30 }
  0xa8   : > { %4194 = vrot.lane.b32.xlu0 %v5186_v47, %s4826_s6  ;;  %v4233_v47 = vpack.i.bf16 %v566_v38, %v565_v34  ;;  %v328_v34 = vld [vmem:[#allocation2 + $0xc8] sm:$0xff] }
  0xaa   : > { %4199 = vrot.lane.b32.xlu1 %v4153_v12, %s4826_s6  ;;  %v325_v12 = vld [vmem:[#allocation2 + $0xa8] sm:$0xff] }
  0xac   : > { %4204 = vrot.lane.b32.xlu0 %v5199_v61, %s4824_s15  ;;  %v502_v61 = vld [vmem:[#allocation2 + $0x182] sm:$0xff] }
  0xad   : > { %v4253_v43 = vpack.i.bf16 %v503_v42, %v502_v61  ;;  %v329_v61 = vld [vmem:[#allocation2 + $0xd8] sm:$0xff]  ;;  %v330_v42 = vld [vmem:[#allocation2 + $0xe0] sm:$0xff] }
  0xae   : > { %4209 = vrot.lane.b32.xlu1 %v4208_v26, %s4825_s30  ;;  %v4348_v44 = vpack.i.bf16 %v330_v42, %v329_v61  ;;  %v5497_v61 = vld [vmem:[#allocation2 + $0x128] sm:$0xff] }
  0xb0   : > { %4214 = vrot.lane.b32.xlu0 %v5279_v56, %s4824_s15 }
  0xb2   : > { %4219 = vrot.lane.b32.xlu1 %v5155_v18, %s4826_s6  ;;  %v4248_v18 = vpack.i.bf16 %v5382_v41, %v5380_v40 }
  0xb4   : > { %4224 = vrot.lane.b32.xlu0 %v4173_v19, %s4826_s6  ;;  %v326_v19 = vld [vmem:[#allocation2 + $0xb0] sm:$0xff] }
  0xb6   : > { %4229 = vrot.lane.b32.xlu1 %v4228_v32, %s4825_s30 }
  0xb8   : > { %4234 = vrot.lane.b32.xlu0 %v4233_v47, %s4826_s6 }
  0xba   : > { %4239 = vrot.lane.b32.xlu1 %v4188_v22, %s4826_s6 }
  0xbc   : > { %4244 = vrot.lane.b32.xlu0 %v5219_v10, %s4824_s15  ;;  %v4273_v10 = vpack.i.bf16 %v568_v55, %v567_v54  ;;  %v332_v54 = vld [vmem:[#allocation2 + $0xf8] sm:$0xff] }
  0xbe   : > { %4249 = vrot.lane.b32.xlu1 %v4248_v18, %s4825_s30  ;;  %v5393_v50 = vpop.permute.xlu0 %3964 }
  0xc0   : > { %v5391_v46 = vpop.permute.xlu1 %3974  ;;  %4254 = vrot.lane.b32.xlu0 %v4253_v43, %s4824_s15 }
  0xc2   : > { %4259 = vrot.lane.b32.xlu1 %v5152_v17, %s4826_s6  ;;  %v5400_v56 = vpop.permute.xlu0 %3969 }
  0xc4   : > { %v5398_v52 = vpop.permute.xlu1 %3979  ;;  %4264 = vrot.lane.b32.xlu0 %v4208_v26, %s4826_s6  ;;  %v4308_v26 = vpack.i.bf16 %v326_v19, %v325_v12  ;;  %v333_v12 = vld [vmem:[#allocation2 + $0x108] sm:$0xff]  ;;  %v334_v19 = vld [vmem:[#allocation2 + $0x110] sm:$0xff] }
  0xc6   : > { %4269 = vrot.lane.b32.xlu1 %v4268_v51, %s4825_s30  ;;  %v5410_v17 = vpop.permute.xlu0 %3984  ;;  %v331_v51 = vld [vmem:[#allocation2 + $0xf0] sm:$0xff] }
  0xc8   : > { %v5408_v62 = vpop.permute.xlu1 %3989  ;;  %4274 = vrot.lane.b32.xlu0 %v4273_v10, %s4826_s6  ;;  %v4368_v10 = vpack.i.bf16 %v332_v54, %v331_v51  ;;  %v557_v51 = vld [vmem:[#allocation2 + $0x121] sm:$0xff] }
  0xca   : > { %4279 = vrot.lane.b32.xlu1 %v4228_v32, %s4826_s6  ;;  %v5418_v5 = vpop.permute.xlu0 %3994  ;;  %v327_v32 = vld [vmem:[#allocation2 + $0xc0] sm:$0xff] }
  0xcb   : > { %6755 = vst [vmem:[#allocation12_spill] sm:$0xff] %v5418_v5  ;;  %v4328_v47 = vpack.i.bf16 %v328_v34, %v327_v32  ;;  %v4388_v32 = vpack.i.bf16 %v334_v19, %v333_v12 }
  0xcc   : > { %v5416_v3 = vpop.permute.xlu1 %3999  ;;  %4284 = vrot.lane.b32.xlu0 %v5212_v6, %s4824_s15 }
  0xcd   : > { %6754 = vst [vmem:[#allocation11_spill] sm:$0xff] %v5416_v3 }
  0xce   : > { %4289 = vrot.lane.b32.xlu1 %v4288_v2, %s4825_s30  ;;  %v5425_v22 = vpop.permute.xlu0 %4004 }
  0xcf   : > { %6757 = vst [vmem:[#allocation14_spill] sm:$0xff] %v5425_v22  ;;  %v440_v22 = vld [vmem:[#allocation2 + $0x19] sm:$0xff] }
  0xd0   : > { %v5423_v7 = vpop.permute.xlu1 %4009  ;;  %4294 = vrot.lane.b32.xlu0 %v5163_v24, %s4826_s6 }
  0xd1   : > { %6756 = vst [vmem:[#allocation13_spill] sm:$0xff] %v5423_v7  ;;  %v312_v7 = vld [vmem:[#allocation2 + $0x8] sm:$0xff] }
  0xd2   : > { %4299 = vrot.lane.b32.xlu1 %v4248_v18, %s4826_s6  ;;  %v5432_v31 = vpop.permute.xlu0 %4014 }
  0xd3   : > { %6759 = vst [vmem:[#allocation16_spill] sm:$0xff] %v5432_v31  ;;  %v559_v31 = vld [vmem:[#allocation2 + $0x139] sm:$0xff] }
  0xd4   : > { %v5430_v11 = vpop.permute.xlu1 %4019  ;;  %4304 = vrot.lane.b32.xlu0 %v5233_v21, %s4824_s15 }
  0xd5   : > { %6758 = vst [vmem:[#allocation15_spill] sm:$0xff] %v5430_v11  ;;  %v311_v11 = vld [vmem:[#allocation2] sm:$0xff] }
  0xd6   : > { %4309 = vrot.lane.b32.xlu1 %v4308_v26, %s4825_s30  ;;  %v5439_v38 = vpop.permute.xlu0 %4024 }
  0xd8   : > { %v5437_v6 = vpop.permute.xlu1 %4029  ;;  %4314 = vrot.lane.b32.xlu0 %v5159_v23, %s4826_s6 }
  0xda   : > { %4319 = vrot.lane.b32.xlu1 %v4288_v2, %s4826_s6  ;;  %v5446_v18 = vpop.permute.xlu0 %4034 }
  0xdc   : > { %v5444_v24 = vpop.permute.xlu1 %4039  ;;  %4324 = vrot.lane.b32.xlu0 %v5226_v15, %s4824_s15 }
  0xde   : > { %4329 = vrot.lane.b32.xlu1 %v4328_v47, %s4825_s30  ;;  %v5453_v43 = vpop.permute.xlu0 %4044 }
  0xe0   : > { %v5451_v21 = vpop.permute.xlu1 %4049  ;;  %4334 = vrot.lane.b32.xlu0 %v5171_v30, %s4826_s6 }
  0xe2   : > { %4339 = vrot.lane.b32.xlu1 %v4308_v26, %s4826_s6  ;;  %v5460_v45 = vpop.permute.xlu0 %4054 }
  0xe4   : > { %v5458_v23 = vpop.permute.xlu1 %4059  ;;  %4344 = vrot.lane.b32.xlu0 %v5247_v33, %s4824_s15 }
  0xe6   : > { %4349 = vrot.lane.b32.xlu1 %v4348_v44, %s4825_s30  ;;  %v5467_v55 = vpop.permute.xlu0 %4064 }
  0xe8   : > { %v5465_v15 = vpop.permute.xlu1 %4069  ;;  %4354 = vrot.lane.b32.xlu0 %v5167_v29, %s4826_s6 }
  0xea   : > { %4359 = vrot.lane.b32.xlu1 %v4328_v47, %s4826_s6  ;;  %v5474_v2 = vpop.permute.xlu0 %4074  ;;  %v5495_v47 = vld [vmem:[#allocation2 + $0x120] sm:$0xff] }
  0xeb   : > { %6761 = vst [vmem:[#allocation18_spill] sm:$0xff] %v5474_v2 }
  0xec   : > { %v5472_v30 = vpop.permute.xlu1 %4079  ;;  %4364 = vrot.lane.b32.xlu0 %v5240_v27, %s4824_s15 }
  0xed   : > { %6760 = vst [vmem:[#allocation17_spill] sm:$0xff] %v5472_v30 }
  0xee   : > { %4369 = vrot.lane.b32.xlu1 %v4368_v10, %s4825_s30  ;;  %v5481_v26 = vpop.permute.xlu0 %4084 }
  0xef   : > { %6763 = vst [vmem:[#allocation20_spill] sm:$0xff] %v5481_v26 }
  0xf0   : > { %v5479_v33 = vpop.permute.xlu1 %4089  ;;  %4374 = vrot.lane.b32.xlu0 %v5179_v36, %s4826_s6  ;;  %v4408_v36 = vpack.i.bf16 %v5497_v61, %v5495_v47 }
  0xf1   : > { %6762 = vst [vmem:[#allocation19_spill] sm:$0xff] %v5479_v33  ;;  %v560_v33 = vld [vmem:[#allocation2 + $0x141] sm:$0xff] }
  0xf2   : > { %4379 = vrot.lane.b32.xlu1 %v4348_v44, %s4826_s6  ;;  %v5488_v34 = vpop.permute.xlu0 %4094 }
  0xf3   : > { %6765 = vst [vmem:[#allocation22_spill] sm:$0xff] %v5488_v34 }
  0xf4   : > { %v5486_v29 = vpop.permute.xlu1 %4099  ;;  %4384 = vrot.lane.b32.xlu0 %v5261_v39, %s4824_s15  ;;  %v558_v39 = vld [vmem:[#allocation2 + $0x129] sm:$0xff] }
  0xf5   : > { %6764 = vst [vmem:[#allocation21_spill] sm:$0xff] %v5486_v29  ;;  %v4413_v12 = vpack.i.bf16 %v558_v39, %v557_v51  ;;  %v3966_v29 = vunpack.i.l.bf16 %v5393_v50  ;;  %v4046_v51 = vunpack.i.l.bf16 %v5453_v43 }
  0xf6   : > { %4389 = vrot.lane.b32.xlu1 %v4388_v32, %s4825_s30  ;;  %v5499_v42 = vpop.permute.xlu0 %4104 }
  0xf7   : > { %v1370_v2 = vsel %vm1369_vm2, %v311_v11, %v3966_v29 }
  0xf8   : > { %v5493_v27 = vpop.permute.xlu1 %4109  ;;  %4394 = vrot.lane.b32.xlu0 %v5175_v35, %s4826_s6  ;;  %v3967_v35 = vunpack.i.h.bf16 %v5393_v50  ;;  %v4433_v50 = vpack.i.bf16 %v560_v33, %v559_v31 }
  0xfa   : > { %4399 = vrot.lane.b32.xlu1 %v4368_v10, %s4826_s6  ;;  %v5508_v54 = vpop.permute.xlu0 %4114 }
  0xfc   : > { %v5506_v44 = vpop.permute.xlu1 %4119  ;;  %4404 = vrot.lane.b32.xlu0 %v5254_v37, %s4824_s15  ;;  %v4047_v37 = vunpack.i.h.bf16 %v5453_v43  ;;  %v1371_v43 = vsel %vm1369_vm2, %v312_v7, %v3967_v35 }
  0xfe   : > { %4409 = vrot.lane.b32.xlu1 %v4408_v36, %s4825_s30  ;;  %v4125_v10 = vpop.permute.xlu0 %4124 }
  0xff   : > { %v4127_v39 = vunpack.i.h.bf16 %v4125_v10  ;;  %v4126_v26 = vunpack.i.l.bf16 %v4125_v10 }
 0x100   : > { %v5513_v19 = vpop.permute.xlu1 %4129  ;;  %4414 = vrot.lane.b32.xlu0 %v4413_v12, %s4826_s6  ;;  %v441_v12 = vld [vmem:[#allocation2 + $0x21] sm:$0xff] }
 0x102   : > { %4419 = vrot.lane.b32.xlu1 %v4388_v32, %s4826_s6  ;;  %v4135_v32 = vpop.permute.xlu0 %4134 }
 0x103   : > { %v4137_v58 = vunpack.i.h.bf16 %v4135_v32  ;;  %v4136_v57 = vunpack.i.l.bf16 %v4135_v32 }
 0x104   : > { %v4140_v34 = vpop.permute.xlu1 %4139  ;;  %4424 = vrot.lane.b32.xlu0 %v5273_v49, %s4824_s15  ;;  %v1404_v49 = vsel %vm1402_vm3, %v1371_v43, %v4047_v37  ;;  %v4107_v43 = vunpack.i.h.bf16 %v5499_v42 }
 0x105   : > { %v4142_v30 = vunpack.i.h.bf16 %v4140_v34  ;;  %v4141_v3 = vunpack.i.l.bf16 %v4140_v34  ;;  %v1468_v5 = vsel %vm1369_vm2, %v440_v22, %v4136_v57  ;;  %v1469_v41 = vsel %vm1369_vm2, %v441_v12, %v4137_v58 }
 0x106   : > { %4429 = vrot.lane.b32.xlu1 %v5333_v53, %s4825_s30  ;;  %v4145_v40 = vpop.permute.xlu0 %4144  ;;  %v1403_v53 = vsel %vm1402_vm3, %v1370_v2, %v4046_v51  ;;  %v1437_v57 = vsel %vm1435_vm4, %v1404_v49, %v4127_v39  ;;  %v2415_v51 = vld [vmem:[%s4936_s23 + $0x8] sm:$0xff]  ;;  %v4027_v39 = vunpack.i.h.bf16 %v5439_v38  ;;  %v3971_v49 = vunpack.i.l.bf16 %v5400_v56 }
 0x107   : > { %v1500_v11 = vsel %vm1402_vm3, %v1468_v5, %v4141_v3  ;;  %v1501_v7 = vsel %vm1402_vm3, %v1469_v41, %v4142_v30  ;;  %v1436_v29 = vsel %vm1435_vm4, %v1403_v53, %v4126_v26  ;;  %v4147_v58 = vunpack.i.h.bf16 %v4145_v40  ;;  %v2417_v53 = vld [vmem:[%s4936_s23 + $0x18] sm:$0xff] }
 0x108   : > { %v4150_v10 = vpop.permute.xlu1 %4149  ;;  %v4146_v22 = vunpack.i.l.bf16 %v4145_v40  ;;  %4434 = vrot.lane.b32.xlu0 %v4433_v50, %s4826_s6  ;;  %v4026_v3 = vunpack.i.l.bf16 %v5439_v38  ;;  %v1596_v26 = vpack.c.bf16 %v1437_v57, %v1436_v29  ;;  %v3972_v38 = vunpack.i.h.bf16 %v5400_v56  ;;  %v2416_v57 = vld [vmem:[%s4936_s23 + $0x10] sm:$0xff] }
 0x109   : > { %v4152_v34 = vunpack.i.h.bf16 %v4150_v10  ;;  %v4151_v32 = vunpack.i.l.bf16 %v4150_v10  ;;  %v4106_v10 = vunpack.i.l.bf16 %v5499_v42  ;;  %v4031_v42 = vunpack.i.l.bf16 %v5437_v6 }
 0x10a   : > { %4439 = vrot.lane.b32.xlu1 %v4408_v36, %s4826_s6  ;;  %v2414_v36 = vld [vmem:[%s4936_s23] sm:$0xff]  ;;  %v4155_v30 = vpop.permute.xlu0 %4154  ;;  %v1395_v56 = vsel %vm1369_vm2, %v5497_v61, %v4027_v39  ;;  %v4131_v61 = vunpack.i.l.bf16 %v5513_v19  ;;  %v4132_v39 = vunpack.i.h.bf16 %v5513_v19  ;;  %v443_v19 = vld [vmem:[#allocation2 + $0x39] sm:$0xff] }
 0x10b   : > { %v1532_v35 = vsel %vm1435_vm4, %v1500_v11, %v4151_v32  ;;  %v1533_v2 = vsel %vm1435_vm4, %v1501_v7, %v4152_v34  ;;  %v4157_v40 = vunpack.i.h.bf16 %v4155_v30  ;;  %v4156_v50 = vunpack.i.l.bf16 %v4155_v30 }
 0x10c   : > { %v4160_v37 = vpop.permute.xlu1 %4159  ;;  %v1597_v12 = vpack.c.bf16 %v1533_v2, %v1532_v35  ;;  %v1492_v34 = vsel %vm1369_vm2, %v559_v31, %v4146_v22  ;;  %v1493_v32 = vsel %vm1369_vm2, %v560_v33, %v4147_v58  ;;  %2478 = vrot.lane.b32.xlu0 %v2414_v36, %s4824_s15  ;;  %v1394_v31 = vsel %vm1369_vm2, %v5495_v47, %v4026_v3  ;;  %v2419_v3 = vld [vmem:[%s4936_s23 + $0x28] sm:$0xff] }
 0x10d   : > { %v4162_v41 = vunpack.i.h.bf16 %v4160_v37  ;;  %v4161_v5 = vunpack.i.l.bf16 %v4160_v37  ;;  %v1524_v7 = vsel %vm1402_vm3, %v1492_v34, %v4156_v50  ;;  %v1525_v29 = vsel %vm1402_vm3, %v1493_v32, %v4157_v40 }
 0x10e   : > { %1868 = vmatprep.mubr.bf16.mxu0 %v1597_v12  ;;  %2480 = vrot.lane.b32.xlu1 %v2415_v51, %s4824_s15  ;;  %v4165_v33 = vpop.permute.xlu0 %4164  ;;  %v4032_v37 = vunpack.i.h.bf16 %v5437_v6  ;;  %v4051_v12 = vunpack.i.l.bf16 %v5451_v21  ;;  %v1427_v47 = vsel %vm1402_vm3, %v1394_v31, %v4106_v10  ;;  %v1428_v36 = vsel %vm1402_vm3, %v1395_v56, %v4107_v43 }
 0x10f   : > { %1869 = vmatmul.mubr.bf16.vlgmr.msra.gmra.mrb[0].mxu0 %v1596_v26  ;;  %v1556_v58 = vsel %vm1435_vm4, %v1524_v7, %v4161_v5  ;;  %v1557_v22 = vsel %vm1435_vm4, %v1525_v29, %v4162_v41  ;;  %v4167_v35 = vunpack.i.h.bf16 %v4165_v33  ;;  %v4166_v2 = vunpack.i.l.bf16 %v4165_v33  ;;  %v2418_v26 = vld [vmem:[%s4936_s23 + $0x20] sm:$0xff]  ;;  %v2420_v33 = vld [vmem:[%s4936_s23 + $0x30] sm:$0xff] }
 0x110   : > { %v4170_v11 = vpop.permute.xlu1 %4169  ;;  %v1633_v51 = vpack.c.bf16 %v1557_v22, %v1556_v58  ;;  %2482 = vrot.lane.b32.xlu0 %v2416_v57, %s4824_s15  ;;  %v4052_v41 = vunpack.i.h.bf16 %v5451_v21  ;;  %v4460_v21 = vld [vmem:[%s6719_s1 + $0x88] sm:$0xff]   ;;  %v1372_v34 = vsel %vm1369_vm2, %v5293_v63, %v3971_v49  ;;  %v1373_v32 = vsel %vm1369_vm2, %v5295_v1, %v3972_v38  ;;  %v442_v7 = vld [vmem:[#allocation2 + $0x31] sm:$0xff] }
 0x111   : > { %v1460_v30 = vsel %vm1435_vm4, %v1427_v47, %v4166_v2  ;;  %v1461_v6 = vsel %vm1435_vm4, %v1428_v36, %v4167_v35  ;;  %v4172_v40 = vunpack.i.h.bf16 %v4170_v11  ;;  %v4171_v50 = vunpack.i.l.bf16 %v4170_v11  ;;  %v2421_v63 = vld [vmem:[%s4936_s23 + $0x38] sm:$0xff] }
 0x112   : > { %2484 = vrot.lane.b32.xlu1 %v2417_v53, %s4824_s15  ;;  %1964 = vmatprep.mubr.bf16.mxu1 %v1633_v51  ;;  %v4175_v43 = vpop.permute.xlu0 %4174  ;;  %v1632_v10 = vpack.c.bf16 %v1461_v6, %v1460_v30  ;;  %v1396_v53 = vsel %vm1369_vm2, %v5324_v13, %v4031_v42  ;;  %v4111_v11 = vunpack.i.l.bf16 %v5493_v27  ;;  %v1405_v31 = vsel %vm1402_vm3, %v1372_v34, %v4051_v12 }
 0x113   : > { %v4177_v29 = vunpack.i.h.bf16 %v4175_v43  ;;  %v4176_v57 = vunpack.i.l.bf16 %v4175_v43  ;;  %v1397_v1 = vsel %vm1369_vm2, %v5326_v14, %v4032_v37  ;;  %v4112_v13 = vunpack.i.h.bf16 %v5493_v27  ;;  %v466_v27 = vld [vmem:[#allocation2 + $0x151] sm:$0xff] }
 0x114   : > { %v5571_v5 = vpop.permute.xlu1 %4179  ;;  %1965 = vmatmul.mubr.bf16.vlgmr.msra.gmra.mrb[0].mxu1 %v1632_v10  ;;  %2486 = vrot.lane.b32.xlu0 %v2418_v26, %s4824_s15  ;;  %v1406_v49 = vsel %vm1402_vm3, %v1373_v32, %v4052_v41  ;;  %v1438_v42 = vsel %vm1435_vm4, %v1405_v31, %v4131_v61  ;;  %v1471_v58 = vsel %vm1369_vm2, %v443_v19, %v4172_v40  ;;  %v2423_v61 = vld [vmem:[%s4936_s23 + $0x48] sm:$0xff]  ;;  %v2422_v40 = vld [vmem:[%s4936_s23 + $0x40] sm:$0xff]  ;;  %v2425_v31 = vld [vmem:[%s4936_s23 + $0x58] sm:$0xff] }
 0x115   : > { %3835 = vmatpush3.bf16.msra.mxu1 %v5366_v28  ;;  %v1470_v22 = vsel %vm1369_vm2, %v442_v7, %v4171_v50  ;;  %v4181_v56 = vunpack.i.l.bf16 %v5571_v5  ;;  %v1439_v14 = vsel %vm1435_vm4, %v1406_v49, %v4132_v39  ;;  %v4182_v2 = vunpack.i.h.bf16 %v5571_v5  ;;  %v467_v28 = vld [vmem:[#allocation2 + $0x159] sm:$0xff] }
 0x116   : > { %2488 = vrot.lane.b32.xlu1 %v2419_v3, %s4824_s15  ;;  %v4185_v35 = vpop.permute.xlu0 %4184  ;;  %3836 = vmatprep.subr.bf16.mxu1 %v4460_v21  ;;  %v1502_v36 = vsel %vm1402_vm3, %v1470_v22, %v4176_v57  ;;  %v1503_v3 = vsel %vm1402_vm3, %v1471_v58, %v4177_v29  ;;  %v1429_v41 = vsel %vm1402_vm3, %v1396_v53, %v4111_v11  ;;  %v2424_v49 = vld [vmem:[%s4936_s23 + $0x50] sm:$0xff] }
 0x117   : > { %v4187_v37 = vunpack.i.h.bf16 %v4185_v35  ;;  %v4186_v12 = vunpack.i.l.bf16 %v4185_v35  ;;  %v1599_v26 = vpack.c.bf16 %v1439_v14, %v1438_v42  ;;  %v1430_v39 = vsel %vm1402_vm3, %v1397_v1, %v4112_v13  ;;  %v444_v42 = vld [vmem:[#allocation2 + $0x49] sm:$0xff] }
 0x118   : > { %v4190_v38 = vpop.permute.xlu1 %4189  ;;  %2490 = vrot.lane.b32.xlu0 %v2420_v33, %s4824_s15  ;;  %v1494_v50 = vsel %vm1369_vm2, %v466_v27, %v4181_v56  ;;  %v1495_v53 = vsel %vm1369_vm2, %v467_v28, %v4182_v2  ;;  %v445_v33 = vld [vmem:[#allocation2 + $0x51] sm:$0xff] }
 0x119   : > { %v4191_v51 = vunpack.i.l.bf16 %v4190_v38  ;;  %v4192_v47 = vunpack.i.h.bf16 %v4190_v38  ;;  %v1534_v5 = vsel %vm1435_vm4, %v1502_v36, %v4186_v12  ;;  %v1535_v6 = vsel %vm1435_vm4, %v1503_v3, %v4187_v37  ;;  %3837 = vmatpush3.bf16.msra.mxu1 %v4460_v21  ;;  %v2427_v2 = vld [vmem:[%s4936_s23 + $0x68] sm:$0xff] }
 0x11a   : > { %2492 = vrot.lane.b32.xlu1 %v2421_v63, %s4824_s15  ;;  %v4195_v34 = vpop.permute.xlu0 %4194  ;;  %v1600_v32 = vpack.c.bf16 %v1535_v6, %v1534_v5  ;;  %v3976_v36 = vunpack.i.l.bf16 %v5391_v46  ;;  %v4036_v3 = vunpack.i.l.bf16 %v5446_v18 }
 0x11b   : > { %v4197_v7 = vunpack.i.h.bf16 %v4195_v34  ;;  %v4196_v19 = vunpack.i.l.bf16 %v4195_v34  ;;  %v1526_v11 = vsel %vm1402_vm3, %v1494_v50, %v4191_v51  ;;  %v1527_v21 = vsel %vm1402_vm3, %v1495_v53, %v4192_v47  ;;  %v2426_v47 = vld [vmem:[%s4936_s23 + $0x60] sm:$0xff] }
 0x11c   : > { %v4200_v30 = vpop.permute.xlu1 %4199  ;;  %1876 = vmatprep.mubr.bf16.mxu0 %v1600_v32  ;;  %2494 = vrot.lane.b32.xlu0 %v2422_v40, %s4824_s15  ;;  %v3977_v51 = vunpack.i.h.bf16 %v5391_v46  ;;  %v4037_v50 = vunpack.i.h.bf16 %v5446_v18  ;;  %v2428_v32 = vld [vmem:[%s4936_s23 + $0x70] sm:$0xff]  ;;  %v1374_v53 = vsel %vm1369_vm2, %v5286_v59, %v3976_v36 }
 0x11d   : > { %v4202_v43 = vunpack.i.h.bf16 %v4200_v30  ;;  %v4201_v10 = vunpack.i.l.bf16 %v4200_v30  ;;  %1877 = vmatmul.mubr.bf16.gmra.mrb[4].mxu0 %v1599_v26  ;;  %v1558_v1 = vsel %vm1435_vm4, %v1526_v11, %v4196_v19  ;;  %v1559_v13 = vsel %vm1435_vm4, %v1527_v21, %v4197_v7 }
 0x11e   : > { %2496 = vrot.lane.b32.xlu1 %v2423_v61, %s4824_s15  ;;  %v4205_v58 = vpop.permute.xlu0 %4204  ;;  %v1636_v22 = vpack.c.bf16 %v1559_v13, %v1558_v1  ;;  %v4057_v26 = vunpack.i.h.bf16 %v5460_v45  ;;  %v1375_v7 = vsel %vm1369_vm2, %v5288_v60, %v3977_v51  ;;  %v4117_v19 = vunpack.i.h.bf16 %v5508_v54 }
 0x11f   : > { %v1462_v29 = vsel %vm1435_vm4, %v1429_v41, %v4201_v10  ;;  %v1463_v57 = vsel %vm1435_vm4, %v1430_v39, %v4202_v43  ;;  %v4207_v14 = vunpack.i.h.bf16 %v4205_v58  ;;  %v4206_v27 = vunpack.i.l.bf16 %v4205_v58 }
 0x120   : > { %v4210_v63 = vpop.permute.xlu1 %4209  ;;  %v1635_v38 = vpack.c.bf16 %v1463_v57, %v1462_v29  ;;  %1972 = vmatprep.mubr.bf16.mxu1 %v1636_v22  ;;  %2498 = vrot.lane.b32.xlu0 %v2424_v49, %s4824_s15  ;;  %v4056_v39 = vunpack.i.l.bf16 %v5460_v45  ;;  %v4116_v43 = vunpack.i.l.bf16 %v5508_v54  ;;  %v1398_v45 = vsel %vm1369_vm2, %v5315_v8, %v4036_v3 }
 0x121   : > { %v4212_v56 = vunpack.i.h.bf16 %v4210_v63  ;;  %v4211_v35 = vunpack.i.l.bf16 %v4210_v63  ;;  %v1473_v37 = vsel %vm1369_vm2, %v445_v33, %v4207_v14  ;;  %v1472_v12 = vsel %vm1369_vm2, %v444_v42, %v4206_v27  ;;  %v469_v63 = vld [vmem:[#allocation2 + $0x171] sm:$0xff] }
 0x122   : > { %2500 = vrot.lane.b32.xlu1 %v2425_v31, %s4824_s15  ;;  %1973 = vmatmul.mubr.bf16.gmra.mrb[4].mxu1 %v1635_v38  ;;  %v4215_v30 = vpop.permute.xlu0 %4214  ;;  %v468_v31 = vld [vmem:[#allocation2 + $0x169] sm:$0xff]  ;;  %v1407_v59 = vsel %vm1402_vm3, %v1374_v53, %v4056_v39  ;;  %v1408_v38 = vsel %vm1402_vm3, %v1375_v7, %v4057_v26  ;;  %v1399_v60 = vsel %vm1369_vm2, %v5317_v9, %v4037_v50  ;;  %v3981_v50 = vunpack.i.l.bf16 %v5398_v52 }
 0x123   : > { %v1504_v5 = vsel %vm1402_vm3, %v1472_v12, %v4211_v35  ;;  %v1505_v6 = vsel %vm1402_vm3, %v1473_v37, %v4212_v56  ;;  %v4217_v21 = vunpack.i.h.bf16 %v4215_v30  ;;  %v4216_v29 = vunpack.i.l.bf16 %v4215_v30  ;;  %v447_v30 = vld [vmem:[#allocation2 + $0x69] sm:$0xff] }
 0x124   : > { %v4220_v28 = vpop.permute.xlu1 %4219  ;;  %2502 = vrot.lane.b32.xlu0 %v2426_v47, %s4824_s15  ;;  %v1431_v42 = vsel %vm1402_vm3, %v1398_v45, %v4116_v43  ;;  %v1432_v35 = vsel %vm1402_vm3, %v1399_v60, %v4117_v19  ;;  %v4041_v53 = vunpack.i.l.bf16 %v5444_v24  ;;  %v3987_v60 = vunpack.i.h.bf16 %v5410_v17 }
 0x125   : > { %v4222_v41 = vunpack.i.h.bf16 %v4220_v28  ;;  %v4221_v61 = vunpack.i.l.bf16 %v4220_v28  ;;  %v1497_v14 = vsel %vm1369_vm2, %v469_v63, %v4217_v21  ;;  %v1496_v27 = vsel %vm1369_vm2, %v468_v31, %v4216_v29 }
 0x126   : > { %2504 = vrot.lane.b32.xlu1 %v2427_v2, %s4824_s15  ;;  %v4225_v11 = vpop.permute.xlu0 %4224  ;;  %v4062_v29 = vunpack.i.h.bf16 %v5458_v23  ;;  %v4042_v63 = vunpack.i.h.bf16 %v5444_v24  ;;  %v470_v24 = vld [vmem:[#allocation2 + $0x181] sm:$0xff] }
 0x127   : > { %v1536_v40 = vsel %vm1435_vm4, %v1504_v5, %v4221_v61  ;;  %v1537_v46 = vsel %vm1435_vm4, %v1505_v6, %v4222_v41  ;;  %v4227_v18 = vunpack.i.h.bf16 %v4225_v11  ;;  %v4226_v57 = vunpack.i.l.bf16 %v4225_v11  ;;  %v446_v61 = vld [vmem:[#allocation2 + $0x61] sm:$0xff] }
 0x128   : > { %v4230_v10 = vpop.permute.xlu1 %4229  ;;  %v1603_v34 = vpack.c.bf16 %v1537_v46, %v1536_v40  ;;  %2506 = vrot.lane.b32.xlu0 %v2428_v32, %s4824_s15  ;;  %v3982_v32 = vunpack.i.h.bf16 %v5398_v52  ;;  %v1376_v52 = vsel %vm1369_vm2, %v5335_v16, %v3981_v50 }
 0x129   : > { %v4232_v1 = vunpack.i.h.bf16 %v4230_v10  ;;  %v4231_v13 = vunpack.i.l.bf16 %v4230_v10  ;;  %v1440_v54 = vsel %vm1435_vm4, %v1407_v59, %v4226_v57  ;;  %v1441_v49 = vsel %vm1435_vm4, %v1408_v38, %v4227_v18 }
 0x12a   : > { %1884 = vmatprep.mubr.bf16.mxu0 %v1603_v34  ;;  %v4235_v22 = vpop.permute.xlu0 %4234  ;;  %v1602_v56 = vpack.c.bf16 %v1441_v49, %v1440_v54  ;;  %v4061_v18 = vunpack.i.l.bf16 %v5458_v23  ;;  %v1377_v38 = vsel %vm1369_vm2, %v5337_v4, %v3982_v32  ;;  %v1400_v23 = vsel %vm1369_vm2, %v5345_v48, %v4041_v53  ;;  %v448_v32 = vld [vmem:[#allocation2 + $0x79] sm:$0xff]  ;;  %v449_v53 = vld [vmem:[#allocation2 + $0x81] sm:$0xff] }
 0x12b   : > { %v4237_v2 = vunpack.i.h.bf16 %v4235_v22  ;;  %v4236_v51 = vunpack.i.l.bf16 %v4235_v22  ;;  %v1528_v9 = vsel %vm1402_vm3, %v1496_v27, %v4231_v13  ;;  %v1529_v37 = vsel %vm1402_vm3, %v1497_v14, %v4232_v1 }
 0x12c   : > { %v4240_v8 = vpop.permute.xlu1 %4239  ;;  %1885 = vmatmul.mubr.bf16.gmra.mrb[8].mxu0 %v1602_v56  ;;  %v4121_v1 = vunpack.i.l.bf16 %v5506_v44  ;;  %v1410_v4 = vsel %vm1402_vm3, %v1377_v38, %v4062_v29  ;;  %v1401_v14 = vsel %vm1369_vm2, %v5347_v20, %v4042_v63  ;;  %v569_v20 = vld [vmem:[#allocation2 + $0x32] sm:$0xff] }
 0x12d   : > { %v4242_v33 = vunpack.i.h.bf16 %v4240_v8  ;;  %v4241_v58 = vunpack.i.l.bf16 %v4240_v8  ;;  %v1560_v36 = vsel %vm1435_vm4, %v1528_v9, %v4236_v51  ;;  %v1561_v3 = vsel %vm1435_vm4, %v1529_v37, %v4237_v2 }
 0x12e   : > { %v4245_v5 = vpop.permute.xlu0 %4244  ;;  %v1639_v6 = vpack.c.bf16 %v1561_v3, %v1560_v36  ;;  %v4122_v8 = vunpack.i.h.bf16 %v5506_v44  ;;  %v1433_v2 = vsel %vm1402_vm3, %v1400_v23, %v4121_v1  ;;  %v571_v23 = vld [vmem:[#allocation2 + $0x4a] sm:$0xff] }
 0x12f   : > { %v1464_v12 = vsel %vm1435_vm4, %v1431_v42, %v4241_v58  ;;  %v1465_v28 = vsel %vm1435_vm4, %v1432_v35, %v4242_v33  ;;  %v4247_v40 = vunpack.i.h.bf16 %v4245_v5  ;;  %v4246_v46 = vunpack.i.l.bf16 %v4245_v5  ;;  %v471_v58 = vld [vmem:[#allocation2 + $0x189] sm:$0xff] }
 0x130   : > { %v4250_v47 = vpop.permute.xlu1 %4249  ;;  %v1638_v41 = vpack.c.bf16 %v1465_v28, %v1464_v12  ;;  %1980 = vmatprep.mubr.bf16.mxu1 %v1639_v6  ;;  %v1409_v35 = vsel %vm1402_vm3, %v1376_v52, %v4061_v18  ;;  %v1434_v28 = vsel %vm1402_vm3, %v1401_v14, %v4122_v8 }
 0x131   : > { %v4252_v26 = vunpack.i.h.bf16 %v4250_v47  ;;  %v4251_v39 = vunpack.i.l.bf16 %v4250_v47  ;;  %v1475_v43 = vsel %vm1369_vm2, %v447_v30, %v4247_v40  ;;  %v1474_v10 = vsel %vm1369_vm2, %v446_v61, %v4246_v46  ;;  %v570_v61 = vld [vmem:[#allocation2 + $0x3a] sm:$0xff] }
 0x132   : > { %1981 = vmatmul.mubr.bf16.gmra.mrb[8].mxu1 %v1638_v41  ;;  %v4255_v19 = vpop.permute.xlu0 %4254 }
 0x133   : > { %v1506_v11 = vsel %vm1402_vm3, %v1474_v10, %v4251_v39  ;;  %v1507_v21 = vsel %vm1402_vm3, %v1475_v43, %v4252_v26  ;;  %v4257_v49 = vunpack.i.h.bf16 %v4255_v19  ;;  %v4256_v42 = vunpack.i.l.bf16 %v4255_v19 }
 0x134   : > { %v4260_v34 = vpop.permute.xlu1 %4259  ;;  %v3986_v39 = vunpack.i.l.bf16 %v5410_v17  ;;  %v1598_v19 = vpack.c.bf16 %v570_v61, %v569_v20 }
 0x135   : > { %v4262_v7 = vunpack.i.h.bf16 %v4260_v34  ;;  %v4261_v45 = vunpack.i.l.bf16 %v4260_v34  ;;  %v1499_v47 = vsel %vm1369_vm2, %v471_v58, %v4257_v49  ;;  %v1498_v36 = vsel %vm1369_vm2, %v470_v24, %v4256_v42  ;;  %v573_v49 = vld [vmem:[#allocation2 + $0x62] sm:$0xff]  ;;  %v574_v42 = vld [vmem:[#allocation2 + $0x6a] sm:$0xff] }
 0x136   : > { %v4265_v54 = vpop.permute.xlu0 %4264  ;;  %v1378_v17 = vsel %vm1369_vm2, %v5356_v0, %v3986_v39  ;;  %v572_v0 = vld [vmem:[#allocation2 + $0x52] sm:$0xff] }
 0x137   : > { %v1538_v57 = vsel %vm1435_vm4, %v1506_v11, %v4261_v45  ;;  %v1539_v31 = vsel %vm1435_vm4, %v1507_v21, %v4262_v7  ;;  %v4267_v16 = vunpack.i.h.bf16 %v4265_v54  ;;  %v4266_v33 = vunpack.i.l.bf16 %v4265_v54 }
 0x138   : > { %v4270_v13 = vpop.permute.xlu1 %4269  ;;  %v1606_v59 = vpack.c.bf16 %v1539_v31, %v1538_v57  ;;  %v4067_v11 = vunpack.i.h.bf16 %v5467_v55  ;;  %v4066_v21 = vunpack.i.l.bf16 %v5467_v55  ;;  %v1379_v57 = vsel %vm1369_vm2, %v5358_v25, %v3987_v60 }
 0x139   : > { %v4272_v22 = vunpack.i.h.bf16 %v4270_v13  ;;  %v4271_v56 = vunpack.i.l.bf16 %v4270_v13  ;;  %v1442_v44 = vsel %vm1435_vm4, %v1409_v35, %v4266_v33  ;;  %v1443_v27 = vsel %vm1435_vm4, %v1410_v4, %v4267_v16 }
 0x13a   : > { %1892 = vmatprep.mubr.bf16.mxu0 %v1606_v59  ;;  %v4275_v37 = vpop.permute.xlu0 %4274  ;;  %v1605_v12 = vpack.c.bf16 %v1443_v27, %v1442_v44  ;;  %v1411_v25 = vsel %vm1402_vm3, %v1378_v17, %v4066_v21  ;;  %v1412_v60 = vsel %vm1402_vm3, %v1379_v57, %v4067_v11  ;;  %v3992_v16 = vunpack.i.h.bf16 %v5408_v62  ;;  %v450_v27 = vld [vmem:[#allocation2 + $0x91] sm:$0xff] }
 0x13b   : > { %v4277_v3 = vunpack.i.h.bf16 %v4275_v37  ;;  %v4276_v41 = vunpack.i.l.bf16 %v4275_v37  ;;  %v1530_v30 = vsel %vm1402_vm3, %v1498_v36, %v4271_v56  ;;  %v1531_v5 = vsel %vm1402_vm3, %v1499_v47, %v4272_v22  ;;  %v6766_v36 = vld [vmem:[#allocation7_spill] sm:$0xff] }
 0x13c   : > { %v4280_v48 = vpop.permute.xlu1 %4279  ;;  %1893 = vmatmul.mubr.bf16.gmra.mrb[12].mxu0 %v1605_v12  ;;  %v3991_v33 = vunpack.i.l.bf16 %v5408_v62  ;;  %v1601_v14 = vpack.c.bf16 %v572_v0, %v571_v23  ;;  %v1604_v37 = vpack.c.bf16 %v574_v42, %v573_v49  ;;  %v4072_v62 = vunpack.i.h.bf16 %v5465_v15  ;;  %v6769_v0 = vld [vmem:[#allocation18_spill] sm:$0xff]  ;;  %v6770_v49 = vld [vmem:[#allocation9_spill] sm:$0xff] }
 0x13d   : > { %v4282_v51 = vunpack.i.h.bf16 %v4280_v48  ;;  %v4281_v9 = vunpack.i.l.bf16 %v4280_v48  ;;  %v1562_v46 = vsel %vm1435_vm4, %v1530_v30, %v4276_v41  ;;  %v1563_v50 = vsel %vm1435_vm4, %v1531_v5, %v4277_v3  ;;  %v6767_v41 = vld [vmem:[#allocation8_spill] sm:$0xff] }
 0x13e   : > { %v4285_v7 = vpop.permute.xlu0 %4284  ;;  %v1642_v45 = vpack.c.bf16 %v1563_v50, %v1562_v46  ;;  %v4071_v12 = vunpack.i.l.bf16 %v5465_v15  ;;  %v1380_v3 = vsel %vm1369_vm2, %v6766_v36, %v3991_v33  ;;  %v1381_v20 = vsel %vm1369_vm2, %v6767_v41, %v3992_v16  ;;  %v575_v46 = vld [vmem:[#allocation2 + $0x7a] sm:$0xff]  ;;  %v576_v50 = vld [vmem:[#allocation2 + $0x82] sm:$0xff] }
 0x13f   : > { %v1466_v6 = vsel %vm1435_vm4, %v1433_v2, %v4281_v9  ;;  %v1467_v26 = vsel %vm1435_vm4, %v1434_v28, %v4282_v51  ;;  %v4287_v29 = vunpack.i.h.bf16 %v4285_v7  ;;  %v4286_v18 = vunpack.i.l.bf16 %v4285_v7  ;;  %v451_v2 = vld [vmem:[#allocation2 + $0x99] sm:$0xff]  ;;  %v6771_v16 = vld [vmem:[#allocation10_spill] sm:$0xff] }
 0x140   : > { %v4290_v40 = vpop.permute.xlu1 %4289  ;;  %v1641_v43 = vpack.c.bf16 %v1467_v26, %v1466_v6  ;;  %1988 = vmatprep.mubr.bf16.mxu1 %v1642_v45  ;;  %v578_v7 = vld [vmem:[#allocation2 + $0x9a] sm:$0xff] }
 0x141   : > { %v4292_v10 = vunpack.i.h.bf16 %v4290_v40  ;;  %v4291_v34 = vunpack.i.l.bf16 %v4290_v40  ;;  %v1477_v31 = vsel %vm1369_vm2, %v449_v53, %v4287_v29  ;;  %v1476_v52 = vsel %vm1369_vm2, %v448_v32, %v4286_v18  ;;  %v577_v53 = vld [vmem:[#allocation2 + $0x92] sm:$0xff] }
 0x142   : > { %1989 = vmatmul.mubr.bf16.gmra.mrb[12].mxu1 %v1641_v43  ;;  %v4295_v59 = vpop.permute.xlu0 %4294  ;;  %v1414_v32 = vsel %vm1402_vm3, %v1381_v20, %v4072_v62  ;;  %v6768_v45 = vld [vmem:[#allocation12_spill] sm:$0xff]  ;;  %v1610_v23 = vpack.c.bf16 %v578_v7, %v577_v53  ;;  %v581_v62 = vld [vmem:[#allocation2 + $0xc2] sm:$0xff] }
 0x143   : > { %v1508_v55 = vsel %vm1402_vm3, %v1476_v52, %v4291_v34  ;;  %v1509_v38 = vsel %vm1402_vm3, %v1477_v31, %v4292_v10  ;;  %3838 = vmatprep.mubr.msk.bf16.mxu1 %vm1369_vm2, %v1598_v19  ;;  %v4297_v8 = vunpack.i.h.bf16 %v4295_v59  ;;  %v4296_v54 = vunpack.i.l.bf16 %v4295_v59  ;;  %v453_v59 = vld [vmem:[#allocation2 + $0xb1] sm:$0xff] }
 0x144   : > { %v4300_v63 = vpop.permute.xlu1 %4299  ;;  %v1413_v34 = vsel %vm1402_vm3, %v1380_v3, %v4071_v12  ;;  %v3997_v19 = vunpack.i.h.bf16 %v6768_v45  ;;  %v3996_v11 = vunpack.i.l.bf16 %v6768_v45  ;;  %v1607_v52 = vpack.c.bf16 %v576_v50, %v575_v46  ;;  %v582_v12 = vld [vmem:[#allocation2 + $0xca] sm:$0xff] }
 0x145   : > { %v4302_v1 = vunpack.i.h.bf16 %v4300_v63  ;;  %v4301_v13 = vunpack.i.l.bf16 %v4300_v63  ;;  %v1540_v56 = vsel %vm1435_vm4, %v1508_v55, %v4296_v54  ;;  %v1541_v35 = vsel %vm1435_vm4, %v1509_v38, %v4297_v8  ;;  %v4717_v45 = vld [vmem:[#allocation2 + $0xa8] sm:$0xff] }
 0x146   : > { %v4305_v51 = vpop.permute.xlu0 %4304  ;;  %v1609_v9 = vpack.c.bf16 %v1541_v35, %v1540_v56  ;;  %v4077_v8 = vunpack.i.h.bf16 %v6769_v0  ;;  %v4076_v54 = vunpack.i.l.bf16 %v6769_v0  ;;  %v1382_v42 = vsel %vm1369_vm2, %v6770_v49, %v3996_v11  ;;  %v4718_v11 = vld [vmem:[#allocation2 + $0xb0] sm:$0xff] }
 0x147   : > { %v1444_v24 = vsel %vm1435_vm4, %v1411_v25, %v4301_v13  ;;  %v1445_v58 = vsel %vm1435_vm4, %v1412_v60, %v4302_v1  ;;  %v4307_v28 = vunpack.i.h.bf16 %v4305_v51  ;;  %v4306_v47 = vunpack.i.l.bf16 %v4305_v51  ;;  %v452_v13 = vld [vmem:[#allocation2 + $0xa9] sm:$0xff] }
 0x148   : > { %v4310_v22 = vpop.permute.xlu1 %4309  ;;  %v1608_v4 = vpack.c.bf16 %v1445_v58, %v1444_v24  ;;  %1900 = vmatprep.mubr.bf16.mxu0 %v1609_v9  ;;  %v1383_v33 = vsel %vm1369_vm2, %v6771_v16, %v3997_v19  ;;  %v1415_v9 = vsel %vm1402_vm3, %v1382_v42, %v4076_v54  ;;  %v586_v54 = vld [vmem:[#allocation2 + $0xfa] sm:$0xff] }
 0x149   : > { %v4312_v48 = vunpack.i.h.bf16 %v4310_v22  ;;  %v4311_v44 = vunpack.i.l.bf16 %v4310_v22  ;;  %v1479_v61 = vsel %vm1369_vm2, %v451_v2, %v4307_v28  ;;  %v1478_v30 = vsel %vm1369_vm2, %v450_v27, %v4306_v47  ;;  %v580_v27 = vld [vmem:[#allocation2 + $0xb2] sm:$0xff] }
 0x14a   : > { %1901 = vmatmul.mubr.bf16.gmra.mrb[16].mxu0 %v1608_v4  ;;  %3839 = vmatmul.mubr.msk.bf16.vlgmr.msra.gmra.mrb[16].mxu1 %vm1369_vm2, %v1601_v14  ;;  %v4315_v15 = vpop.permute.xlu0 %4314  ;;  %v6772_v28 = vld [vmem:[#allocation11_spill] sm:$0xff] }
 0x14b   : > { %v1510_v39 = vsel %vm1402_vm3, %v1478_v30, %v4311_v44  ;;  %v1511_v40 = vsel %vm1402_vm3, %v1479_v61, %v4312_v48  ;;  %3842 = vmatprep.mubr.msk.bf16.mxu1 %vm1369_vm2, %v1604_v37  ;;  %v4317_v43 = vunpack.i.h.bf16 %v4315_v15  ;;  %v4316_v10 = vunpack.i.l.bf16 %v4315_v15  ;;  %v579_v44 = vld [vmem:[#allocation2 + $0xaa] sm:$0xff] }
 0x14c   : > { %v4320_v5 = vpop.permute.xlu1 %4319  ;;  %v1416_v37 = vsel %vm1402_vm3, %v1383_v33, %v4077_v8  ;;  %v4002_v47 = vunpack.i.h.bf16 %v6772_v28  ;;  %v4001_v36 = vunpack.i.l.bf16 %v6772_v28  ;;  %v585_v8 = vld [vmem:[#allocation2 + $0xf2] sm:$0xff]  ;;  %v4719_v28 = vld [vmem:[#allocation2 + $0xc0] sm:$0xff] }
 0x14d   : > { %v4322_v6 = vunpack.i.h.bf16 %v4320_v5  ;;  %v4321_v26 = vunpack.i.l.bf16 %v4320_v5  ;;  %v1542_v17 = vsel %vm1435_vm4, %v1510_v39, %v4316_v10  ;;  %v1543_v57 = vsel %vm1435_vm4, %v1511_v40, %v4317_v43  ;;  %v454_v39 = vld [vmem:[#allocation2 + $0xc1] sm:$0xff]  ;;  %v455_v40 = vld [vmem:[#allocation2 + $0xc9] sm:$0xff] }
 0x14e   : > { %v4325_v55 = vpop.permute.xlu0 %4324  ;;  %v1612_v38 = vpack.c.bf16 %v1543_v57, %v1542_v17  ;;  %v1616_v43 = vpack.c.bf16 %v582_v12, %v581_v62  ;;  %v6773_v10 = vld [vmem:[#allocation17_spill] sm:$0xff]  ;;  %v1384_v19 = vsel %vm1369_vm2, %v4717_v45, %v4001_v36  ;;  %v4720_v36 = vld [vmem:[#allocation2 + $0xc8] sm:$0xff]  ;;  %v2431_v45 = vld [vmem:[%s4936_s23 + $0x88] sm:$0xff] }
 0x14f   : > { %v1446_v21 = vsel %vm1435_vm4, %v1413_v34, %v4321_v26  ;;  %v1447_v29 = vsel %vm1435_vm4, %v1414_v32, %v4322_v6  ;;  %v4327_v25 = vunpack.i.h.bf16 %v4325_v55  ;;  %v4326_v60 = vunpack.i.l.bf16 %v4325_v55 }
 0x150   : > { %v4330_v18 = vpop.permute.xlu1 %4329  ;;  %v1611_v31 = vpack.c.bf16 %v1447_v29, %v1446_v21  ;;  %1908 = vmatprep.mubr.bf16.mxu0 %v1612_v38  ;;  %v1613_v6 = vpack.c.bf16 %v580_v27, %v579_v44  ;;  %v4082_v34 = vunpack.i.h.bf16 %v6773_v10  ;;  %v4081_v32 = vunpack.i.l.bf16 %v6773_v10 }
 0x151   : > { %v4332_v63 = vunpack.i.h.bf16 %v4330_v18  ;;  %v4331_v1 = vunpack.i.l.bf16 %v4330_v18  ;;  %v1481_v24 = vsel %vm1369_vm2, %v453_v59, %v4327_v25  ;;  %v1480_v58 = vsel %vm1369_vm2, %v452_v13, %v4326_v60  ;;  %v583_v13 = vld [vmem:[#allocation2 + $0xda] sm:$0xff]  ;;  %v584_v59 = vld [vmem:[#allocation2 + $0xe2] sm:$0xff] }
 0x152   : > { %1909 = vmatmul.mubr.bf16.gmra.mrb[20].mxu0 %v1611_v31  ;;  %3843 = vmatmul.mubr.msk.bf16.gmra.mrb[20].mxu1 %vm1369_vm2, %v1607_v52  ;;  %v4335_v4 = vpop.permute.xlu0 %4334  ;;  %v1385_v21 = vsel %vm1369_vm2, %v4718_v11, %v4002_v47  ;;  %v6774_v25 = vld [vmem:[#allocation14_spill] sm:$0xff] }
 0x153   : > { %v1512_v14 = vsel %vm1402_vm3, %v1480_v58, %v4331_v1  ;;  %v1513_v48 = vsel %vm1402_vm3, %v1481_v24, %v4332_v63  ;;  %3846 = vmatprep.mubr.msk.bf16.mxu1 %vm1369_vm2, %v1610_v23  ;;  %v4337_v2 = vunpack.i.h.bf16 %v4335_v4  ;;  %v4336_v51 = vunpack.i.l.bf16 %v4335_v4 }
 0x154   : > { %v4340_v22 = vpop.permute.xlu1 %4339  ;;  %v1417_v23 = vsel %vm1402_vm3, %v1384_v19, %v4081_v32  ;;  %v1418_v0 = vsel %vm1402_vm3, %v1385_v21, %v4082_v34  ;;  %v4007_v60 = vunpack.i.h.bf16 %v6774_v25  ;;  %v4006_v49 = vunpack.i.l.bf16 %v6774_v25  ;;  %v6776_v19 = vld [vmem:[#allocation13_spill] sm:$0xff] }
 0x155   : > { %v4342_v56 = vunpack.i.h.bf16 %v4340_v22  ;;  %v4341_v35 = vunpack.i.l.bf16 %v4340_v22  ;;  %v1544_v61 = vsel %vm1435_vm4, %v1512_v14, %v4336_v51  ;;  %v1545_v30 = vsel %vm1435_vm4, %v1513_v48, %v4337_v2  ;;  %v456_v14 = vld [vmem:[#allocation2 + $0xd9] sm:$0xff]  ;;  %v457_v48 = vld [vmem:[#allocation2 + $0xe1] sm:$0xff] }
 0x156   : > { %v4345_v46 = vpop.permute.xlu0 %4344  ;;  %v1615_v50 = vpack.c.bf16 %v1545_v30, %v1544_v61  ;;  %v1622_v2 = vpack.c.bf16 %v586_v54, %v585_v8  ;;  %v6775_v51 = vld [vmem:[#allocation20_spill] sm:$0xff]  ;;  %v1386_v47 = vsel %vm1369_vm2, %v4719_v28, %v4006_v49  ;;  %v2429_v30 = vld [vmem:[%s4936_s23 + $0x78] sm:$0xff]  ;;  %v4012_v11 = vunpack.i.h.bf16 %v6776_v19  ;;  %v6777_v8 = vld [vmem:[#allocation19_spill] sm:$0xff] }
 0x157   : > { %v1448_v3 = vsel %vm1435_vm4, %v1415_v9, %v4341_v35  ;;  %v1449_v41 = vsel %vm1435_vm4, %v1416_v37, %v4342_v56  ;;  %v4347_v53 = vunpack.i.h.bf16 %v4345_v46  ;;  %v4346_v7 = vunpack.i.l.bf16 %v4345_v46  ;;  %v588_v46 = vld [vmem:[#allocation2 + $0x112] sm:$0xff]  ;;  %2508 = vrot.lane.b32.xlu1 %v2429_v30, %s4824_s15 }
 0x158   : > { %v4350_v20 = vpop.permute.xlu1 %4349  ;;  %v1614_v5 = vpack.c.bf16 %v1449_v41, %v1448_v3  ;;  %1916 = vmatprep.mubr.bf16.mxu0 %v1615_v50  ;;  %v1619_v56 = vpack.c.bf16 %v584_v59, %v583_v13  ;;  %v4087_v9 = vunpack.i.h.bf16 %v6775_v51  ;;  %v4086_v37 = vunpack.i.l.bf16 %v6775_v51  ;;  %v589_v50 = vld [vmem:[#allocation2 + $0x122] sm:$0xff]  ;;  %v458_v59 = vld [vmem:[#allocation2 + $0xf1] sm:$0xff]  ;;  %v591_v51 = vld [vmem:[#allocation2 + $0x13a] sm:$0xff] }
 0x159   : > { %v4352_v26 = vunpack.i.h.bf16 %v4350_v20  ;;  %v4351_v15 = vunpack.i.l.bf16 %v4350_v20  ;;  %v1483_v29 = vsel %vm1369_vm2, %v455_v40, %v4347_v53  ;;  %v1482_v18 = vsel %vm1369_vm2, %v454_v39, %v4346_v7  ;;  %v587_v40 = vld [vmem:[#allocation2 + $0x10a] sm:$0xff] }
 0x15a   : > { %1917 = vmatmul.mubr.bf16.gmra.mrb[24].mxu0 %v1614_v5  ;;  %3847 = vmatmul.mubr.msk.bf16.gmra.mrb[24].mxu1 %vm1369_vm2, %v1613_v6  ;;  %v4355_v52 = vpop.permute.xlu0 %4354  ;;  %v1387_v3 = vsel %vm1369_vm2, %v4720_v36, %v4007_v60  ;;  %v1419_v34 = vsel %vm1402_vm3, %v1386_v47, %v4086_v37  ;;  %v590_v53 = vld [vmem:[#allocation2 + $0x12a] sm:$0xff]  ;;  %v4011_v21 = vunpack.i.l.bf16 %v6776_v19  ;;  %v4092_v54 = vunpack.i.h.bf16 %v6777_v8  ;;  %v593_v37 = vld [vmem:[#allocation2 + $0x152] sm:$0xff]  ;;  %v594_v36 = vld [vmem:[#allocation2 + $0x15a] sm:$0xff] }
 0x15b   : > { %v1514_v63 = vsel %vm1402_vm3, %v1482_v18, %v4351_v15  ;;  %v1515_v1 = vsel %vm1402_vm3, %v1483_v29, %v4352_v26  ;;  %3850 = vmatprep.mubr.msk.bf16.mxu1 %vm1369_vm2, %v1616_v43  ;;  %v4357_v55 = vunpack.i.h.bf16 %v4355_v52  ;;  %v4356_v38 = vunpack.i.l.bf16 %v4355_v52  ;;  %v2430_v7 = vld [vmem:[%s4936_s23 + $0x80] sm:$0xff]  ;;  %2512 = vrot.lane.b32.xlu1 %v2431_v45, %s4824_s15  ;;  %v6779_v19 = vld [vmem:[#allocation22_spill] sm:$0xff] }
 0x15c   : > { %v4360_v17 = vpop.permute.xlu1 %4359  ;;  %v1420_v32 = vsel %vm1402_vm3, %v1387_v3, %v4087_v9  ;;  %2510 = vrot.lane.b32.xlu0 %v2430_v7, %s4824_s15  ;;  %v4091_v25 = vunpack.i.l.bf16 %v6777_v8  ;;  %v592_v9 = vld [vmem:[#allocation2 + $0x142] sm:$0xff]  ;;  %v2434_v3 = vld [vmem:[%s4936_s23 + $0xa0] sm:$0xff]  ;;  %v1634_v45 = vpack.c.bf16 %v594_v36, %v593_v37 }
 0x15d   : > { %v4362_v57 = vunpack.i.h.bf16 %v4360_v17  ;;  %v4361_v31 = vunpack.i.l.bf16 %v4360_v17  ;;  %v1546_v24 = vsel %vm1435_vm4, %v1514_v63, %v4356_v38  ;;  %v1547_v58 = vsel %vm1435_vm4, %v1515_v1, %v4357_v55  ;;  %v459_v55 = vld [vmem:[#allocation2 + $0xf9] sm:$0xff] }
 0x15e   : > { %v4365_v44 = vpop.permute.xlu0 %4364  ;;  %v1618_v27 = vpack.c.bf16 %v1547_v58, %v1546_v24  ;;  %v1625_v63 = vpack.c.bf16 %v588_v46, %v587_v40  ;;  %v4722_v24 = vld [vmem:[#allocation2 + $0xe0] sm:$0xff]  ;;  %v1631_v46 = vpack.c.bf16 %v592_v9, %v591_v51  ;;  %v2439_v9 = vld [vmem:[%s4936_s23 + $0xc8] sm:$0xff] }
 0x15f   : > { %v1450_v42 = vsel %vm1435_vm4, %v1417_v23, %v4361_v31  ;;  %v1451_v16 = vsel %vm1435_vm4, %v1418_v0, %v4362_v57  ;;  %v4367_v62 = vunpack.i.h.bf16 %v4365_v44  ;;  %v4366_v12 = vunpack.i.l.bf16 %v4365_v44 }
 0x160   : > { %v4370_v33 = vpop.permute.xlu1 %4369  ;;  %v1617_v22 = vpack.c.bf16 %v1451_v16, %v1450_v42  ;;  %1924 = vmatprep.mubr.bf16.mxu0 %v1618_v27  ;;  %v1628_v0 = vpack.c.bf16 %v590_v53, %v589_v50  ;;  %v2432_v42 = vld [vmem:[%s4936_s23 + $0x90] sm:$0xff]  ;;  %v4721_v16 = vld [vmem:[#allocation2 + $0xd8] sm:$0xff]  ;;  %v1389_v58 = vsel %vm1369_vm2, %v4722_v24, %v4012_v11  ;;  %v4097_v11 = vunpack.i.h.bf16 %v6779_v19  ;;  %v598_v24 = vld [vmem:[#allocation2 + $0x18a] sm:$0xff] }
 0x161   : > { %v4372_v35 = vunpack.i.h.bf16 %v4370_v33  ;;  %v4371_v4 = vunpack.i.l.bf16 %v4370_v33  ;;  %v1485_v41 = vsel %vm1369_vm2, %v457_v48, %v4367_v62  ;;  %v1484_v20 = vsel %vm1369_vm2, %v456_v14, %v4366_v12  ;;  %2514 = vrot.lane.b32.xlu0 %v2432_v42, %s4824_s15  ;;  %v2436_v50 = vld [vmem:[%s4936_s23 + $0xb0] sm:$0xff] }
 0x162   : > { %1925 = vmatmul.mubr.bf16.gmra.mrb[28].mxu0 %v1617_v22  ;;  %3851 = vmatmul.mubr.msk.bf16.gmra.mrb[28].mxu1 %vm1369_vm2, %v1619_v56  ;;  %v4375_v26 = vpop.permute.xlu0 %4374  ;;  %v1388_v33 = vsel %vm1369_vm2, %v4721_v16, %v4011_v21  ;;  %v1422_v47 = vsel %vm1402_vm3, %v1389_v58, %v4092_v54  ;;  %v4096_v21 = vunpack.i.l.bf16 %v6779_v19  ;;  %v595_v54 = vld [vmem:[#allocation2 + $0x16a] sm:$0xff] }
 0x163   : > { %v1516_v15 = vsel %vm1402_vm3, %v1484_v20, %v4371_v4  ;;  %v1517_v39 = vsel %vm1402_vm3, %v1485_v41, %v4372_v35  ;;  %3854 = vmatprep.mubr.msk.bf16.mxu1 %vm1369_vm2, %v1622_v2  ;;  %v4377_v43 = vunpack.i.h.bf16 %v4375_v26  ;;  %v4376_v10 = vunpack.i.l.bf16 %v4375_v26  ;;  %v2433_v4 = vld [vmem:[%s4936_s23 + $0x98] sm:$0xff]  ;;  %v2435_v41 = vld [vmem:[%s4936_s23 + $0xa8] sm:$0xff]  ;;  %v2438_v58 = vld [vmem:[%s4936_s23 + $0xc0] sm:$0xff] }
 0x164   : > { %v4380_v61 = vpop.permute.xlu1 %4379  ;;  %2516 = vrot.lane.b32.xlu1 %v2433_v4, %s4824_s15  ;;  %v1421_v28 = vsel %vm1402_vm3, %v1388_v33, %v4091_v25  ;;  %v6778_v20 = vld [vmem:[#allocation16_spill] sm:$0xff]  ;;  %v597_v33 = vld [vmem:[#allocation2 + $0x182] sm:$0xff] }
 0x165   : > { %v4382_v5 = vunpack.i.h.bf16 %v4380_v61  ;;  %v4381_v6 = vunpack.i.l.bf16 %v4380_v61  ;;  %v1548_v57 = vsel %vm1435_vm4, %v1516_v15, %v4376_v10  ;;  %v1549_v31 = vsel %vm1435_vm4, %v1517_v39, %v4377_v43  ;;  %2518 = vrot.lane.b32.xlu0 %v2434_v3, %s4824_s15  ;;  %v596_v25 = vld [vmem:[#allocation2 + $0x172] sm:$0xff] }
 0x166   : > { %v4385_v38 = vpop.permute.xlu0 %4384  ;;  %v1621_v23 = vpack.c.bf16 %v1549_v31, %v1548_v57  ;;  %v4017_v61 = vunpack.i.h.bf16 %v6778_v20  ;;  %v4016_v30 = vunpack.i.l.bf16 %v6778_v20  ;;  %v4724_v31 = vld [vmem:[#allocation2 + $0xf8] sm:$0xff]  ;;  %v1637_v51 = vpack.c.bf16 %v596_v25, %v595_v54 }
 0x167   : > { %v1452_v29 = vsel %vm1435_vm4, %v1419_v34, %v4381_v6  ;;  %v1453_v18 = vsel %vm1435_vm4, %v1420_v32, %v4382_v5  ;;  %v4387_v60 = vunpack.i.h.bf16 %v4385_v38  ;;  %v4386_v49 = vunpack.i.l.bf16 %v4385_v38  ;;  %v460_v34 = vld [vmem:[#allocation2 + $0x109] sm:$0xff]  ;;  %v461_v32 = vld [vmem:[#allocation2 + $0x111] sm:$0xff] }
 0x168   : > { %v4390_v17 = vpop.permute.xlu1 %4389  ;;  %v1620_v52 = vpack.c.bf16 %v1453_v18, %v1452_v29  ;;  %1932 = vmatprep.mubr.bf16.mxu0 %v1621_v23  ;;  %2520 = vrot.lane.b32.xlu1 %v2435_v41, %s4824_s15  ;;  %v1640_v3 = vpack.c.bf16 %v598_v24, %v597_v33  ;;  %v6781_v41 = vld [vmem:[#allocation21_spill] sm:$0xff] }
 0x169   : > { %v4392_v1 = vunpack.i.h.bf16 %v4390_v17  ;;  %v4391_v13 = vunpack.i.l.bf16 %v4390_v17  ;;  %v1487_v22 = vsel %vm1369_vm2, %v459_v55, %v4387_v60  ;;  %v1486_v56 = vsel %vm1369_vm2, %v458_v59, %v4386_v49  ;;  %v4723_v17 = vld [vmem:[#allocation2 + $0xf0] sm:$0xff]  ;;  %2522 = vrot.lane.b32.xlu0 %v2436_v50, %s4824_s15  ;;  %v2437_v59 = vld [vmem:[%s4936_s23 + $0xb8] sm:$0xff] }
 0x16a   : > { %1933 = vmatmul.mubr.bf16.gmra.mrb[32].mxu0 %v1620_v52  ;;  %3855 = vmatmul.mubr.msk.bf16.gmra.mrb[32].mxu1 %vm1369_vm2, %v1625_v63  ;;  %v4395_v44 = vpop.permute.xlu0 %4394  ;;  %v1390_v57 = vsel %vm1369_vm2, %v4723_v17, %v4016_v30  ;;  %v1391_v52 = vsel %vm1369_vm2, %v4724_v31, %v4017_v61  ;;  %v4102_v20 = vunpack.i.h.bf16 %v6781_v41  ;;  %v4101_v61 = vunpack.i.l.bf16 %v6781_v41  ;;  %v2443_v31 = vld [vmem:[%s4936_s23 + $0xe8] sm:$0xff] }
 0x16b   : > { %v1518_v27 = vsel %vm1402_vm3, %v1486_v56, %v4391_v13  ;;  %v1519_v2 = vsel %vm1402_vm3, %v1487_v22, %v4392_v1  ;;  %3858 = vmatprep.mubr.msk.bf16.mxu1 %vm1369_vm2, %v1628_v0  ;;  %v4397_v62 = vunpack.i.h.bf16 %v4395_v44  ;;  %v4396_v12 = vunpack.i.l.bf16 %v4395_v44  ;;  %v6780_v22 = vld [vmem:[#allocation15_spill] sm:$0xff] }
 0x16c   : > { %v4400_v35 = vpop.permute.xlu1 %4399  ;;  %2524 = vrot.lane.b32.xlu1 %v2437_v59, %s4824_s15  ;;  %v1423_v42 = vsel %vm1402_vm3, %v1390_v57, %v4096_v21  ;;  %v1424_v16 = vsel %vm1402_vm3, %v1391_v52, %v4097_v11  ;;  %v4022_v56 = vunpack.i.h.bf16 %v6780_v22  ;;  %v599_v11 = vld [vmem:[#allocation2 + $0x19a] sm:$0xff]  ;;  %v600_v21 = vld [vmem:[#allocation2 + $0x1a2] sm:$0xff] }
 0x16d   : > { %v4402_v14 = vunpack.i.h.bf16 %v4400_v35  ;;  %v4401_v48 = vunpack.i.l.bf16 %v4400_v35  ;;  %v1550_v15 = vsel %vm1435_vm4, %v1518_v27, %v4396_v12  ;;  %v1551_v39 = vsel %vm1435_vm4, %v1519_v2, %v4397_v62  ;;  %2526 = vrot.lane.b32.xlu0 %v2438_v58, %s4824_s15  ;;  %v462_v12 = vld [vmem:[#allocation2 + $0x121] sm:$0xff] }
 0x16e   : > { %v4405_v53 = vpop.permute.xlu0 %4404  ;;  %v1624_v7 = vpack.c.bf16 %v1551_v39, %v1550_v15  ;;  %v4021_v35 = vunpack.i.l.bf16 %v6780_v22  ;;  %v2441_v39 = vld [vmem:[%s4936_s23 + $0xd8] sm:$0xff] }
 0x16f   : > { %v1454_v5 = vsel %vm1435_vm4, %v1421_v28, %v4401_v48  ;;  %v1455_v6 = vsel %vm1435_vm4, %v1422_v47, %v4402_v14  ;;  %v4407_v29 = vunpack.i.h.bf16 %v4405_v53  ;;  %v4406_v18 = vunpack.i.l.bf16 %v4405_v53  ;;  %v463_v28 = vld [vmem:[#allocation2 + $0x129] sm:$0xff] }
 0x170   : > { %v4410_v26 = vpop.permute.xlu1 %4409  ;;  %v1623_v40 = vpack.c.bf16 %v1455_v6, %v1454_v5  ;;  %1940 = vmatprep.mubr.bf16.mxu0 %v1624_v7  ;;  %2528 = vrot.lane.b32.xlu1 %v2439_v9, %s4824_s15  ;;  %v2440_v6 = vld [vmem:[%s4936_s23 + $0xd0] sm:$0xff] }
 0x171   : > { %v4412_v43 = vunpack.i.h.bf16 %v4410_v26  ;;  %v4411_v10 = vunpack.i.l.bf16 %v4410_v26  ;;  %v1489_v63 = vsel %vm1369_vm2, %v461_v32, %v4407_v29  ;;  %v1488_v1 = vsel %vm1369_vm2, %v460_v34, %v4406_v18  ;;  %v4725_v26 = vld [vmem:[#allocation2 + $0x108] sm:$0xff]  ;;  %2530 = vrot.lane.b32.xlu0 %v2440_v6, %s4824_s15  ;;  %v2442_v34 = vld [vmem:[%s4936_s23 + $0xe0] sm:$0xff] }
 0x172   : > { %1941 = vmatmul.mubr.bf16.gmra.mrb[36].mxu0 %v1623_v40  ;;  %3859 = vmatmul.mubr.msk.bf16.gmra.mrb[36].mxu1 %vm1369_vm2, %v1631_v46  ;;  %v4415_v23 = vpop.permute.xlu0 %4414  ;;  %v1392_v15 = vsel %vm1369_vm2, %v4725_v26, %v4021_v35  ;;  %v4726_v40 = vld [vmem:[#allocation2 + $0x110] sm:$0xff] }
 0x173   : > { %v1520_v0 = vsel %vm1402_vm3, %v1488_v1, %v4411_v10  ;;  %v1521_v8 = vsel %vm1402_vm3, %v1489_v63, %v4412_v43  ;;  %3862 = vmatprep.mubr.msk.bf16.mxu1 %vm1369_vm2, %v1634_v45  ;;  %v4417_v60 = vunpack.i.h.bf16 %v4415_v23  ;;  %v4416_v49 = vunpack.i.l.bf16 %v4415_v23  ;;  %v2444_v23 = vld [vmem:[%s4936_s23 + $0xf0] sm:$0xff] }
 0x174   : > { %v4420_v13 = vpop.permute.xlu1 %4419  ;;  %v1393_v46 = vsel %vm1369_vm2, %v4726_v40, %v4022_v56  ;;  %2532 = vrot.lane.b32.xlu1 %v2441_v39, %s4824_s15  ;;  %v1425_v17 = vsel %vm1402_vm3, %v1392_v15, %v4101_v61 }
 0x175   : > { %v4422_v55 = vunpack.i.h.bf16 %v4420_v13  ;;  %v4421_v38 = vunpack.i.l.bf16 %v4420_v13  ;;  %v1552_v44 = vsel %vm1435_vm4, %v1520_v0, %v4416_v49  ;;  %v1553_v27 = vsel %vm1435_vm4, %v1521_v8, %v4417_v60  ;;  %2534 = vrot.lane.b32.xlu0 %v2442_v34, %s4824_s15  ;;  %v2445_v0 = vld [vmem:[%s4936_s23 + $0xf8] sm:$0xff] }
 0x176   : > { %v4425_v47 = vpop.permute.xlu0 %4424  ;;  %v1627_v36 = vpack.c.bf16 %v1553_v27, %v1552_v44  ;;  %v1426_v57 = vsel %vm1402_vm3, %v1393_v46, %v4102_v20 }
 0x177   : > { %v1456_v4 = vsel %vm1435_vm4, %v1423_v42, %v4421_v38  ;;  %v1457_v14 = vsel %vm1435_vm4, %v1424_v16, %v4422_v55  ;;  %v4427_v30 = vunpack.i.h.bf16 %v4425_v47  ;;  %v4426_v5 = vunpack.i.l.bf16 %v4425_v47 }
 0x178   : > { %v4430_v48 = vpop.permute.xlu1 %4429  ;;  %v1626_v2 = vpack.c.bf16 %v1457_v14, %v1456_v4  ;;  %1948 = vmatprep.mubr.bf16.mxu0 %v1627_v36  ;;  %v1643_v55 = vpack.c.bf16 %v600_v21, %v599_v11  ;;  %2536 = vrot.lane.b32.xlu1 %v2443_v31, %s4824_s15  ;;  %v1566_v21 = vld [vmem:[%s4929_s20 + $0x10] sm:$0xff] }
 0x179   : > { %v4432_v37 = vunpack.i.h.bf16 %v4430_v48  ;;  %v4431_v62 = vunpack.i.l.bf16 %v4430_v48  ;;  %v1491_v50 = vsel %vm1369_vm2, %v463_v28, %v4427_v30  ;;  %v1490_v43 = vsel %vm1369_vm2, %v462_v12, %v4426_v5  ;;  %2538 = vrot.lane.b32.xlu0 %v2444_v23, %s4824_s15 }
 0x17a   : > { %1949 = vmatmul.mubr.bf16.gmra.mrb[40].mxu0 %v1626_v2  ;;  %3863 = vmatmul.mubr.msk.bf16.gmra.mrb[40].mxu1 %vm1369_vm2, %v1637_v51  ;;  %v4435_v7 = vpop.permute.xlu0 %4434 }
 0x17b   : > { %v1522_v45 = vsel %vm1402_vm3, %v1490_v43, %v4431_v62  ;;  %v1523_v19 = vsel %vm1402_vm3, %v1491_v50, %v4432_v37  ;;  %3866 = vmatprep.mubr.msk.bf16.mxu1 %vm1369_vm2, %v1640_v3  ;;  %v4437_v29 = vunpack.i.h.bf16 %v4435_v7  ;;  %v4436_v18 = vunpack.i.l.bf16 %v4435_v7 }
 0x17c   : > { %v4440_v10 = vpop.permute.xlu1 %4439  ;;  %2540 = vrot.lane.b32.xlu1 %v2445_v0, %s4824_s15 }
 0x17d   : > { %v4442_v32 = vunpack.i.h.bf16 %v4440_v10  ;;  %v4441_v53 = vunpack.i.l.bf16 %v4440_v10  ;;  %v1554_v1 = vsel %vm1435_vm4, %v1522_v45, %v4436_v18  ;;  %v1555_v13 = vsel %vm1435_vm4, %v1523_v19, %v4437_v29 }
 0x17e   : > { %v1630_v38 = vpack.c.bf16 %v1555_v13, %v1554_v1 }
 0x17f   : > { %v1458_v52 = vsel %vm1435_vm4, %v1425_v17, %v4441_v53  ;;  %v1459_v63 = vsel %vm1435_vm4, %v1426_v57, %v4442_v32 }
 0x180   : > { %v1629_v59 = vpack.c.bf16 %v1459_v63, %v1458_v52  ;;  %1956 = vmatprep.mubr.bf16.mxu0 %v1630_v38  ;;  %v1564_v52 = vld [vmem:[%s4929_s20] sm:$0xff] }
 0x182   : > { %1957 = vmatmul.mubr.bf16.gmra.mrb[44].mxu0 %v1629_v59  ;;  %3867 = vmatmul.mubr.msk.bf16.gmra.mrb[44].mxu1 %vm1369_vm2, %v1643_v55  ;;  %v1567_v55 = vld [vmem:[%s4929_s20 + $0x18] sm:$0xff] }
 0x1e2   : > { %v3720_v8 = vpop.f32.mrb[0].mxu0 }
 0x1e3   : > { %v3721_v54 = vpop.f32.mrb[1].mxu0 }
 0x1e4   : > { %v3722_v25 = vadd.f32 %v3721_v54, %v3720_v8  ;;  %v3723_v60 = vpop.f32.mrb[2].mxu0 }
 0x1e5   : > { %v3724_v49 = vpop.f32.mrb[3].mxu0 }
 0x1e6   : > { %v3725_v42 = vadd.f32 %v3724_v49, %v3723_v60 }
 0x1e7   : > { %v3792_v16 = vpop.f32.mrb[0].mxu1 }
 0x1e8   : > { %v3793_v33 = vpop.f32.mrb[1].mxu1 }
 0x1e9   : > { %v5889_v24 = vadd.f32 %v3793_v33, %v3792_v16  ;;  %v3795_v58 = vpop.f32.mrb[2].mxu1  ;;  %v1565_v16 = vld [vmem:[%s4929_s20 + $0x8] sm:$0xff]  ;;  %v1570_v33 = vld [vmem:[%s4929_s20 + $0x30] sm:$0xff] }
 0x1ea   : > { %v3796_v22 = vpop.f32.mrb[3].mxu1 }
 0x1eb   : > { %v5891_v56 = vadd.f32 %v3796_v22, %v3795_v58 }
 0x1f0   : > { %v3726_v35 = vpop.f32.mrb[4].mxu0 }
 0x1f1   : > { %v3727_v4 = vpop.f32.mrb[5].mxu0 }
 0x1f2   : > { %v3728_v14 = vadd.f32 %v3727_v4, %v3726_v35  ;;  %v3729_v48 = vpop.f32.mrb[6].mxu0 }
 0x1f3   : > { %v3730_v44 = vpop.f32.mrb[7].mxu0 }
 0x1f4   : > { %v3731_v27 = vadd.f32 %v3730_v44, %v3729_v48  ;;  %v1568_v48 = vld [vmem:[%s4929_s20 + $0x20] sm:$0xff] }
 0x1f5   : > { %v3798_v2 = vpop.f32.mrb[4].mxu1 }
 0x1f6   : > { %v3799_v51 = vpop.f32.mrb[5].mxu1 }
 0x1f7   : > { %v5893_v9 = vadd.f32 %v3799_v51, %v3798_v2  ;;  %v3801_v37 = vpop.f32.mrb[6].mxu1 }
 0x1f8   : > { %v3802_v62 = vpop.f32.mrb[7].mxu1 }
 0x1f9   : > { %v5895_v12 = vadd.f32 %v3802_v62, %v3801_v37  ;;  %v1571_v37 = vld [vmem:[%s4929_s20 + $0x38] sm:$0xff] }
 0x1ff   : > { %v3732_v28 = vpop.f32.mrb[8].mxu0 }
 0x200   : > { %v3733_v47 = vpop.f32.mrb[9].mxu0 }
 0x201   : > { %v3734_v36 = vadd.f32 %v3733_v47, %v3732_v28  ;;  %v3735_v3 = vpop.f32.mrb[10].mxu0 }
 0x202   : > { %v3736_v41 = vpop.f32.mrb[11].mxu0 }
 0x203   : > { %v3737_v20 = vadd.f32 %v3736_v41, %v3735_v3 }
 0x205   : > { %v3804_v61 = vpop.f32.mrb[8].mxu1 }
 0x206   : > { %v3805_v30 = vpop.f32.mrb[9].mxu1 }
 0x207   : > { %v5897_v5 = vadd.f32 %v3805_v30, %v3804_v61  ;;  %v3807_v6 = vpop.f32.mrb[10].mxu1 }
 0x208   : > { %v3808_v26 = vpop.f32.mrb[11].mxu1 }
 0x209   : > { %v5899_v15 = vadd.f32 %v3808_v26, %v3807_v6 }
 0x20f   : > { %v3738_v39 = vpop.f32.mrb[12].mxu0 }
 0x210   : > { %v3739_v40 = vpop.f32.mrb[13].mxu0 }
 0x211   : > { %v3740_v46 = vadd.f32 %v3739_v40, %v3738_v39  ;;  %v3741_v50 = vpop.f32.mrb[14].mxu0 }
 0x212   : > { %v3742_v43 = vpop.f32.mrb[15].mxu0 }
 0x213   : > { %v3743_v10 = vadd.f32 %v3742_v43, %v3741_v50 }
 0x215   : > { %v3810_v34 = vpop.f32.mrb[12].mxu1 }
 0x216   : > { %v3811_v32 = vpop.f32.mrb[13].mxu1 }
 0x217   : > { %v5901_v53 = vadd.f32 %v3811_v32, %v3810_v34  ;;  %v3813_v7 = vpop.f32.mrb[14].mxu1 }
 0x218   : > { %v3814_v45 = vpop.f32.mrb[15].mxu1 }
 0x219   : > { %v5903_v19 = vadd.f32 %v3814_v45, %v3813_v7  ;;  %v1574_v45 = vld [vmem:[%s4929_s20 + $0x50] sm:$0xff] }
 0x21d   : > { %v3744_v11 = vpop.f32.mrb[16].mxu0  ;;  %v3840_v29 = vpop.f32.mrb[16].mxu1 }
 0x21e   : > { %v2040_v18 = vadd.f32 %v3840_v29, %v3728_v14  ;;  %v3745_v17 = vpop.f32.mrb[17].mxu0  ;;  %v2031_v57 = vpop.f32.mrb[17].mxu1 }
 0x21f   : > { %v3746_v31 = vadd.f32 %v3745_v17, %v3744_v11  ;;  %v2032_v63 = vadd.f32 %v3722_v25, %v2031_v57  ;;  %v3747_v1 = vpop.f32.mrb[18].mxu0  ;;  %v3841_v13 = vpop.f32.mrb[18].mxu1 }
 0x220   : > { %v5907_v59 = vadd.f32 %v2040_v18, %v1566_v21  ;;  %v2043_v38 = vadd.f32 %v3841_v13, %v3731_v27  ;;  %v3748_v23 = vpop.f32.mrb[19].mxu0  ;;  %v2034_v0 = vpop.f32.mrb[19].mxu1 }
 0x221   : > { %v3749_v8 = vadd.f32 %v3748_v23, %v3747_v1  ;;  %v2035_v54 = vadd.f32 %v3725_v42, %v2034_v0  ;;  %v5911_v60 = vadd.f32 %v2032_v63, %v1564_v52  ;;  %v1572_v1 = vld [vmem:[%s4929_s20 + $0x40] sm:$0xff] }
 0x222   : > { %4461 = vtanh.f32 %v5907_v59  ;;  %v5913_v49 = vadd.f32 %v2043_v38, %v1567_v55 }
 0x223   : > { %4463 = vtanh.f32 %v5911_v60  ;;  %v5919_v14 = vadd.f32 %v2035_v54, %v1565_v16 }
 0x224   : > { %4465 = vtanh.f32 %v5913_v49 }
 0x225   : > { %v3750_v25 = vpop.f32.mrb[20].mxu0  ;;  %v3844_v58 = vpop.f32.mrb[20].mxu1 }
 0x226   : > { %v2056_v22 = vadd.f32 %v3844_v58, %v3740_v46  ;;  %v3751_v35 = vpop.f32.mrb[21].mxu0  ;;  %v2047_v4 = vpop.f32.mrb[21].mxu1  ;;  %v1575_v58 = vld [vmem:[%s4929_s20 + $0x58] sm:$0xff] }
 0x227   : > { %v3752_v42 = vadd.f32 %v3751_v35, %v3750_v25  ;;  %v2048_v44 = vadd.f32 %v3734_v36, %v2047_v4  ;;  %v3753_v27 = vpop.f32.mrb[22].mxu0  ;;  %v3845_v2 = vpop.f32.mrb[22].mxu1  ;;  %v1569_v36 = vld [vmem:[%s4929_s20 + $0x28] sm:$0xff] }
 0x228   : > { %v5922_v51 = vadd.f32 %v2056_v22, %v1570_v33  ;;  %v2059_v62 = vadd.f32 %v3845_v2, %v3743_v10  ;;  %v3754_v28 = vpop.f32.mrb[23].mxu0  ;;  %v2050_v47 = vpop.f32.mrb[23].mxu1  ;;  %v1573_v2 = vld [vmem:[%s4929_s20 + $0x48] sm:$0xff] }
 0x229   : > { %v3755_v3 = vadd.f32 %v3754_v28, %v3753_v27  ;;  %v2051_v41 = vadd.f32 %v3737_v20, %v2050_v47  ;;  %v5926_v61 = vadd.f32 %v2048_v44, %v1568_v48  ;;  %v5958_v28 = vpop.permute.xlu1 %2480 }
 0x22a   : > { %4467 = vtanh.f32 %v5922_v51  ;;  %v5929_v30 = vadd.f32 %v2059_v62, %v1571_v37  ;;  %v5956_v37 = vpop.permute.xlu0 %2478 }
 0x22b   : > { %4469 = vtanh.f32 %v5919_v14  ;;  %v5935_v7 = vadd.f32 %v2051_v41, %v1569_v36 }
 0x22c   : > { %v4462_v6 = vpop.eup %4461  ;;  %4471 = vtanh.f32 %v5926_v61 }
 0x22d   : > { %v3756_v26 = vpop.f32.mrb[24].mxu0  ;;  %v3848_v39 = vpop.f32.mrb[24].mxu1  ;;  %2642 = vrot.lane.b32.xlu0 %v4462_v6, %s4824_s15  ;;  %4473 = vtanh.f32 %v5929_v30 }
 0x22e   : > { %v2072_v40 = vadd.f32 %v3848_v39, %v3752_v42  ;;  %v3757_v46 = vpop.f32.mrb[25].mxu0  ;;  %v2063_v20 = vpop.f32.mrb[25].mxu1  ;;  %4475 = vtanh.f32 %v5935_v7 }
 0x22f   : > { %v3758_v50 = vadd.f32 %v3757_v46, %v3756_v26  ;;  %v2064_v43 = vadd.f32 %v3746_v31, %v2063_v20  ;;  %v3759_v10 = vpop.f32.mrb[26].mxu0  ;;  %v3849_v34 = vpop.f32.mrb[26].mxu1  ;;  %v1576_v20 = vld [vmem:[%s4929_s20 + $0x60] sm:$0xff] }
 0x230   : > { %v4464_v32 = vpop.eup %4463  ;;  %v2075_v11 = vadd.f32 %v3849_v34, %v3755_v3  ;;  %v3760_v21 = vpop.f32.mrb[27].mxu0  ;;  %v5940_v52 = vadd.f32 %v2072_v40, %v1574_v45 }
 0x231   : > { %v2066_v29 = vpop.f32.mrb[27].mxu1  ;;  %v4466_v18 = vpop.eup %4465  ;;  %v3761_v17 = vadd.f32 %v3760_v21, %v3759_v10  ;;  %2638 = vrot.lane.b32.xlu0 %v4464_v32, %s4824_s15  ;;  %v5947_v33 = vadd.f32 %v2064_v43, %v1572_v1  ;;  %v1578_v21 = vld [vmem:[%s4929_s20 + $0x70] sm:$0xff] }
 0x232   : > { %2644 = vrot.lane.b32.xlu1 %v4466_v18, %s4824_s15  ;;  %v2067_v57 = vadd.f32 %v3749_v8, %v2066_v29  ;;  %4477 = vtanh.f32 %v5940_v52  ;;  %v5952_v27 = vadd.f32 %v2075_v11, %v1575_v58  ;;  %v5970_v29 = vpop.permute.xlu0 %2482  ;;  %v5972_v18 = vpop.permute.xlu1 %2484 }
 0x233   : > { %4479 = vtanh.f32 %v5947_v33 }
 0x234   : > { %v4468_v31 = vpop.eup %4467  ;;  %4481 = vtanh.f32 %v5952_v27  ;;  %v5961_v26 = vadd.f32 %v2067_v57, %v1573_v2 }
 0x235   : > { %v4470_v63 = vpop.eup %4469  ;;  %v3762_v13 = vpop.f32.mrb[28].mxu0  ;;  %2650 = vrot.lane.b32.xlu0 %v4468_v31, %s4824_s15 }
 0x236   : > { %v3852_v55 = vpop.f32.mrb[28].mxu1  ;;  %2640 = vrot.lane.b32.xlu1 %v4470_v63, %s4824_s15  ;;  %v3763_v38 = vpop.f32.mrb[29].mxu0  ;;  %4483 = vtanh.f32 %v5961_v26 }
 0x237   : > { %v2079_v23 = vpop.f32.mrb[29].mxu1  ;;  %v3764_v0 = vadd.f32 %v3763_v38, %v3762_v13  ;;  %v3765_v54 = vpop.f32.mrb[30].mxu0 }
 0x238   : > { %v2080_v8 = vadd.f32 %v3758_v50, %v2079_v23  ;;  %v3853_v16 = vpop.f32.mrb[30].mxu1  ;;  %v4472_v25 = vpop.eup %4471 }
 0x239   : > { %v3766_v22 = vpop.f32.mrb[31].mxu0  ;;  %v2082_v35 = vpop.f32.mrb[31].mxu1  ;;  %v2088_v42 = vadd.f32 %v3852_v55, %v3764_v0  ;;  %2646 = vrot.lane.b32.xlu0 %v4472_v25, %s4824_s15 }
 0x23a   : > { %v4474_v4 = vpop.eup %4473  ;;  %v3767_v48 = vadd.f32 %v3766_v22, %v3765_v54  ;;  %v2083_v44 = vadd.f32 %v3761_v17, %v2082_v35  ;;  %v5967_v45 = vadd.f32 %v2080_v8, %v1576_v20  ;;  %v1577_v17 = vld [vmem:[%s4929_s20 + $0x68] sm:$0xff]  ;;  %v1579_v8 = vld [vmem:[%s4929_s20 + $0x78] sm:$0xff]  ;;  %v1580_v22 = vld [vmem:[%s4929_s20 + $0x80] sm:$0xff] }
 0x23b   : > { %2652 = vrot.lane.b32.xlu1 %v4474_v4, %s4824_s15  ;;  %v4476_v41 = vpop.eup %4475  ;;  %v5977_v55 = vadd.f32 %v2088_v42, %v1578_v21 }
 0x23c   : > { %v2091_v62 = vadd.f32 %v3853_v16, %v3767_v48  ;;  %v4478_v10 = vpop.eup %4477  ;;  %4485 = vtanh.f32 %v5967_v45  ;;  %v5984_v54 = vadd.f32 %v2083_v44, %v1577_v17  ;;  %v1581_v48 = vld [vmem:[%s4929_s20 + $0x88] sm:$0xff] }
 0x23d   : > { %v3768_v47 = vpop.f32.mrb[32].mxu0  ;;  %v3856_v3 = vpop.f32.mrb[32].mxu1  ;;  %2658 = vrot.lane.b32.xlu0 %v4478_v10, %s4824_s15  ;;  %4487 = vtanh.f32 %v5977_v55 }
 0x23e   : > { %v3769_v6 = vpop.f32.mrb[33].mxu0  ;;  %v2095_v36 = vpop.f32.mrb[33].mxu1  ;;  %v5989_v42 = vadd.f32 %v2091_v62, %v1579_v8  ;;  %4489 = vtanh.f32 %v5984_v54 }
 0x23f   : > { %2648 = vrot.lane.b32.xlu1 %v4476_v41, %s4824_s15  ;;  %v3770_v39 = vadd.f32 %v3769_v6, %v3768_v47  ;;  %v3771_v40 = vpop.f32.mrb[34].mxu0  ;;  %v3857_v46 = vpop.f32.mrb[34].mxu1 }
 0x240   : > { %v3772_v50 = vpop.f32.mrb[35].mxu0  ;;  %v2098_v43 = vpop.f32.mrb[35].mxu1  ;;  %4491 = vtanh.f32 %v5989_v42 }
 0x241   : > { %v3773_v34 = vadd.f32 %v3772_v50, %v3771_v40  ;;  %v2096_v32 = vadd.f32 %v3770_v39, %v2095_v36  ;;  %v4480_v63 = vpop.eup %4479  ;;  %v5993_v47 = vpop.permute.xlu0 %2486 }
 0x242   : > { %2654 = vrot.lane.b32.xlu0 %v4480_v63, %s4824_s15  ;;  %v4482_v58 = vpop.eup %4481  ;;  %v5997_v41 = vpop.permute.xlu1 %2488  ;;  %v1583_v63 = vld [vmem:[%s4929_s20 + $0x98] sm:$0xff] }
 0x243   : > { %v2099_v11 = vadd.f32 %v3773_v34, %v2098_v43  ;;  %2660 = vrot.lane.b32.xlu1 %v4482_v58, %s4824_s15  ;;  %v5995_v44 = vadd.f32 %v2096_v32, %v1580_v22  ;;  %v4484_v6 = vpop.eup %4483  ;;  %v1590_v58 = vld [vmem:[%s4929_s20 + $0xd0] sm:$0xff] }
 0x245   : > { %v3774_v57 = vpop.f32.mrb[36].mxu0  ;;  %v5975_v31 = vpop.f32.mrb[36].mxu1  ;;  %v5999_v39 = vadd.f32 %v2099_v11, %v1581_v48  ;;  %4493 = vtanh.f32 %v5995_v44 }
 0x246   : > { %v3775_v1 = vpop.f32.mrb[37].mxu0  ;;  %v2111_v13 = vpop.f32.mrb[37].mxu1 }
 0x247   : > { %v3776_v38 = vadd.f32 %v3775_v1, %v3774_v57  ;;  %v3777_v23 = vpop.f32.mrb[38].mxu0  ;;  %v5981_v0 = vpop.f32.mrb[38].mxu1  ;;  %2656 = vrot.lane.b32.xlu1 %v4484_v6, %s4824_s15  ;;  %4495 = vtanh.f32 %v5999_v39 }
 0x248   : > { %v3778_v16 = vpop.f32.mrb[39].mxu0  ;;  %v2114_v25 = vpop.f32.mrb[39].mxu1 }
 0x249   : > { %v2104_v35 = vadd.f32 %v3856_v3, %v3776_v38  ;;  %v3779_v4 = vadd.f32 %v3778_v16, %v3777_v23  ;;  %v4486_v17 = vpop.eup %4485  ;;  %v6015_v38 = vpop.permute.xlu1 %2492 }
 0x24a   : > { %2662 = vrot.lane.b32.xlu0 %v4486_v17, %s4824_s15  ;;  %v4488_v8 = vpop.eup %4487 }
 0x24b   : > { %v2107_v2 = vadd.f32 %v3857_v46, %v3779_v4  ;;  %v1582_v46 = vld [vmem:[%s4929_s20 + $0x90] sm:$0xff]  ;;  %v4490_v4 = vpop.eup %4489 }
 0x24c   : > { %v6009_v57 = vadd.f32 %v2104_v35, %v1582_v46  ;;  %2664 = vrot.lane.b32.xlu1 %v4490_v4, %s4824_s15  ;;  %v4492_v46 = vpop.eup %4491 }
 0x24d   : > { %v3780_v3 = vpop.f32.mrb[40].mxu0  ;;  %v3864_v36 = vpop.f32.mrb[40].mxu1  ;;  %v6018_v16 = vadd.f32 %v2107_v2, %v1583_v63 }
 0x24e   : > { %v2136_v62 = vadd.f32 %v3864_v36, %v5893_v9  ;;  %v3781_v40 = vpop.f32.mrb[41].mxu0  ;;  %v2127_v20 = vpop.f32.mrb[41].mxu1  ;;  %4497 = vtanh.f32 %v6009_v57  ;;  %2666 = vrot.lane.b32.xlu0 %v4488_v8, %s4824_s15  ;;  %v1584_v8 = vld [vmem:[%s4929_s20 + $0xa0] sm:$0xff] }
 0x24f   : > { %v3782_v50 = vadd.f32 %v3781_v40, %v3780_v3  ;;  %v2128_v43 = vadd.f32 %v5889_v24, %v2127_v20  ;;  %v3783_v10 = vpop.f32.mrb[42].mxu0  ;;  %v3865_v34 = vpop.f32.mrb[42].mxu1  ;;  %4499 = vtanh.f32 %v6018_v16 }
 0x250   : > { %v2139_v32 = vadd.f32 %v3865_v34, %v5895_v12  ;;  %v3784_v11 = vpop.f32.mrb[43].mxu0  ;;  %v2130_v21 = vpop.f32.mrb[43].mxu1  ;;  %v6026_v36 = vadd.f32 %v2136_v62, %v1590_v58  ;;  %2668 = vrot.lane.b32.xlu1 %v4492_v46, %s4824_s15  ;;  %v1592_v46 = vld [vmem:[%s4929_s20 + $0xe0] sm:$0xff] }
 0x251   : > { %v2112_v9 = vadd.f32 %v3782_v50, %v2111_v13  ;;  %v3785_v1 = vadd.f32 %v3784_v11, %v3783_v10  ;;  %v6013_v24 = vpop.permute.xlu0 %2490  ;;  %v2131_v12 = vadd.f32 %v5891_v56, %v2130_v21  ;;  %v4494_v34 = vpop.eup %4493  ;;  %v1591_v21 = vld [vmem:[%s4929_s20 + $0xd8] sm:$0xff] }
 0x252   : > { %2670 = vrot.lane.b32.xlu0 %v4494_v34, %s4824_s15  ;;  %v4496_v11 = vpop.eup %4495  ;;  %4501 = vtanh.f32 %v6026_v36 }
 0x253   : > { %v2115_v23 = vadd.f32 %v3785_v1, %v2114_v25  ;;  %v6040_v1 = vpop.permute.xlu1 %2496 }
 0x254   : > { %2672 = vrot.lane.b32.xlu1 %v4496_v11, %s4824_s15 }
 0x255   : > { %v3786_v13 = vpop.f32.mrb[44].mxu0  ;;  %v3868_v22 = vpop.f32.mrb[44].mxu1 }
 0x256   : > { %v3787_v35 = vpop.f32.mrb[45].mxu0  ;;  %v2143_v48 = vpop.f32.mrb[45].mxu1  ;;  %v2152_v25 = vadd.f32 %v3868_v22, %v5901_v53  ;;  %v6051_v22 = vadd.f32 %v2112_v9, %v1584_v8  ;;  %v1594_v9 = vld [vmem:[%s4929_s20 + $0xf0] sm:$0xff] }
 0x257   : > { %v3788_v6 = vadd.f32 %v3787_v35, %v3786_v13  ;;  %v2144_v56 = vadd.f32 %v5897_v5, %v2143_v48  ;;  %v3789_v2 = vpop.f32.mrb[46].mxu0  ;;  %v3869_v3 = vpop.f32.mrb[46].mxu1  ;;  %v1588_v5 = vld [vmem:[%s4929_s20 + $0xc0] sm:$0xff]  ;;  %v6048_v13 = vadd.f32 %v2139_v32, %v1591_v21  ;;  %v1585_v48 = vld [vmem:[%s4929_s20 + $0xa8] sm:$0xff] }
 0x258   : > { %v3790_v40 = vpop.f32.mrb[47].mxu0  ;;  %v2146_v20 = vpop.f32.mrb[47].mxu1  ;;  %v2155_v53 = vadd.f32 %v3869_v3, %v5903_v19  ;;  %v6071_v3 = vadd.f32 %v2115_v23, %v1585_v48 }
 0x259   : > { %v6028_v50 = vpop.permute.xlu0 %2494  ;;  %v2120_v10 = vadd.f32 %v5975_v31, %v3788_v6  ;;  %v3791_v62 = vadd.f32 %v3790_v40, %v3789_v2  ;;  %v2147_v63 = vadd.f32 %v5899_v15, %v2146_v20  ;;  %v6042_v31 = vadd.f32 %v2128_v43, %v1588_v5  ;;  %v4498_v58 = vpop.eup %4497  ;;  %v1589_v43 = vld [vmem:[%s4929_s20 + $0xc8] sm:$0xff]  ;;  %v1595_v5 = vld [vmem:[%s4929_s20 + $0xf8] sm:$0xff] }
 0x25a   : > { %2674 = vrot.lane.b32.xlu0 %v4498_v58, %s4824_s15  ;;  %v4500_v15 = vpop.eup %4499  ;;  %v6062_v32 = vadd.f32 %v2131_v12, %v1589_v43  ;;  %v6069_v2 = vadd.f32 %v2152_v25, %v1594_v9  ;;  %v6083_v23 = vadd.f32 %v2144_v56, %v1592_v46  ;;  %v6090_v21 = vadd.f32 %v2155_v53, %v1595_v5 }
 0x25b   : > { %v2123_v17 = vadd.f32 %v5981_v0, %v3791_v62  ;;  %4503 = vtanh.f32 %v6042_v31  ;;  %v6054_v0 = vpop.permute.xlu1 %2500  ;;  %2676 = vrot.lane.b32.xlu1 %v4500_v15, %s4824_s15  ;;  %v1586_v62 = vld [vmem:[%s4929_s20 + $0xb0] sm:$0xff]  ;;  %v1593_v15 = vld [vmem:[%s4929_s20 + $0xe8] sm:$0xff] }
 0x25c   : > { %4505 = vtanh.f32 %v6048_v13  ;;  %v4502_v35 = vpop.eup %4501  ;;  %v6092_v8 = vadd.f32 %v2120_v10, %v1586_v62  ;;  %v6103_v53 = vadd.f32 %v2147_v63, %v1593_v15  ;;  %v1587_v10 = vld [vmem:[%s4929_s20 + $0xb8] sm:$0xff]  ;;  %v3669_v15 = vmul.f32 -1.442695, %v5913_v49  ;;  %s3703_s20 = sshll.u32 %s4809_s16, 12  ;;  %s6563_s16 = scalar_lea.sflag [#allocation4], %s197_s29 }
 0x25d   : > { %v6044_v19 = vpop.permute.xlu0 %2498  ;;  %4507 = vtanh.f32 %v6051_v22  ;;  %v3673_v49 = vmul.f32 -1.442695, %v5929_v30  ;;  %s6554_s21 = scalar_lea.hbm %s6721_s3, %s3703_s20 }
 0x25e   : > { %2690 = vrot.lane.b32.xlu0 %v4502_v35, %s4824_s15  ;;  %4509 = vtanh.f32 %v6062_v32 }
 0x25f   : > { %v6067_v6 = vpop.permute.xlu1 %2504  ;;  %4511 = vtanh.f32 %v6069_v2 }
 0x260   : > { %4513 = vtanh.f32 %v6071_v3 }
 0x261   : > { %v6059_v4 = vpop.permute.xlu0 %2502  ;;  %4515 = vtanh.f32 %v6083_v23 }
 0x262   : > { %4517 = vtanh.f32 %v6090_v21 }
 0x263   : > { %v6081_v34 = vpop.permute.xlu1 %2508  ;;  %4519 = vtanh.f32 %v6092_v8 }
 0x264   : > { %4521 = vtanh.f32 %v6103_v53 }
 0x265   : > { %v6074_v40 = vpop.permute.xlu0 %2506  ;;  %v4504_v20 = vpop.eup %4503 }
 0x266   : > { %2686 = vrot.lane.b32.xlu0 %v4504_v20, %s4824_s15  ;;  %v4506_v12 = vpop.eup %4505  ;;  %v6110_v20 = vadd.f32 %v2123_v17, %v1587_v10  ;;  %v3666_v17 = vmul.f32 -1.442695, %v5911_v60 }
 0x267   : > { %2692 = vrot.lane.b32.xlu1 %v4506_v12, %s4824_s15  ;;  %v4508_v25 = vpop.eup %4507  ;;  %v6096_v43 = vpop.permute.xlu1 %2512 }
 0x268   : > { %v4510_v58 = vpop.eup %4509  ;;  %4523 = vtanh.f32 %v6110_v20 }
 0x269   : > { %v6087_v11 = vpop.permute.xlu0 %2510  ;;  %v4512_v35 = vpop.eup %4511 }
 0x26a   : > { %2678 = vrot.lane.b32.xlu0 %v4508_v25, %s4824_s15  ;;  %v4514_v9 = vpop.eup %4513  ;;  %v3668_v25 = vmul.f32 -1.442695, %v5907_v59  ;;  %v3667_v59 = vmul.f32 -1.442695, %v5919_v14 }
 0x26b   : > { %2688 = vrot.lane.b32.xlu1 %v4510_v58, %s4824_s15  ;;  %v6108_v48 = vpop.permute.xlu1 %2516  ;;  %v4516_v12 = vpop.eup %4515 }
 0x26c   : > { %v4518_v63 = vpop.eup %4517  ;;  %4525 = vpow2.f32 %v3668_v25  ;;  %v3670_v25 = vmul.f32 -1.442695, %v5926_v61 }
 0x26d   : > { %v6100_v56 = vpop.permute.xlu0 %2514  ;;  %v4520_v5 = vpop.eup %4519  ;;  %4527 = vpow2.f32 %v3666_v17 }
 0x26e   : > { %2698 = vrot.lane.b32.xlu0 %v4512_v35, %s4824_s15  ;;  %v4522_v35 = vpop.eup %4521  ;;  %4529 = vpow2.f32 %v3669_v15  ;;  %v3671_v15 = vmul.f32 -1.442695, %v5935_v7  ;;  %v3674_v7 = vmul.f32 -1.442695, %v5947_v33 }
 0x26f   : > { %2680 = vrot.lane.b32.xlu1 %v4514_v9, %s4824_s15  ;;  %v6118_v62 = vpop.permute.xlu1 %2520  ;;  %v3672_v9 = vmul.f32 -1.442695, %v5922_v51  ;;  %4531 = vpow2.f32 %v3667_v59 }
 0x270   : > { %6782 = vst [vmem:[#allocation7_spill] sm:$0xff] %v6118_v62 }
 0x271   : > { %v6113_v46 = vpop.permute.xlu0 %2518  ;;  %4533 = vpow2.f32 %v3672_v9 }
 0x272   : > { %2694 = vrot.lane.b32.xlu0 %v4516_v12, %s4824_s15  ;;  %v4524_v60 = vpop.eup %4523  ;;  %4535 = vpow2.f32 %v3670_v25 }
 0x273   : > { %2700 = vrot.lane.b32.xlu1 %v4518_v63, %s4824_s15  ;;  %v6128_v10 = vpop.permute.xlu1 %2524  ;;  %4537 = vpow2.f32 %v3673_v49 }
 0x274   : > { %6784 = vst [vmem:[#allocation12_spill] sm:$0xff] %v6128_v10 }
 0x275   : > { %v6122_v58 = vpop.permute.xlu0 %2522 }
 0x276   : > { %6783 = vst [vmem:[#allocation8_spill] sm:$0xff] %v6122_v58  ;;  %2682 = vrot.lane.b32.xlu0 %v4520_v5, %s4824_s15  ;;  %v4526_v63 = vpop.eup %4525 }
 0x277   : > { %2696 = vrot.lane.b32.xlu1 %v4522_v35, %s4824_s15  ;;  %v6136_v14 = vpop.permute.xlu1 %2528  ;;  %v4528_v5 = vpop.eup %4527  ;;  %v2288_v17 = vadd.f32 1.0, %v4526_v63 }
 0x278   : > { %6785 = vst [vmem:[#allocation18_spill] sm:$0xff] %v6136_v14  ;;  %v4530_v35 = vpop.eup %4529  ;;  %v2286_v59 = vadd.f32 1.0, %v4528_v5 }
 0x279   : > { %v6131_v12 = vpop.permute.xlu0 %2526  ;;  %v4532_v61 = vpop.eup %4531  ;;  %4539 = vrcp.f32 %v2288_v17  ;;  %v2289_v58 = vadd.f32 1.0, %v4530_v35 }
 0x27a   : > { %4541 = vpow2.f32 %v3671_v15  ;;  %v2287_v25 = vadd.f32 1.0, %v4532_v61 }
 0x27b   : > { %2684 = vrot.lane.b32.xlu1 %v4524_v60, %s4824_s15  ;;  %v6141_v9 = vpop.permute.xlu1 %2532  ;;  %v3676_v60 = vmul.f32 -1.442695, %v5940_v52  ;;  %v4534_v10 = vpop.eup %4533  ;;  %4543 = vrcp.f32 %v2286_v59  ;;  %v3677_v52 = vmul.f32 -1.442695, %v5952_v27 }
 0x27c   : > { %v2292_v62 = vadd.f32 1.0, %v4534_v10  ;;  %v4536_v49 = vpop.eup %4535 }
 0x27d   : > { %v6138_v51 = vpop.permute.xlu0 %2530  ;;  %4545 = vpow2.f32 %v3676_v60  ;;  %v4538_v5 = vpop.eup %4537  ;;  %v2290_v17 = vadd.f32 1.0, %v4536_v49 }
 0x27e   : > { %4547 = vrcp.f32 %v2289_v58  ;;  %v2293_v35 = vadd.f32 1.0, %v4538_v5  ;;  %v3675_v58 = vmul.f32 -1.442695, %v5961_v26  ;;  %v3678_v26 = vmul.f32 -1.442695, %v5967_v45 }
 0x27f   : > { %v6147_v63 = vpop.permute.xlu1 %2536  ;;  %4549 = vrcp.f32 %v2287_v25 }
 0x280   : > { %6787 = vst [vmem:[#allocation10_spill] sm:$0xff] %v6147_v63  ;;  %4551 = vrcp.f32 %v2292_v62 }
 0x281   : > { %v6144_v30 = vpop.permute.xlu0 %2534  ;;  %4553 = vpow2.f32 %v3674_v7 }
 0x282   : > { %6786 = vst [vmem:[#allocation9_spill] sm:$0xff] %v6144_v30  ;;  %4555 = vpow2.f32 %v3677_v52 }
 0x283   : > { %v6152_v15 = vpop.eup %4539  ;;  %v6155_v33 = vpop.permute.xlu1 %2540  ;;  %4557 = vrcp.f32 %v2290_v17 }
 0x284   : > { %v4542_v59 = vpop.eup %4541  ;;  %6788 = vst [vmem:[#allocation11_spill] sm:$0xff] %v6155_v33  ;;  %4559 = vrcp.f32 %v2293_v35 }
 0x285   : > { %v6149_v14 = vpop.permute.xlu0 %2538  ;;  %v6158_v60 = vpop.eup %4543  ;;  %v2291_v62 = vadd.f32 1.0, %v4542_v59  ;;  %4561 = vpow2.f32 %v3675_v58  ;;  %v3680_v58 = vmul.f32 -1.442695, %v5977_v55  ;;  %v3681_v55 = vmul.f32 -1.442695, %v5989_v42 }
 0x287   : > { %v4546_v27 = vpop.eup %4545  ;;  %4563 = vrcp.f32 %v2291_v62 }
 0x288   : > { %v6161_v49 = vpop.eup %4547  ;;  %v2296_v17 = vadd.f32 1.0, %v4546_v27  ;;  %4565 = vpow2.f32 %v3678_v26  ;;  %v3679_v27 = vmul.f32 -1.442695, %v5984_v54 }
 0x28a   : > { %4567 = vrcp.f32 %v2296_v17 }
 0x28b   : > { %4569 = vpow2.f32 %v3680_v58 }
 0x28c   : > { %4571 = vpow2.f32 %v3679_v27 }
 0x29f   : > { %v2643_v10 = vpop.permute.xlu0 %2642 }
 0x2a0   : > { %v2736_v61 = vmul.f32 %v6152_v15, %v2643_v10  ;;  %v6166_v10 = vpop.eup %4549 }
 0x2a1   : > { %v6169_v35 = vpop.eup %4551 }
 0x2a2   : > { %2802 = vrot.lane.b32.xlu0 %v2736_v61, %s4824_s15  ;;  %v4554_v61 = vpop.eup %4553 }
 0x2a3   : > { %v2639_v25 = vpop.permute.xlu0 %2638  ;;  %v2294_v62 = vadd.f32 1.0, %v4554_v61 }
 0x2a4   : > { %v2645_v7 = vpop.permute.xlu1 %2644  ;;  %v2734_v5 = vmul.f32 %v6158_v60, %v2639_v25 }
 0x2a5   : > { %v2737_v52 = vmul.f32 %v6161_v49, %v2645_v7  ;;  %v4556_v7 = vpop.eup %4555  ;;  %4573 = vrcp.f32 %v2294_v62 }
 0x2a6   : > { %2798 = vrot.lane.b32.xlu0 %v2734_v5, %s4824_s15  ;;  %v6177_v5 = vpop.eup %4557  ;;  %4575 = vpow2.f32 %v3681_v55 }
 0x2a7   : > { %2804 = vrot.lane.b32.xlu1 %v2737_v52, %s4824_s15  ;;  %v2651_v59 = vpop.permute.xlu0 %2650  ;;  %v6180_v33 = vpop.eup %4559 }
 0x2a8   : > { %v2641_v63 = vpop.permute.xlu1 %2640  ;;  %v2740_v25 = vmul.f32 %v6169_v35, %v2651_v59  ;;  %v2297_v59 = vadd.f32 1.0, %v4556_v7  ;;  %v4562_v54 = vpop.eup %4561 }
 0x2a9   : > { %v2735_v45 = vmul.f32 %v6166_v10, %v2641_v63  ;;  %v6188_v61 = vpop.eup %4563  ;;  %v2295_v42 = vadd.f32 1.0, %v4562_v54 }
 0x2aa   : > { %2810 = vrot.lane.b32.xlu0 %v2740_v25, %s4824_s15  ;;  %v3682_v25 = vmul.f32 -1.442695, %v5995_v44  ;;  %4577 = vrcp.f32 %v2297_v59  ;;  %v3684_v44 = vmul.f32 -1.442695, %v6009_v57  ;;  %v3685_v59 = vmul.f32 -1.442695, %v6018_v16 }
 0x2ab   : > { %2800 = vrot.lane.b32.xlu1 %v2735_v45, %s4824_s15  ;;  %v2647_v52 = vpop.permute.xlu0 %2646  ;;  %v3683_v45 = vmul.f32 -1.442695, %v5999_v39 }
 0x2ac   : > { %v2738_v63 = vmul.f32 %v6177_v5, %v2647_v52  ;;  %4579 = vpow2.f32 %v3682_v25  ;;  %v4566_v52 = vpop.eup %4565 }
 0x2ad   : > { %v2653_v26 = vpop.permute.xlu1 %2652  ;;  %v6192_v27 = vpop.eup %4567  ;;  %4581 = vrcp.f32 %v2295_v42 }
 0x2ae   : > { %v2741_v17 = vmul.f32 %v6180_v33, %v2653_v26  ;;  %2806 = vrot.lane.b32.xlu0 %v2738_v63, %s4824_s15  ;;  %v4570_v55 = vpop.eup %4569  ;;  %v2298_v63 = vadd.f32 1.0, %v4566_v52  ;;  %4583 = vpow2.f32 %v3683_v45 }
 0x2af   : > { %v2659_v26 = vpop.permute.xlu0 %2658  ;;  %v4572_v39 = vpop.eup %4571  ;;  %4585 = vpow2.f32 %v3684_v44  ;;  %v2300_v54 = vadd.f32 1.0, %v4570_v55 }
 0x2b0   : > { %2812 = vrot.lane.b32.xlu1 %v2741_v17, %s4824_s15  ;;  %v2744_v62 = vmul.f32 %v6192_v27, %v2659_v26  ;;  %v6199_v17 = vpop.eup %4573  ;;  %4587 = vrcp.f32 %v2298_v63  ;;  %v2299_v52 = vadd.f32 1.0, %v4572_v39  ;;  %v3690_v63 = vmul.f32 -1.442695, %v6042_v31 }
 0x2b1   : > { %v2649_v58 = vpop.permute.xlu1 %2648  ;;  %v4576_v57 = vpop.eup %4575  ;;  %4589 = vpow2.f32 %v3685_v59  ;;  %v3686_v59 = vmul.f32 -1.442695, %v6051_v22 }
 0x2b2   : > { %v2739_v7 = vmul.f32 %v6188_v61, %v2649_v58  ;;  %2818 = vrot.lane.b32.xlu0 %v2744_v62, %s4824_s15  ;;  %v3692_v58 = vmul.f32 -1.442695, %v6026_v36  ;;  %4591 = vrcp.f32 %v2300_v54  ;;  %v2301_v26 = vadd.f32 1.0, %v4576_v57 }
 0x2b3   : > { %v3693_v54 = vmul.f32 -1.442695, %v6048_v13 }
 0x2b4   : > { %2808 = vrot.lane.b32.xlu1 %v2739_v7, %s4824_s15  ;;  %v2655_v25 = vpop.permute.xlu0 %2654  ;;  %v6203_v7 = vpop.eup %4577  ;;  %4593 = vpow2.f32 %v3692_v58 }
 0x2b5   : > { %v2742_v42 = vmul.f32 %v6199_v17, %v2655_v25  ;;  %v2661_v16 = vpop.permute.xlu1 %2660  ;;  %4595 = vrcp.f32 %v2299_v52 }
 0x2b6   : > { %v4580_v45 = vpop.eup %4579  ;;  %v2745_v44 = vmul.f32 %v6203_v7, %v2661_v16  ;;  %4597 = vrcp.f32 %v2301_v26 }
 0x2b7   : > { %2814 = vrot.lane.b32.xlu0 %v2742_v42, %s4824_s15  ;;  %v6207_v62 = vpop.eup %4581  ;;  %v2302_v55 = vadd.f32 1.0, %v4580_v45 }
 0x2b8   : > { %2820 = vrot.lane.b32.xlu1 %v2745_v44, %s4824_s15  ;;  %v4584_v36 = vpop.eup %4583 }
 0x2b9   : > { %v2657_v39 = vpop.permute.xlu1 %2656  ;;  %v4586_v42 = vpop.eup %4585  ;;  %4599 = vrcp.f32 %v2302_v55  ;;  %v2303_v57 = vadd.f32 1.0, %v4584_v36  ;;  %v3691_v36 = vmul.f32 -1.442695, %v6062_v32 }
 0x2ba   : > { %v2743_v25 = vmul.f32 %v6207_v62, %v2657_v39  ;;  %v6215_v58 = vpop.eup %4587  ;;  %4601 = vpow2.f32 %v3690_v63  ;;  %v2304_v16 = vadd.f32 1.0, %v4586_v42 }
 0x2bb   : > { %v4590_v45 = vpop.eup %4589  ;;  %4603 = vpow2.f32 %v3686_v59 }
 0x2bc   : > { %2816 = vrot.lane.b32.xlu1 %v2743_v25, %s4824_s15  ;;  %v2663_v52 = vpop.permute.xlu0 %2662  ;;  %4605 = vpow2.f32 %v3693_v54  ;;  %v6218_v22 = vpop.eup %4591  ;;  %v2305_v44 = vadd.f32 1.0, %v4590_v45  ;;  %v3696_v54 = vmul.f32 -1.442695, %v6069_v2 }
 0x2bd   : > { %v2746_v31 = vmul.f32 %v6215_v58, %v2663_v52  ;;  %4607 = vrcp.f32 %v2303_v57  ;;  %v3687_v52 = vmul.f32 -1.442695, %v6071_v3 }
 0x2be   : > { %v4594_v13 = vpop.eup %4593  ;;  %4609 = vrcp.f32 %v2304_v16  ;;  %v2665_v63 = vpop.permute.xlu1 %2664 }
 0x2bf   : > { %2822 = vrot.lane.b32.xlu0 %v2746_v31, %s4824_s15  ;;  %v6221_v55 = vpop.eup %4595  ;;  %v2312_v25 = vadd.f32 1.0, %v4594_v13  ;;  %4611 = vrcp.f32 %v2305_v44 }
 0x2c0   : > { %v2667_v26 = vpop.permute.xlu0 %2666  ;;  %v2747_v59 = vmul.f32 %v6221_v55, %v2665_v63  ;;  %v6227_v42 = vpop.eup %4597  ;;  %4613 = vpow2.f32 %v3691_v36  ;;  %v3694_v36 = vmul.f32 -1.442695, %v6083_v23 }
 0x2c1   : > { %v2748_v39 = vmul.f32 %v6218_v22, %v2667_v26  ;;  %4615 = vrcp.f32 %v2312_v25 }
 0x2c2   : > { %2824 = vrot.lane.b32.xlu1 %v2747_v59, %s4824_s15  ;;  %v2669_v32 = vpop.permute.xlu1 %2668  ;;  %4617 = vpow2.f32 %v3696_v54 }
 0x2c3   : > { %2826 = vrot.lane.b32.xlu0 %v2748_v39, %s4824_s15  ;;  %v6231_v57 = vpop.eup %4599  ;;  %v2749_v31 = vmul.f32 %v6227_v42, %v2669_v32  ;;  %4619 = vpow2.f32 %v3687_v52  ;;  %v3688_v52 = vmul.f32 -1.442695, %v6092_v8 }
 0x2c4   : > { %v2671_v45 = vpop.permute.xlu0 %2670  ;;  %v4602_v16 = vpop.eup %4601 }
 0x2c5   : > { %v2750_v13 = vmul.f32 %v6231_v57, %v2671_v45  ;;  %v4604_v26 = vpop.eup %4603  ;;  %v2310_v44 = vadd.f32 1.0, %v4602_v16 }
 0x2c6   : > { %v4606_v63 = vpop.eup %4605  ;;  %2828 = vrot.lane.b32.xlu1 %v2749_v31, %s4824_s15  ;;  %v2673_v3 = vpop.permute.xlu1 %2672  ;;  %v2306_v25 = vadd.f32 1.0, %v4604_v26  ;;  %v3697_v31 = vmul.f32 -1.442695, %v6090_v21 }
 0x2c7   : > { %2830 = vrot.lane.b32.xlu0 %v2750_v13, %s4824_s15  ;;  %v6238_v2 = vpop.eup %4607  ;;  %v2313_v32 = vadd.f32 1.0, %v4606_v63  ;;  %4621 = vrcp.f32 %v2310_v44 }
 0x2c8   : > { %v2751_v39 = vmul.f32 %v6238_v2, %v2673_v3  ;;  %v6242_v59 = vpop.eup %4609  ;;  %4623 = vpow2.f32 %v3694_v36 }
 0x2c9   : > { %v6247_v13 = vpop.eup %4611  ;;  %4625 = vrcp.f32 %v2313_v32 }
 0x2ca   : > { %2832 = vrot.lane.b32.xlu1 %v2751_v39, %s4824_s15  ;;  %v4614_v16 = vpop.eup %4613  ;;  %4627 = vrcp.f32 %v2306_v25  ;;  %v3695_v39 = vmul.f32 -1.442695, %v6103_v53 }
 0x2cb   : > { %v6252_v26 = vpop.eup %4615  ;;  %4629 = vpow2.f32 %v3697_v31  ;;  %v2311_v3 = vadd.f32 1.0, %v4614_v16 }
 0x2cc   : > { %v2675_v45 = vpop.permute.xlu0 %2674  ;;  %v4618_v21 = vpop.eup %4617  ;;  %4631 = vpow2.f32 %v3688_v52 }
 0x2cd   : > { %v2752_v54 = vmul.f32 %v6242_v59, %v2675_v45  ;;  %v2677_v23 = vpop.permute.xlu1 %2676  ;;  %v4620_v36 = vpop.eup %4619  ;;  %v2316_v32 = vadd.f32 1.0, %v4618_v21  ;;  %4633 = vrcp.f32 %v2311_v3 }
 0x2ce   : > { %v2753_v63 = vmul.f32 %v6247_v13, %v2677_v23  ;;  %v2307_v45 = vadd.f32 1.0, %v4620_v36  ;;  %4635 = vpow2.f32 %v3695_v39 }
 0x2cf   : > { %2834 = vrot.lane.b32.xlu0 %v2752_v54, %s4824_s15  ;;  %v3689_v54 = vmul.f32 -1.442695, %v6110_v20  ;;  %4637 = vrcp.f32 %v2316_v32 }
 0x2d0   : > { %2836 = vrot.lane.b32.xlu1 %v2753_v63, %s4824_s15  ;;  %v2691_v44 = vpop.permute.xlu0 %2690  ;;  %4639 = vrcp.f32 %v2307_v45 }
 0x2d1   : > { %v2760_v8 = vmul.f32 %v6252_v26, %v2691_v44  ;;  %v6258_v25 = vpop.eup %4621  ;;  %4641 = vpow2.f32 %v3689_v54 }
 0x2d2   : > { %v4624_v23 = vpop.eup %4623 }
 0x2d3   : > { %2850 = vrot.lane.b32.xlu0 %v2760_v8, %s4824_s15  ;;  %v6262_v52 = vpop.eup %4625  ;;  %v2314_v3 = vadd.f32 1.0, %v4624_v23 }
 0x2d4   : > { %v6264_v44 = vpop.eup %4627 }
 0x2d5   : > { %v4630_v21 = vpop.eup %4629  ;;  %4643 = vrcp.f32 %v2314_v3 }
 0x2d6   : > { %v4632_v8 = vpop.eup %4631  ;;  %v2317_v39 = vadd.f32 1.0, %v4630_v21 }
 0x2d7   : > { %v2308_v32 = vadd.f32 1.0, %v4632_v8 }
 0x2d8   : > { %v2687_v31 = vpop.permute.xlu0 %2686  ;;  %4645 = vrcp.f32 %v2317_v39 }
 0x2d9   : > { %v2758_v16 = vmul.f32 %v6258_v25, %v2687_v31  ;;  %v2693_v63 = vpop.permute.xlu1 %2692  ;;  %v6271_v31 = vpop.eup %4633  ;;  %4647 = vrcp.f32 %v2308_v32 }
 0x2da   : > { %v2761_v53 = vmul.f32 %v6262_v52, %v2693_v63  ;;  %v4636_v63 = vpop.eup %4635 }
 0x2db   : > { %2846 = vrot.lane.b32.xlu0 %v2758_v16, %s4824_s15  ;;  %v6274_v23 = vpop.eup %4637  ;;  %v2315_v21 = vadd.f32 1.0, %v4636_v63 }
 0x2dc   : > { %v2679_v20 = vpop.permute.xlu0 %2678  ;;  %2852 = vrot.lane.b32.xlu1 %v2761_v53, %s4824_s15  ;;  %v6277_v53 = vpop.eup %4639 }
 0x2dd   : > { %v2754_v36 = vmul.f32 %v6264_v44, %v2679_v20  ;;  %v2689_v45 = vpop.permute.xlu1 %2688  ;;  %v4642_v3 = vpop.eup %4641  ;;  %4649 = vrcp.f32 %v2315_v21 }
 0x2de   : > { %v2759_v16 = vmul.f32 %v6271_v31, %v2689_v45  ;;  %v2309_v39 = vadd.f32 1.0, %v4642_v3 }
 0x2df   : > { %2838 = vrot.lane.b32.xlu0 %v2754_v36, %s4824_s15  ;;  %v6283_v45 = vpop.eup %4643 }
 0x2e0   : > { %2848 = vrot.lane.b32.xlu1 %v2759_v16, %s4824_s15  ;;  %v2699_v54 = vpop.permute.xlu0 %2698  ;;  %6789 = vst [vmem:[#allocation17_spill] sm:$0xff] %v6283_v45  ;;  %4651 = vrcp.f32 %v2309_v39 }
 0x2e1   : > { %v2681_v20 = vpop.permute.xlu1 %2680  ;;  %v2764_v8 = vmul.f32 %v6274_v23, %v2699_v54 }
 0x2e2   : > { %v2755_v36 = vmul.f32 %v6277_v53, %v2681_v20  ;;  %v6286_v30 = vpop.eup %4645 }
 0x2e3   : > { %2858 = vrot.lane.b32.xlu0 %v2764_v8, %s4824_s15  ;;  %6790 = vst [vmem:[#allocation14_spill] sm:$0xff] %v6286_v30  ;;  %v6289_v54 = vpop.eup %4647 }
 0x2e4   : > { %2840 = vrot.lane.b32.xlu1 %v2755_v36, %s4824_s15  ;;  %v2695_v32 = vpop.permute.xlu0 %2694  ;;  %6791 = vst [vmem:[#allocation20_spill] sm:$0xff] %v6289_v54 }
 0x2e5   : > { %v2762_v16 = vmul.f32 %v6283_v45, %v2695_v32  ;;  %v2701_v63 = vpop.permute.xlu1 %2700 }
 0x2e6   : > { %v2765_v20 = vmul.f32 %v6286_v30, %v2701_v63  ;;  %v2576_v63 = vmul.f32 %v6152_v15, %v5970_v29  ;;  %v2575_v29 = vmul.f32 %v6166_v10, %v5958_v28 }
 0x2e7   : > { %2854 = vrot.lane.b32.xlu0 %v2762_v16, %s4824_s15  ;;  %v6295_v21 = vpop.eup %4649 }
 0x2e8   : > { %v2683_v8 = vpop.permute.xlu0 %2682  ;;  %2860 = vrot.lane.b32.xlu1 %v2765_v20, %s4824_s15  ;;  %6792 = vst [vmem:[#allocation13_spill] sm:$0xff] %v6295_v21 }
 0x2e9   : > { %v2756_v36 = vmul.f32 %v6289_v54, %v2683_v8  ;;  %v2697_v3 = vpop.permute.xlu1 %2696 }
 0x2ea   : > { %v2763_v32 = vmul.f32 %v6295_v21, %v2697_v3  ;;  %v6299_v39 = vpop.eup %4651  ;;  %v2577_v3 = vmul.f32 %v6161_v49, %v5972_v18  ;;  %v2578_v18 = vmul.f32 %v6177_v5, %v5993_v47  ;;  %v2579_v47 = vmul.f32 %v6188_v61, %v5997_v41 }
 0x2eb   : > { %2842 = vrot.lane.b32.xlu0 %v2756_v36, %s4824_s15  ;;  %v2574_v36 = vmul.f32 %v6158_v60, %v5956_v37 }
 0x2ec   : > { %2856 = vrot.lane.b32.xlu1 %v2763_v32, %s4824_s15 }
 0x2ed   : > { %v2685_v16 = vpop.permute.xlu1 %2684 }
 0x2ee   : > { %v2757_v45 = vmul.f32 %v6299_v39, %v2685_v16 }
 0x2f0   : > { %2844 = vrot.lane.b32.xlu1 %v2757_v45, %s4824_s15  ;;  %v2580_v45 = vmul.f32 %v6169_v35, %v6013_v24  ;;  %v2581_v24 = vmul.f32 %v6180_v33, %v6015_v38 }
 0x314   : > { %v2803_v20 = vpop.permute.xlu0 %2802 }
 0x315   : > { %v2896_v8 = vadd.f32 %v2803_v20, %v2576_v63 }
 0x317   : > { %3154 = vrot.lane.b32.xlu0 %v2896_v8, %s4826_s6  ;;  %4653 = vtanh.f32 %v2896_v8 }
 0x318   : > { %v2799_v32 = vpop.permute.xlu0 %2798 }
 0x319   : > { %v2805_v54 = vpop.permute.xlu1 %2804  ;;  %v2894_v21 = vadd.f32 %v2799_v32, %v2574_v36 }
 0x31a   : > { %v2897_v30 = vadd.f32 %v2805_v54, %v2577_v3 }
 0x31b   : > { %3150 = vrot.lane.b32.xlu0 %v2894_v21, %s4826_s6  ;;  %4655 = vtanh.f32 %v2894_v21 }
 0x31c   : > { %3156 = vrot.lane.b32.xlu1 %v2897_v30, %s4826_s6  ;;  %v2811_v37 = vpop.permute.xlu0 %2810  ;;  %4657 = vtanh.f32 %v2897_v30  ;;  %v2584_v30 = vmul.f32 %v6192_v27, %v6044_v19 }
 0x31d   : > { %v2801_v16 = vpop.permute.xlu1 %2800  ;;  %v2900_v63 = vadd.f32 %v2811_v37, %v2580_v45 }
 0x31e   : > { %v2895_v20 = vadd.f32 %v2801_v16, %v2575_v29  ;;  %v2582_v16 = vmul.f32 %v6199_v17, %v6028_v50 }
 0x31f   : > { %3162 = vrot.lane.b32.xlu0 %v2900_v63, %s4826_s6 }
 0x320   : > { %3152 = vrot.lane.b32.xlu1 %v2895_v20, %s4826_s6  ;;  %v2807_v54 = vpop.permute.xlu0 %2806  ;;  %4659 = vtanh.f32 %v2895_v20 }
 0x321   : > { %v2898_v8 = vadd.f32 %v2807_v54, %v2578_v18  ;;  %v4654_v3 = vpop.eup %4653  ;;  %4661 = vtanh.f32 %v2900_v63  ;;  %v2585_v18 = vmul.f32 %v6203_v7, %v6054_v0  ;;  %v2583_v54 = vmul.f32 %v6207_v62, %v6040_v1 }
 0x322   : > { %v2813_v28 = vpop.permute.xlu1 %2812 }
 0x323   : > { %v2901_v36 = vadd.f32 %v2813_v28, %v2581_v24  ;;  %3158 = vrot.lane.b32.xlu0 %v2898_v8, %s4826_s6  ;;  %4663 = vtanh.f32 %v2898_v8 }
 0x324   : > { %v2819_v38 = vpop.permute.xlu0 %2818 }
 0x325   : > { %3164 = vrot.lane.b32.xlu1 %v2901_v36, %s4826_s6  ;;  %v4656_v21 = vpop.eup %4655  ;;  %v2904_v37 = vadd.f32 %v2819_v38, %v2584_v30  ;;  %4665 = vtanh.f32 %v2901_v36  ;;  %v2586_v36 = vmul.f32 %v6215_v58, %v6059_v4  ;;  %v2587_v38 = vmul.f32 %v6221_v55, %v6067_v6 }
 0x326   : > { %v2809_v32 = vpop.permute.xlu1 %2808  ;;  %v4658_v29 = vpop.eup %4657  ;;  %v2588_v4 = vmul.f32 %v6218_v22, %v6074_v40  ;;  %v2589_v6 = vmul.f32 %v6227_v42, %v6081_v34  ;;  %v2590_v40 = vmul.f32 %v6231_v57, %v6087_v11  ;;  %v2591_v34 = vmul.f32 %v6238_v2, %v6096_v43 }
 0x327   : > { %v2899_v45 = vadd.f32 %v2809_v32, %v2579_v47  ;;  %2994 = vrot.lane.b32.xlu0 %v4654_v3, %s4824_s15 }
 0x329   : > { %3160 = vrot.lane.b32.xlu1 %v2899_v45, %s4826_s6  ;;  %v2815_v41 = vpop.permute.xlu0 %2814  ;;  %4667 = vtanh.f32 %v2899_v45 }
 0x32a   : > { %v4660_v20 = vpop.eup %4659  ;;  %v2821_v24 = vpop.permute.xlu1 %2820  ;;  %v2902_v19 = vadd.f32 %v2815_v41, %v2582_v16  ;;  %4669 = vtanh.f32 %v2904_v37 }
 0x32b   : > { %2990 = vrot.lane.b32.xlu0 %v4656_v21, %s4824_s15  ;;  %v2905_v63 = vadd.f32 %v2821_v24, %v2585_v18  ;;  %v4662_v50 = vpop.eup %4661 }
 0x32d   : > { %2996 = vrot.lane.b32.xlu1 %v4658_v29, %s4824_s15  ;;  %v4664_v0 = vpop.eup %4663  ;;  %4671 = vtanh.f32 %v2905_v63 }
 0x32e   : > { %v2817_v28 = vpop.permute.xlu1 %2816  ;;  %4673 = vtanh.f32 %v2902_v19 }
 0x32f   : > { %3170 = vrot.lane.b32.xlu0 %v2904_v37, %s4826_s6  ;;  %v2903_v8 = vadd.f32 %v2817_v28, %v2583_v54  ;;  %v4666_v3 = vpop.eup %4665 }
 0x331   : > { %2992 = vrot.lane.b32.xlu1 %v4660_v20, %s4824_s15  ;;  %v2823_v47 = vpop.permute.xlu0 %2822  ;;  %4675 = vtanh.f32 %v2903_v8 }
 0x332   : > { %v2906_v1 = vadd.f32 %v2823_v47, %v2586_v36 }
 0x333   : > { %3166 = vrot.lane.b32.xlu0 %v2902_v19, %s4826_s6  ;;  %v4668_v32 = vpop.eup %4667 }
 0x334   : > { %v2825_v45 = vpop.permute.xlu1 %2824  ;;  %v4670_v21 = vpop.eup %4669  ;;  %4677 = vtanh.f32 %v2906_v1 }
 0x335   : > { %3172 = vrot.lane.b32.xlu1 %v2905_v63, %s4826_s6  ;;  %v2827_v30 = vpop.permute.xlu0 %2826  ;;  %v2907_v29 = vadd.f32 %v2825_v45, %v2587_v38 }
 0x336   : > { %v2908_v37 = vadd.f32 %v2827_v30, %v2588_v4 }
 0x337   : > { %3002 = vrot.lane.b32.xlu0 %v4662_v50, %s4824_s15  ;;  %v4672_v41 = vpop.eup %4671 }
 0x338   : > { %v2829_v16 = vpop.permute.xlu1 %2828  ;;  %v4674_v20 = vpop.eup %4673  ;;  %4679 = vtanh.f32 %v2908_v37 }
 0x339   : > { %3168 = vrot.lane.b32.xlu1 %v2903_v8, %s4826_s6  ;;  %v2831_v18 = vpop.permute.xlu0 %2830  ;;  %v2909_v24 = vadd.f32 %v2829_v16, %v2589_v6  ;;  %4681 = vtanh.f32 %v2907_v29  ;;  %v2594_v6 = vmul.f32 %v6264_v44, %v6113_v46 }
 0x33a   : > { %v2910_v19 = vadd.f32 %v2831_v18, %v2590_v40  ;;  %v6793_v18 = vld [vmem:[#allocation18_spill] sm:$0xff] }
 0x33b   : > { %2998 = vrot.lane.b32.xlu0 %v4664_v0, %s4824_s15  ;;  %v4676_v63 = vpop.eup %4675  ;;  %4683 = vtanh.f32 %v2909_v24  ;;  %v2592_v0 = vmul.f32 %v6242_v59, %v6100_v56  ;;  %v2600_v56 = vmul.f32 %v6252_v26, %v6138_v51 }
 0x33c   : > { %v2833_v54 = vpop.permute.xlu1 %2832  ;;  %4685 = vtanh.f32 %v2910_v19 }
 0x33d   : > { %3004 = vrot.lane.b32.xlu1 %v4666_v3, %s4824_s15  ;;  %v2911_v11 = vadd.f32 %v2833_v54, %v2591_v34  ;;  %v2604_v34 = vmul.f32 %v6274_v23, %v6149_v14 }
 0x33e   : > { %v4678_v28 = vpop.eup %4677 }
 0x33f   : > { %3174 = vrot.lane.b32.xlu0 %v2906_v1, %s4826_s6  ;;  %4687 = vtanh.f32 %v2911_v11 }
 0x341   : > { %3000 = vrot.lane.b32.xlu1 %v4668_v32, %s4824_s15  ;;  %v2835_v50 = vpop.permute.xlu0 %2834  ;;  %v2593_v32 = vmul.f32 %v6247_v13, %v6108_v48 }
 0x342   : > { %v4680_v8 = vpop.eup %4679  ;;  %v2912_v36 = vadd.f32 %v2835_v50, %v2592_v0  ;;  %v2837_v43 = vpop.permute.xlu1 %2836  ;;  %v6795_v0 = vld [vmem:[#allocation9_spill] sm:$0xff] }
 0x343   : > { %3010 = vrot.lane.b32.xlu0 %v4670_v21, %s4824_s15  ;;  %v4682_v47 = vpop.eup %4681  ;;  %v2913_v38 = vadd.f32 %v2837_v43, %v2593_v32 }
 0x344   : > { %4689 = vtanh.f32 %v2912_v36 }
 0x345   : > { %3176 = vrot.lane.b32.xlu1 %v2907_v29, %s4826_s6  ;;  %v2851_v3 = vpop.permute.xlu0 %2850  ;;  %v4684_v1 = vpop.eup %4683  ;;  %v2598_v29 = vmul.f32 %v6258_v25, %v6131_v12  ;;  %v2599_v12 = vmul.f32 %v6271_v31, %v6793_v18  ;;  %4691 = vtanh.f32 %v2913_v38  ;;  %v6803_v18 = vld [vmem:[#allocation12_spill] sm:$0xff] }
 0x346   : > { %v4686_v45 = vpop.eup %4685  ;;  %v2920_v4 = vadd.f32 %v2851_v3, %v2600_v56  ;;  %v6797_v3 = vld [vmem:[#allocation11_spill] sm:$0xff] }
 0x347   : > { %3178 = vrot.lane.b32.xlu0 %v2908_v37, %s4826_s6  ;;  %v2601_v37 = vmul.f32 %v6262_v52, %v6141_v9 }
 0x348   : > { %4693 = vtanh.f32 %v2920_v4 }
 0x349   : > { %3012 = vrot.lane.b32.xlu1 %v4672_v41, %s4824_s15  ;;  %v4688_v48 = vpop.eup %4687 }
 0x34b   : > { %3006 = vrot.lane.b32.xlu0 %v4674_v20, %s4824_s15 }
 0x34d   : > { %3180 = vrot.lane.b32.xlu1 %v2909_v24, %s4826_s6  ;;  %v2847_v30 = vpop.permute.xlu0 %2846 }
 0x34e   : > { %v2853_v21 = vpop.permute.xlu1 %2852  ;;  %v2918_v41 = vadd.f32 %v2847_v30, %v2598_v29  ;;  %v4690_v46 = vpop.eup %4689 }
 0x34f   : > { %3182 = vrot.lane.b32.xlu0 %v2910_v19, %s4826_s6  ;;  %v2921_v20 = vadd.f32 %v2853_v21, %v2601_v37  ;;  %v4692_v43 = vpop.eup %4691  ;;  %v6800_v21 = vld [vmem:[#allocation13_spill] sm:$0xff]  ;;  %v6802_v37 = vld [vmem:[#allocation20_spill] sm:$0xff] }
 0x351   : > { %3008 = vrot.lane.b32.xlu1 %v4676_v63, %s4824_s15  ;;  %v2839_v16 = vpop.permute.xlu0 %2838  ;;  %v6794_v63 = vld [vmem:[#allocation7_spill] sm:$0xff]  ;;  %4695 = vtanh.f32 %v2921_v20 }
 0x352   : > { %v2849_v51 = vpop.permute.xlu1 %2848  ;;  %v2914_v40 = vadd.f32 %v2839_v16, %v2594_v6  ;;  %v2595_v54 = vmul.f32 %v6277_v53, %v6794_v63  ;;  %4697 = vtanh.f32 %v2918_v41 }
 0x353   : > { %3014 = vrot.lane.b32.xlu0 %v4678_v28, %s4824_s15  ;;  %v2919_v24 = vadd.f32 %v2849_v51, %v2599_v12  ;;  %v2597_v12 = vmul.f32 %v6299_v39, %v6803_v18 }
 0x354   : > { %4699 = vtanh.f32 %v2914_v40 }
 0x355   : > { %3184 = vrot.lane.b32.xlu1 %v2911_v11, %s4826_s6  ;;  %v2859_v19 = vpop.permute.xlu0 %2858  ;;  %4701 = vtanh.f32 %v2919_v24 }
 0x356   : > { %v2841_v9 = vpop.permute.xlu1 %2840  ;;  %v2924_v11 = vadd.f32 %v2859_v19, %v2604_v34 }
 0x357   : > { %3018 = vrot.lane.b32.xlu0 %v4680_v8, %s4824_s15  ;;  %v2915_v28 = vadd.f32 %v2841_v9, %v2595_v54 }
 0x358   : > { %4703 = vtanh.f32 %v2924_v11 }
 0x359   : > { %3016 = vrot.lane.b32.xlu1 %v4682_v47, %s4824_s15  ;;  %v2855_v8 = vpop.permute.xlu0 %2854  ;;  %v6796_v47 = vld [vmem:[#allocation17_spill] sm:$0xff]  ;;  %4705 = vtanh.f32 %v2915_v28 }
 0x35a   : > { %v2861_v50 = vpop.permute.xlu1 %2860 }
 0x35b   : > { %3186 = vrot.lane.b32.xlu0 %v2912_v36, %s4826_s6  ;;  %v2602_v36 = vmul.f32 %v6796_v47, %v6795_v0 }
 0x35d   : > { %3020 = vrot.lane.b32.xlu1 %v4684_v1, %s4824_s15  ;;  %v6798_v1 = vld [vmem:[#allocation14_spill] sm:$0xff]  ;;  %v2843_v29 = vpop.permute.xlu0 %2842 }
 0x35e   : > { %v2605_v32 = vmul.f32 %v6798_v1, %v6797_v3  ;;  %v2857_v56 = vpop.permute.xlu1 %2856 }
 0x35f   : > { %3022 = vrot.lane.b32.xlu0 %v4686_v45, %s4824_s15  ;;  %v2922_v45 = vadd.f32 %v2855_v8, %v2602_v36 }
 0x360   : > { %v2925_v14 = vadd.f32 %v2861_v50, %v2605_v32 }
 0x361   : > { %3188 = vrot.lane.b32.xlu1 %v2913_v38, %s4826_s6  ;;  %v6799_v38 = vld [vmem:[#allocation10_spill] sm:$0xff]  ;;  %4707 = vtanh.f32 %v2922_v45 }
 0x362   : > { %v2603_v30 = vmul.f32 %v6800_v21, %v6799_v38  ;;  %4709 = vtanh.f32 %v2925_v14 }
 0x363   : > { %3202 = vrot.lane.b32.xlu0 %v2920_v4, %s4826_s6  ;;  %v4694_v4 = vpop.eup %4693 }
 0x364   : > { %v2923_v16 = vadd.f32 %v2857_v56, %v2603_v30 }
 0x365   : > { %3024 = vrot.lane.b32.xlu1 %v4688_v48, %s4824_s15  ;;  %v6801_v48 = vld [vmem:[#allocation8_spill] sm:$0xff] }
 0x366   : > { %v2596_v51 = vmul.f32 %v6802_v37, %v6801_v48 }
 0x367   : > { %3198 = vrot.lane.b32.xlu0 %v2918_v41, %s4826_s6  ;;  %v4696_v41 = vpop.eup %4695 }
 0x368   : > { %v2916_v6 = vadd.f32 %v2843_v29, %v2596_v51  ;;  %v4698_v9 = vpop.eup %4697 }
 0x369   : > { %3204 = vrot.lane.b32.xlu1 %v2921_v20, %s4826_s6  ;;  %v2845_v20 = vpop.permute.xlu1 %2844 }
 0x36a   : > { %v2917_v19 = vadd.f32 %v2845_v20, %v2597_v12  ;;  %4711 = vtanh.f32 %v2916_v6 }
 0x36b   : > { %3190 = vrot.lane.b32.xlu0 %v2914_v40, %s4826_s6  ;;  %v4700_v40 = vpop.eup %4699  ;;  %4713 = vtanh.f32 %v2923_v16 }
 0x36c   : > { %4715 = vtanh.f32 %v2917_v19 }
 0x36d   : > { %3200 = vrot.lane.b32.xlu1 %v2919_v24, %s4826_s6  ;;  %v4702_v24 = vpop.eup %4701 }
 0x36e   : > { %v4704_v54 = vpop.eup %4703 }
 0x36f   : > { %3026 = vrot.lane.b32.xlu0 %v4690_v46, %s4824_s15  ;;  %v4706_v46 = vpop.eup %4705 }
 0x371   : > { %3192 = vrot.lane.b32.xlu1 %v2915_v28, %s4826_s6  ;;  %v4708_v28 = vpop.eup %4707 }
 0x372   : > { %v4710_v50 = vpop.eup %4709 }
 0x373   : > { %3210 = vrot.lane.b32.xlu0 %v2924_v11, %s4826_s6 }
 0x374   : > { %v4712_v0 = vpop.eup %4711 }
 0x375   : > { %3028 = vrot.lane.b32.xlu1 %v4692_v43, %s4824_s15  ;;  %v4714_v43 = vpop.eup %4713 }
 0x377   : > { %3206 = vrot.lane.b32.xlu0 %v2922_v45, %s4826_s6  ;;  %v4716_v45 = vpop.eup %4715 }
 0x379   : > { %3212 = vrot.lane.b32.xlu1 %v2925_v14, %s4826_s6 }
 0x37b   : > { %3042 = vrot.lane.b32.xlu0 %v4694_v4, %s4824_s15 }
 0x37d   : > { %3208 = vrot.lane.b32.xlu1 %v2923_v16, %s4826_s6 }
 0x37f   : > { %3194 = vrot.lane.b32.xlu0 %v2916_v6, %s4826_s6 }
 0x381   : > { %3044 = vrot.lane.b32.xlu1 %v4696_v41, %s4824_s15 }
 0x383   : > { %3038 = vrot.lane.b32.xlu0 %v4698_v9, %s4824_s15 }
 0x385   : > { %3196 = vrot.lane.b32.xlu1 %v2917_v19, %s4826_s6 }
 0x387   : > { %3030 = vrot.lane.b32.xlu0 %v4700_v40, %s4824_s15 }
 0x389   : > { %3040 = vrot.lane.b32.xlu1 %v4702_v24, %s4824_s15  ;;  %v3155_v63 = vpop.permute.xlu0 %3154 }
 0x38a   : > { %3248 = vst.msk [vmem:[%s4936_s23 + $0x10] sm:$0xff] %vm1369_vm2, %v3155_v63 }
 0x38b   : > { %3050 = vrot.lane.b32.xlu0 %v4704_v54, %s4824_s15 }
 0x38d   : > { %3032 = vrot.lane.b32.xlu1 %v4706_v46, %s4824_s15  ;;  %v3151_v34 = vpop.permute.xlu0 %3150 }
 0x38e   : > { %v3157_v11 = vpop.permute.xlu1 %3156  ;;  %3246 = vst.msk [vmem:[%s4936_s23] sm:$0xff] %vm1369_vm2, %v3151_v34 }
 0x38f   : > { %3249 = vst.msk [vmem:[%s4936_s23 + $0x18] sm:$0xff] %vm1369_vm2, %v3157_v11  ;;  %3046 = vrot.lane.b32.xlu0 %v4708_v28, %s4824_s15 }
 0x391   : > { %3052 = vrot.lane.b32.xlu1 %v4710_v50, %s4824_s15  ;;  %v3163_v8 = vpop.permute.xlu0 %3162 }
 0x392   : > { %v3153_v36 = vpop.permute.xlu1 %3152  ;;  %3252 = vst.msk [vmem:[%s4936_s23 + $0x30] sm:$0xff] %vm1369_vm2, %v3163_v8 }
 0x393   : > { %3247 = vst.msk [vmem:[%s4936_s23 + $0x8] sm:$0xff] %vm1369_vm2, %v3153_v36  ;;  %3034 = vrot.lane.b32.xlu0 %v4712_v0, %s4824_s15 }
 0x395   : > { %3048 = vrot.lane.b32.xlu1 %v4714_v43, %s4824_s15  ;;  %v3159_v3 = vpop.permute.xlu0 %3158 }
 0x396   : > { %3250 = vst.msk [vmem:[%s4936_s23 + $0x20] sm:$0xff] %vm1369_vm2, %v3159_v3 }
 0x397   : > { %v3165_v32 = vpop.permute.xlu1 %3164 }
 0x398   : > { %3253 = vst.msk [vmem:[%s4936_s23 + $0x38] sm:$0xff] %vm1369_vm2, %v3165_v32 }
 0x399   : > { %3036 = vrot.lane.b32.xlu1 %v4716_v45, %s4824_s15  ;;  %v2995_v14 = vpop.permute.xlu0 %2994 }
 0x39a   : > { %v3088_v56 = vmul.f32 %v6152_v15, %v2995_v14 }
 0x39b   : > { %v3161_v38 = vpop.permute.xlu1 %3160 }
 0x39c   : > { %3251 = vst.msk [vmem:[%s4936_s23 + $0x28] sm:$0xff] %vm1369_vm2, %v3161_v38  ;;  %3314 = vrot.lane.b32.xlu0 %v3088_v56, %s4825_s30 }
 0x39d   : > { %v2991_v30 = vpop.permute.xlu0 %2990 }
 0x39e   : > { %v3086_v4 = vmul.f32 %v6158_v60, %v2991_v30 }
 0x39f   : > { %v2997_v29 = vpop.permute.xlu1 %2996 }
 0x3a0   : > { %v3089_v48 = vmul.f32 %v6161_v49, %v2997_v29  ;;  %3310 = vrot.lane.b32.xlu0 %v3086_v4, %s4825_s30 }
 0x3a1   : > { %v3171_v51 = vpop.permute.xlu0 %3170 }
 0x3a2   : > { %3316 = vrot.lane.b32.xlu1 %v3089_v48, %s4825_s30  ;;  %3256 = vst.msk [vmem:[%s4936_s23 + $0x50] sm:$0xff] %vm1369_vm2, %v3171_v51 }
 0x3a3   : > { %v2993_v15 = vpop.permute.xlu1 %2992 }
 0x3a4   : > { %v3087_v16 = vmul.f32 %v6166_v10, %v2993_v15 }
 0x3a5   : > { %v3167_v6 = vpop.permute.xlu0 %3166 }
 0x3a6   : > { %3312 = vrot.lane.b32.xlu1 %v3087_v16, %s4825_s30  ;;  %3254 = vst.msk [vmem:[%s4936_s23 + $0x40] sm:$0xff] %vm1369_vm2, %v3167_v6 }
 0x3a7   : > { %v3173_v60 = vpop.permute.xlu1 %3172 }
 0x3a8   : > { %3257 = vst.msk [vmem:[%s4936_s23 + $0x58] sm:$0xff] %vm1369_vm2, %v3173_v60 }
 0x3a9   : > { %v3003_v49 = vpop.permute.xlu0 %3002 }
 0x3aa   : > { %v3092_v41 = vmul.f32 %v6169_v35, %v3003_v49 }
 0x3ab   : > { %v3169_v20 = vpop.permute.xlu1 %3168 }
 0x3ac   : > { %3255 = vst.msk [vmem:[%s4936_s23 + $0x48] sm:$0xff] %vm1369_vm2, %v3169_v20  ;;  %3322 = vrot.lane.b32.xlu0 %v3092_v41, %s4825_s30 }
 0x3ad   : > { %v2999_v18 = vpop.permute.xlu0 %2998 }
 0x3ae   : > { %v3090_v10 = vmul.f32 %v6177_v5, %v2999_v18 }
 0x3af   : > { %v3005_v12 = vpop.permute.xlu1 %3004 }
 0x3b0   : > { %v3093_v9 = vmul.f32 %v6180_v33, %v3005_v12  ;;  %3318 = vrot.lane.b32.xlu0 %v3090_v10, %s4825_s30 }
 0x3b1   : > { %v3175_v19 = vpop.permute.xlu0 %3174 }
 0x3b2   : > { %3324 = vrot.lane.b32.xlu1 %v3093_v9, %s4825_s30  ;;  %3258 = vst.msk [vmem:[%s4936_s23 + $0x60] sm:$0xff] %vm1369_vm2, %v3175_v19 }
 0x3b3   : > { %v3001_v35 = vpop.permute.xlu1 %3000 }
 0x3b4   : > { %v3091_v40 = vmul.f32 %v6188_v61, %v3001_v35 }
 0x3b5   : > { %v3011_v24 = vpop.permute.xlu0 %3010 }
 0x3b6   : > { %3320 = vrot.lane.b32.xlu1 %v3091_v40, %s4825_s30  ;;  %v3096_v5 = vmul.f32 %v6192_v27, %v3011_v24 }
 0x3b7   : > { %v3177_v63 = vpop.permute.xlu1 %3176 }
 0x3b8   : > { %3259 = vst.msk [vmem:[%s4936_s23 + $0x68] sm:$0xff] %vm1369_vm2, %v3177_v63  ;;  %3330 = vrot.lane.b32.xlu0 %v3096_v5, %s4825_s30 }
 0x3b9   : > { %v3179_v33 = vpop.permute.xlu0 %3178 }
 0x3ba   : > { %3260 = vst.msk [vmem:[%s4936_s23 + $0x70] sm:$0xff] %vm1369_vm2, %v3179_v33 }
 0x3bb   : > { %v3013_v54 = vpop.permute.xlu1 %3012 }
 0x3bc   : > { %v3097_v46 = vmul.f32 %v6203_v7, %v3013_v54 }
 0x3bd   : > { %v3007_v34 = vpop.permute.xlu0 %3006 }
 0x3be   : > { %3332 = vrot.lane.b32.xlu1 %v3097_v46, %s4825_s30  ;;  %v3094_v61 = vmul.f32 %v6199_v17, %v3007_v34 }
 0x3bf   : > { %v3181_v28 = vpop.permute.xlu1 %3180 }
 0x3c0   : > { %3261 = vst.msk [vmem:[%s4936_s23 + $0x78] sm:$0xff] %vm1369_vm2, %v3181_v28  ;;  %3326 = vrot.lane.b32.xlu0 %v3094_v61, %s4825_s30 }
 0x3c1   : > { %v3183_v27 = vpop.permute.xlu0 %3182 }
 0x3c2   : > { %3262 = vst.msk [vmem:[%s4936_s23 + $0x80] sm:$0xff] %vm1369_vm2, %v3183_v27 }
 0x3c3   : > { %v3009_v11 = vpop.permute.xlu1 %3008 }
 0x3c4   : > { %v3095_v50 = vmul.f32 %v6207_v62, %v3009_v11 }
 0x3c5   : > { %v3015_v8 = vpop.permute.xlu0 %3014 }
 0x3c6   : > { %3328 = vrot.lane.b32.xlu1 %v3095_v50, %s4825_s30  ;;  %v3098_v7 = vmul.f32 %v6215_v58, %v3015_v8 }
 0x3c7   : > { %v3185_v0 = vpop.permute.xlu1 %3184 }
 0x3c8   : > { %3263 = vst.msk [vmem:[%s4936_s23 + $0x88] sm:$0xff] %vm1369_vm2, %v3185_v0  ;;  %3334 = vrot.lane.b32.xlu0 %v3098_v7, %s4825_s30 }
 0x3c9   : > { %v3019_v17 = vpop.permute.xlu0 %3018 }
 0x3ca   : > { %v3100_v36 = vmul.f32 %v6218_v22, %v3019_v17 }
 0x3cb   : > { %v3017_v43 = vpop.permute.xlu1 %3016 }
 0x3cc   : > { %v3099_v3 = vmul.f32 %v6221_v55, %v3017_v43  ;;  %3338 = vrot.lane.b32.xlu0 %v3100_v36, %s4825_s30 }
 0x3cd   : > { %v3187_v62 = vpop.permute.xlu0 %3186 }
 0x3ce   : > { %3336 = vrot.lane.b32.xlu1 %v3099_v3, %s4825_s30  ;;  %3264 = vst.msk [vmem:[%s4936_s23 + $0x90] sm:$0xff] %vm1369_vm2, %v3187_v62 }
 0x3cf   : > { %v3021_v58 = vpop.permute.xlu1 %3020 }
 0x3d0   : > { %v3101_v32 = vmul.f32 %v6227_v42, %v3021_v58 }
 0x3d1   : > { %v3023_v45 = vpop.permute.xlu0 %3022 }
 0x3d2   : > { %3340 = vrot.lane.b32.xlu1 %v3101_v32, %s4825_s30  ;;  %v3102_v22 = vmul.f32 %v6231_v57, %v3023_v45 }
 0x3d3   : > { %v3189_v55 = vpop.permute.xlu1 %3188 }
 0x3d4   : > { %3265 = vst.msk [vmem:[%s4936_s23 + $0x98] sm:$0xff] %vm1369_vm2, %v3189_v55  ;;  %3342 = vrot.lane.b32.xlu0 %v3102_v22, %s4825_s30 }
 0x3d5   : > { %v3203_v14 = vpop.permute.xlu0 %3202 }
 0x3d6   : > { %3272 = vst.msk [vmem:[%s4936_s23 + $0xd0] sm:$0xff] %vm1369_vm2, %v3203_v14 }
 0x3d7   : > { %v3025_v56 = vpop.permute.xlu1 %3024 }
 0x3d8   : > { %v3103_v38 = vmul.f32 %v6238_v2, %v3025_v56 }
 0x3d9   : > { %v3199_v42 = vpop.permute.xlu0 %3198 }
 0x3da   : > { %3344 = vrot.lane.b32.xlu1 %v3103_v38, %s4825_s30  ;;  %3270 = vst.msk [vmem:[%s4936_s23 + $0xc0] sm:$0xff] %vm1369_vm2, %v3199_v42 }
 0x3db   : > { %v3205_v57 = vpop.permute.xlu1 %3204 }
 0x3dc   : > { %3273 = vst.msk [vmem:[%s4936_s23 + $0xd8] sm:$0xff] %vm1369_vm2, %v3205_v57 }
 0x3dd   : > { %v3191_v30 = vpop.permute.xlu0 %3190 }
 0x3de   : > { %3266 = vst.msk [vmem:[%s4936_s23 + $0xa0] sm:$0xff] %vm1369_vm2, %v3191_v30 }
 0x3df   : > { %v3201_v4 = vpop.permute.xlu1 %3200 }
 0x3e0   : > { %3271 = vst.msk [vmem:[%s4936_s23 + $0xc8] sm:$0xff] %vm1369_vm2, %v3201_v4 }
 0x3e1   : > { %v3027_v29 = vpop.permute.xlu0 %3026 }
 0x3e2   : > { %v3104_v2 = vmul.f32 %v6242_v59, %v3027_v29 }
 0x3e3   : > { %v3193_v48 = vpop.permute.xlu1 %3192 }
 0x3e4   : > { %3267 = vst.msk [vmem:[%s4936_s23 + $0xa8] sm:$0xff] %vm1369_vm2, %v3193_v48  ;;  %3346 = vrot.lane.b32.xlu0 %v3104_v2, %s4825_s30 }
 0x3e5   : > { %v3211_v51 = vpop.permute.xlu0 %3210 }
 0x3e6   : > { %3276 = vst.msk [vmem:[%s4936_s23 + $0xf0] sm:$0xff] %vm1369_vm2, %v3211_v51 }
 0x3e7   : > { %v3029_v15 = vpop.permute.xlu1 %3028 }
 0x3e8   : > { %v3105_v16 = vmul.f32 %v6247_v13, %v3029_v15 }
 0x3e9   : > { %v3207_v6 = vpop.permute.xlu0 %3206 }
 0x3ea   : > { %3348 = vrot.lane.b32.xlu1 %v3105_v16, %s4825_s30  ;;  %3274 = vst.msk [vmem:[%s4936_s23 + $0xe0] sm:$0xff] %vm1369_vm2, %v3207_v6 }
 0x3eb   : > { %v3213_v59 = vpop.permute.xlu1 %3212 }
 0x3ec   : > { %3277 = vst.msk [vmem:[%s4936_s23 + $0xf8] sm:$0xff] %vm1369_vm2, %v3213_v59 }
 0x3ed   : > { %v3043_v60 = vpop.permute.xlu0 %3042 }
 0x3ee   : > { %v3112_v49 = vmul.f32 %v6252_v26, %v3043_v60 }
 0x3ef   : > { %v3209_v41 = vpop.permute.xlu1 %3208 }
 0x3f0   : > { %3275 = vst.msk [vmem:[%s4936_s23 + $0xe8] sm:$0xff] %vm1369_vm2, %v3209_v41  ;;  %3362 = vrot.lane.b32.xlu0 %v3112_v49, %s4825_s30 }
 0x3f1   : > { %v3195_v20 = vpop.permute.xlu0 %3194 }
 0x3f2   : > { %3268 = vst.msk [vmem:[%s4936_s23 + $0xb0] sm:$0xff] %vm1369_vm2, %v3195_v20 }
 0x3f3   : > { %v3045_v13 = vpop.permute.xlu1 %3044 }
 0x3f4   : > { %v3113_v18 = vmul.f32 %v6262_v52, %v3045_v13 }
 0x3f5   : > { %v3039_v10 = vpop.permute.xlu0 %3038 }
 0x3f6   : > { %3364 = vrot.lane.b32.xlu1 %v3113_v18, %s4825_s30  ;;  %v3110_v12 = vmul.f32 %v6258_v25, %v3039_v10 }
 0x3f7   : > { %v3197_v9 = vpop.permute.xlu1 %3196 }
 0x3f8   : > { %3269 = vst.msk [vmem:[%s4936_s23 + $0xb8] sm:$0xff] %vm1369_vm2, %v3197_v9  ;;  %3358 = vrot.lane.b32.xlu0 %v3110_v12, %s4825_s30  ;;  %s4731_s23 = sshll.u32 %s4827_s5, 4  ;;  %s4732_s23 = int_to_ptr.vmem [resolvable:$false] %s4731_s23 }
 0x3f9   : > { %v3031_v26 = vpop.permute.xlu0 %3030  ;;  %s4733_s6 = scalar_lea.vmem %s4732_s23, 8192  ;;  %p4734_p5 = scmp.lt.s32.totalorder %s6557_s26, %s4732_s23 }
 0x3fa   : > { %v3106_v19 = vmul.f32 %v6264_v44, %v3031_v26  ;;  %p4735_p6 = scmp.lt.s32.totalorder %s4733_s6, %s4727_s4 }
 0x3fb   : > { %v3041_v35 = vpop.permute.xlu1 %3040 }
 0x3fc   : > { %v3111_v40 = vmul.f32 %v6271_v31, %v3041_v35  ;;  %3350 = vrot.lane.b32.xlu0 %v3106_v19, %s4825_s30  ;;  %p4736_p7 = por %p4735_p6, %p4734_p5 }
 0x3fd   : > { %v3051_v52 = vpop.permute.xlu0 %3050 }
 0x3fe   : > { %3360 = vrot.lane.b32.xlu1 %v3111_v40, %s4825_s30  ;;  %p4737_p8 = pnand %p4736_p7, %p4730_p4 }
 0x3ff   : > { %v3033_v24 = vpop.permute.xlu1 %3032 }
 0x400   : > { %v3107_v25 = vmul.f32 %v6277_v53, %v3033_v24 }
 0x401   : > { %v3047_v5 = vpop.permute.xlu0 %3046 }
 0x402   : > { %3352 = vrot.lane.b32.xlu1 %v3107_v25, %s4825_s30  ;;  %v3114_v63 = vmul.f32 %v6796_v47, %v3047_v5 }
 0x403   : > { %v3053_v44 = vpop.permute.xlu1 %3052 }
 0x404   : > { %3366 = vrot.lane.b32.xlu0 %v3114_v63, %s4825_s30 }
 0x405   : > { %v3035_v33 = vpop.permute.xlu0 %3034 }
 0x406   : > { %v3108_v31 = vmul.f32 %v6802_v37, %v3035_v33 }
 0x407   : > { %v3049_v53 = vpop.permute.xlu1 %3048 }
 0x408   : > { %v3115_v47 = vmul.f32 %v6800_v21, %v3049_v53  ;;  %3354 = vrot.lane.b32.xlu0 %v3108_v31, %s4825_s30 }
 0x409   : > { %4740 = shalt.err (!%p4737_p8)
}
 0x40a   : > { %s4741_s29 = scalar_lea.hbm %s6554_s21, 4096  ;;  %s4745_s9 = scalar_lea.hbm %s6721_s3, 8192 }
 0x40b   : > { %p4742_p10 = scmp.ne.s32.totalorder %s6554_s21, %s4741_s29  ;;  %p4746_p13 = scmp.lt.u32.totalorder %s6554_s21, %s6721_s3 }
 0x40c   : > { %p4747_p0 = scmp.lt.u32.totalorder %s4745_s9, %s4741_s29  ;;  %p4749_p2 = scmp.lt.u32.totalorder %s4741_s29, %s6554_s21 }
 0x40d   : > { %p4743_p11 = pnand %p4742_p10, %p4899_p3 }
 0x40e   : > { %p4748_p1 = por %p4747_p0, %p4746_p13 }
 0x40f   : > { %p4744_p12 = pneg %p4743_p11 }
 0x410   : > { %p4750_p4 = por %p4749_p2, %p4748_p1 }
 0x412   : > { %p4751_p5 = pnand %p4750_p4, %p4744_p12 }
 0x414   : > { %4754 = shalt.err (!%p4751_p5)
}
 0x415   : > { %s4828_s15 = smov 128   ;;  %s4829_s11 = smov 8   ;;  %v3116_v21 = vmul.f32 %v6274_v23, %v3051_v52  ;;  %3368 = vrot.lane.b32.xlu1 %v3115_v47, %s4825_s30  ;;  %v3037_v37 = vpop.permute.xlu1 %3036  ;;  %v3315_v46 = vpop.permute.xlu0 %3314  ;;  %v3117_v34 = vmul.f32 %v6798_v1, %v3053_v44 }
 0x416   : > { %3886 = dma.vmem_to_hbm [thread:$0]  (%p4899_p3), %s6557_s26, 4096, %s6554_s21, %s6563_s16, %s4828_s15, %s4828_s15, %s4829_s11   ;;  %v3109_v54 = vmul.f32 %v6299_v39, %v3037_v37  ;;  %3440 = vst.msk [vmem:[#allocation2 + $0x31] sm:$0xff] %vm1369_vm2, %v3315_v46 }
 0x417   : > { %3370 = vrot.lane.b32.xlu0 %v3116_v21, %s4825_s30  ;;  %3408 = vst.msk [vmem:[%s4934_s27 + $0x10] sm:$0xff] %vm1369_vm2, %v3315_v46 }
 0x419   : > { %3356 = vrot.lane.b32.xlu1 %v3109_v54, %s4825_s30  ;;  %v3311_v23 = vpop.permute.xlu0 %3310  ;;  %v3317_v39 = vpop.permute.xlu1 %3316 }
 0x41a   : > { %3406 = vst.msk [vmem:[%s4934_s27] sm:$0xff] %vm1369_vm2, %v3311_v23  ;;  %3438 = vst.msk [vmem:[#allocation2 + $0x19] sm:$0xff] %vm1369_vm2, %v3311_v23 }
 0x41b   : > { %3409 = vst.msk [vmem:[%s4934_s27 + $0x18] sm:$0xff] %vm1369_vm2, %v3317_v39  ;;  %3441 = vst.msk [vmem:[#allocation2 + $0x39] sm:$0xff] %vm1369_vm2, %v3317_v39 }
 0x41d   : > { %3372 = vrot.lane.b32.xlu1 %v3117_v34, %s4825_s30  ;;  %v3313_v61 = vpop.permute.xlu1 %3312 }
 0x41e   : > { %3407 = vst.msk [vmem:[%s4934_s27 + $0x8] sm:$0xff] %vm1369_vm2, %v3313_v61  ;;  %3439 = vst.msk [vmem:[#allocation2 + $0x21] sm:$0xff] %vm1369_vm2, %v3313_v61  ;;  %v3323_v1 = vpop.permute.xlu0 %3322 }
 0x41f   : > { %3412 = vst.msk [vmem:[%s4934_s27 + $0x30] sm:$0xff] %vm1369_vm2, %v3323_v1  ;;  %3444 = vst.msk [vmem:[#allocation2 + $0x61] sm:$0xff] %vm1369_vm2, %v3323_v1 }
 0x422   : > { %v3319_v28 = vpop.permute.xlu0 %3318 }
 0x423   : > { %3410 = vst.msk [vmem:[%s4934_s27 + $0x20] sm:$0xff] %vm1369_vm2, %v3319_v28  ;;  %3442 = vst.msk [vmem:[#allocation2 + $0x49] sm:$0xff] %vm1369_vm2, %v3319_v28 }
 0x424   : > { %v3325_v27 = vpop.permute.xlu1 %3324 }
 0x425   : > { %3413 = vst.msk [vmem:[%s4934_s27 + $0x38] sm:$0xff] %vm1369_vm2, %v3325_v27  ;;  %3445 = vst.msk [vmem:[#allocation2 + $0x69] sm:$0xff] %vm1369_vm2, %v3325_v27 }
 0x428   : > { %v3321_v11 = vpop.permute.xlu1 %3320 }
 0x429   : > { %3411 = vst.msk [vmem:[%s4934_s27 + $0x28] sm:$0xff] %vm1369_vm2, %v3321_v11  ;;  %3443 = vst.msk [vmem:[#allocation2 + $0x51] sm:$0xff] %vm1369_vm2, %v3321_v11 }
 0x42a   : > { %v3331_v50 = vpop.permute.xlu0 %3330 }
 0x42b   : > { %3416 = vst.msk [vmem:[%s4934_s27 + $0x50] sm:$0xff] %vm1369_vm2, %v3331_v50  ;;  %3448 = vst.msk [vmem:[#allocation2 + $0x91] sm:$0xff] %vm1369_vm2, %v3331_v50 }
 0x430   : > { %v3333_v8 = vpop.permute.xlu1 %3332 }
 0x431   : > { %3417 = vst.msk [vmem:[%s4934_s27 + $0x58] sm:$0xff] %vm1369_vm2, %v3333_v8  ;;  %3449 = vst.msk [vmem:[#allocation2 + $0x99] sm:$0xff] %vm1369_vm2, %v3333_v8 }
 0x432   : > { %v3327_v7 = vpop.permute.xlu0 %3326 }
 0x433   : > { %3414 = vst.msk [vmem:[%s4934_s27 + $0x40] sm:$0xff] %vm1369_vm2, %v3327_v7  ;;  %3446 = vst.msk [vmem:[#allocation2 + $0x79] sm:$0xff] %vm1369_vm2, %v3327_v7 }
 0x438   : > { %v3329_v0 = vpop.permute.xlu1 %3328 }
 0x439   : > { %3415 = vst.msk [vmem:[%s4934_s27 + $0x48] sm:$0xff] %vm1369_vm2, %v3329_v0  ;;  %3447 = vst.msk [vmem:[#allocation2 + $0x81] sm:$0xff] %vm1369_vm2, %v3329_v0 }
 0x43a   : > { %v3335_v17 = vpop.permute.xlu0 %3334 }
 0x43b   : > { %3418 = vst.msk [vmem:[%s4934_s27 + $0x60] sm:$0xff] %vm1369_vm2, %v3335_v17  ;;  %3450 = vst.msk [vmem:[#allocation2 + $0xa9] sm:$0xff] %vm1369_vm2, %v3335_v17 }
 0x43e   : > { %v3339_v36 = vpop.permute.xlu0 %3338 }
 0x43f   : > { %3420 = vst.msk [vmem:[%s4934_s27 + $0x70] sm:$0xff] %vm1369_vm2, %v3339_v36  ;;  %3452 = vst.msk [vmem:[#allocation2 + $0xc1] sm:$0xff] %vm1369_vm2, %v3339_v36 }
 0x440   : > { %v3337_v43 = vpop.permute.xlu1 %3336 }
 0x441   : > { %3419 = vst.msk [vmem:[%s4934_s27 + $0x68] sm:$0xff] %vm1369_vm2, %v3337_v43  ;;  %3451 = vst.msk [vmem:[#allocation2 + $0xb1] sm:$0xff] %vm1369_vm2, %v3337_v43 }
 0x444   : > { %v3341_v3 = vpop.permute.xlu1 %3340 }
 0x445   : > { %3421 = vst.msk [vmem:[%s4934_s27 + $0x78] sm:$0xff] %vm1369_vm2, %v3341_v3  ;;  %3453 = vst.msk [vmem:[#allocation2 + $0xc9] sm:$0xff] %vm1369_vm2, %v3341_v3 }
 0x446   : > { %v3343_v62 = vpop.permute.xlu0 %3342 }
 0x447   : > { %3422 = vst.msk [vmem:[%s4934_s27 + $0x80] sm:$0xff] %vm1369_vm2, %v3343_v62  ;;  %3454 = vst.msk [vmem:[#allocation2 + $0xd9] sm:$0xff] %vm1369_vm2, %v3343_v62 }
 0x44c   : > { %v3345_v58 = vpop.permute.xlu1 %3344 }
 0x44d   : > { %3423 = vst.msk [vmem:[%s4934_s27 + $0x88] sm:$0xff] %vm1369_vm2, %v3345_v58  ;;  %3455 = vst.msk [vmem:[#allocation2 + $0xe1] sm:$0xff] %vm1369_vm2, %v3345_v58 }
 0x456   : > { %v3347_v32 = vpop.permute.xlu0 %3346 }
 0x457   : > { %3424 = vst.msk [vmem:[%s4934_s27 + $0x90] sm:$0xff] %vm1369_vm2, %v3347_v32  ;;  %3456 = vst.msk [vmem:[#allocation2 + $0xf1] sm:$0xff] %vm1369_vm2, %v3347_v32 }
 0x45c   : > { %v3349_v45 = vpop.permute.xlu1 %3348 }
 0x45d   : > { %3425 = vst.msk [vmem:[%s4934_s27 + $0x98] sm:$0xff] %vm1369_vm2, %v3349_v45  ;;  %3457 = vst.msk [vmem:[#allocation2 + $0xf9] sm:$0xff] %vm1369_vm2, %v3349_v45 }
 0x462   : > { %v3363_v22 = vpop.permute.xlu0 %3362 }
 0x463   : > { %3432 = vst.msk [vmem:[%s4934_s27 + $0xd0] sm:$0xff] %vm1369_vm2, %v3363_v22  ;;  %3464 = vst.msk [vmem:[#allocation2 + $0x151] sm:$0xff] %vm1369_vm2, %v3363_v22 }
 0x468   : > { %v3365_v55 = vpop.permute.xlu1 %3364 }
 0x469   : > { %3433 = vst.msk [vmem:[%s4934_s27 + $0xd8] sm:$0xff] %vm1369_vm2, %v3365_v55  ;;  %3465 = vst.msk [vmem:[#allocation2 + $0x159] sm:$0xff] %vm1369_vm2, %v3365_v55 }
 0x46a   : > { %v3359_v14 = vpop.permute.xlu0 %3358 }
 0x46b   : > { %3430 = vst.msk [vmem:[%s4934_s27 + $0xc0] sm:$0xff] %vm1369_vm2, %v3359_v14  ;;  %3462 = vst.msk [vmem:[#allocation2 + $0x139] sm:$0xff] %vm1369_vm2, %v3359_v14 }
 0x46e   : > { %v3351_v56 = vpop.permute.xlu0 %3350 }
 0x46f   : > { %3426 = vst.msk [vmem:[%s4934_s27 + $0xa0] sm:$0xff] %vm1369_vm2, %v3351_v56  ;;  %3458 = vst.msk [vmem:[#allocation2 + $0x109] sm:$0xff] %vm1369_vm2, %v3351_v56 }
 0x470   : > { %v3361_v38 = vpop.permute.xlu1 %3360 }
 0x471   : > { %3431 = vst.msk [vmem:[%s4934_s27 + $0xc8] sm:$0xff] %vm1369_vm2, %v3361_v38  ;;  %3463 = vst.msk [vmem:[#allocation2 + $0x141] sm:$0xff] %vm1369_vm2, %v3361_v38 }
 0x474   : > { %v3353_v42 = vpop.permute.xlu1 %3352 }
 0x475   : > { %3427 = vst.msk [vmem:[%s4934_s27 + $0xa8] sm:$0xff] %vm1369_vm2, %v3353_v42  ;;  %3459 = vst.msk [vmem:[#allocation2 + $0x111] sm:$0xff] %vm1369_vm2, %v3353_v42 }
 0x476   : > { %v3367_v57 = vpop.permute.xlu0 %3366 }
 0x477   : > { %3434 = vst.msk [vmem:[%s4934_s27 + $0xe0] sm:$0xff] %vm1369_vm2, %v3367_v57  ;;  %3466 = vst.msk [vmem:[#allocation2 + $0x169] sm:$0xff] %vm1369_vm2, %v3367_v57 }
 0x47a   : > { %v3355_v30 = vpop.permute.xlu0 %3354 }
 0x47b   : > { %3428 = vst.msk [vmem:[%s4934_s27 + $0xb0] sm:$0xff] %vm1369_vm2, %v3355_v30  ;;  %3460 = vst.msk [vmem:[#allocation2 + $0x121] sm:$0xff] %vm1369_vm2, %v3355_v30 }
 0x487   : > { %v3369_v4 = vpop.permute.xlu1 %3368 }
 0x488   : > { %3435 = vst.msk [vmem:[%s4934_s27 + $0xe8] sm:$0xff] %vm1369_vm2, %v3369_v4  ;;  %3467 = vst.msk [vmem:[#allocation2 + $0x171] sm:$0xff] %vm1369_vm2, %v3369_v4 }
 0x489   : > { %v3371_v29 = vpop.permute.xlu0 %3370 }
 0x48a   : > { %3436 = vst.msk [vmem:[%s4934_s27 + $0xf0] sm:$0xff] %vm1369_vm2, %v3371_v29  ;;  %3468 = vst.msk [vmem:[#allocation2 + $0x181] sm:$0xff] %vm1369_vm2, %v3371_v29 }
 0x48b   : > { %v3357_v2 = vpop.permute.xlu1 %3356 }
 0x48c   : > { %3429 = vst.msk [vmem:[%s4934_s27 + $0xb8] sm:$0xff] %vm1369_vm2, %v3357_v2  ;;  %3461 = vst.msk [vmem:[#allocation2 + $0x129] sm:$0xff] %vm1369_vm2, %v3357_v2 }
 0x48f   : > { %v3373_v48 = vpop.permute.xlu1 %3372 }
 0x490   : > { %3437 = vst.msk [vmem:[%s4934_s27 + $0xf8] sm:$0xff] %vm1369_vm2, %v3373_v48  ;;  %3469 = vst.msk [vmem:[#allocation2 + $0x189] sm:$0xff] %vm1369_vm2, %v3373_v48 }
 0x491 PF: > { %p3892_p3 = scmp.ge.s32.totalorder %s4821_s19, 2  ;;  %s3523_s24 = sand.u32 1, %s4793_s12  }
 0x492   : > { %s3524_s30 = scalar_lea.sflag [#allocation4], %s3523_s24 }
 0x493   : > { %p3889_p6 = pnand %p3892_p3, %p4909_p9 }
 0x495   : > { %4788 = dma.done.wait (!%p3889_p6), %s3524_s30, 4096  }
 0x496   : > { %4790 = vsyncadd (!%p3889_p6), %s3524_s30, 4294963200  ;;  %s17_s19 = sadd.s32 1, %s4821_s19   ;;  %s6804_s27 = sld [smem:[#allocation6_spill]] }
 0x497   : > { %p14_p7 = scmp.ge.s32.totalorder %s17_s19, 18   ;;  %s6805_s12 = smov %s4797_s13 }
 0x498   : > { %s6806_s13 = smov %s4801_s14  ;;  %s6807_s14 = smov %s4917_s28 }
 0x499   : > { %s6808_s15 = smov %s4813_s17  ;;  %s6809_s16 = smov %s4817_s18 }
 0x49a   : > { %s6810_s17 = smov %s6813_s22  ;;  %16 = sbr.rel (!%p14_p7) target bundleno = 5 (0x5), region = 81 }
 0x49c   : > { %s6811_s18 = smov %s6804_s27 }
 0x4a1   :  { %3529 = vsyncpa [#allocation4], 1 }
 0x4a2   :  { %3531 = vsyncpa [#allocation4 + $0x1], 1 }

// kernel: _convlstm_forward.6
= control target key start
LH: loop header
LB: loop body
LE: loop exit
PB: predicated region body
PF: predicated region fallthrough
CT: control target
= control target key end

     0   :  { %s1621_s12 = smov 0   ;;  %s1623_s13 = smov 0   ;;  %s1901_s0 = inlined_call_operand.vmem [shape: bf16[2,8,256,288], index: 0, kind: input, shape index: {}]   ;;  %s1902_s1 = inlined_call_operand.vmem [shape: bf16[288,128], index: 1, kind: input, shape index: {}]   ;;  %s1903_s2 = inlined_call_operand.vmem [shape: f32[1,128], index: 2, kind: input, shape index: {}]   ;;  %s1904_s3 = inlined_call_operand.vmem [shape: f32[2,8,256,128], index: 3, kind: output, shape index: {}]  }
   0x1   :  { %s1625_s14 = smov 0   ;;  %s1627_s15 = smov 0  }
   0x2   :  { %s1629_s16 = smov 0  }
   0x3 LB: > { %s22_s17 = sadd.s32 1, %s1591_s14  ;;  %s25_s18 = sadd.s32 1, %s1595_s15  ;;  %s1599_s16 = sphi %s1629_s16, %s13_s16   ;;  %s1595_s15 = sphi %s1627_s15, %s1908_s15   ;;  %s1591_s14 = sphi %s1625_s14, %s1907_s14   ;;  %s1587_s13 = sphi %s1623_s13, %s1906_s13   ;;  %s1583_s12 = sphi %s1621_s12, %s1905_s12  }
   0x4   : > { %p23_p0 = scmp.ge.s32.totalorder %s22_s17, 8  ;;  %p1165_p1 = scmp.ge.s32.totalorder %s1599_s16, 1 }
   0x5   : > { %p157_p2 = scmp.lt.s32.totalorder %s1599_s16, 17 }
   0x6   : > { %s1910_s17 = smov (%p23_p0, %s22_s17), 0  ;;  %s1912_s18 = smov (!%p23_p0, %s25_s18), %s1595_s15 }
   0x7   : > { %p158_p3 = pnand %p1165_p1, %p157_p2  ;;  %p27_p4 = scmp.ge.s32.totalorder %s1912_s18, 2 }
   0x8   : > { %v1479_v0 = vld [vmem:[%s1902_s1 + $0x40] sm:$0xff] (!%p158_p3)   ;;  %p189_p5 = scmp.lt.s32.totalorder (!%p158_p3), %s1587_s13, 1  ;;  %p191_p6 = scmp.lt.s32.totalorder (!%p158_p3), %s1583_s12, 7  ;;  %v1481_v2 = vld [vmem:[%s1902_s1 + $0x48] sm:$0xff] (!%p158_p3)   ;;  %v1483_v4 = vld [vmem:[%s1902_s1 + $0x50] sm:$0xff] (!%p158_p3)   ;;  %vm663_vm0 = vcmask (!%p158_p3), 261120  }
   0x9   : > { %s1914_s18 = smov (%p27_p4, %s1912_s18), 0  ;;  %161 = sbr.rel (%p158_p3) target bundleno = 352 (0x160), region = 32 }
   0xa   : > { %v1480_v1 = vld [vmem:[%s1902_s1] sm:$0xff] (!%p158_p3)   ;;  %1255 = vmatprep.subr.bf16.mxu0 (!%p158_p3), %v1479_v0  ;;  %1421 = vmatprep.subr.bf16.mxu1 (!%p158_p3), %v1479_v0  ;;  %v1482_v3 = vld [vmem:[%s1902_s1 + $0x8] sm:$0xff] (!%p158_p3)   ;;  %v1484_v5 = vld [vmem:[%s1902_s1 + $0x10] sm:$0xff] (!%p158_p3)  }
   0xb   : > { %1256 = vmatpush3.bf16.msra.mxu0 (!%p158_p3), %v1480_v1  ;;  %1429 = vmatpush3.bf16.msra.mxu1 (!%p158_p3), %v1480_v1  ;;  %v1485_v6 = vld [vmem:[%s1902_s1 + $0x58] sm:$0xff] (!%p158_p3)   ;;  %v1487_v8 = vld [vmem:[%s1902_s1 + $0x60] sm:$0xff] (!%p158_p3)   ;;  %v1489_v10 = vld [vmem:[%s1902_s1 + $0x68] sm:$0xff] (!%p158_p3)  }
   0xc   : > { %1257 = vmatprep.subr.bf16.mxu0 (!%p158_p3), %v1481_v2  ;;  %1422 = vmatprep.subr.bf16.mxu1 (!%p158_p3), %v1481_v2  ;;  %v1486_v7 = vld [vmem:[%s1902_s1 + $0x18] sm:$0xff] (!%p158_p3)   ;;  %v1488_v9 = vld [vmem:[%s1902_s1 + $0x20] sm:$0xff] (!%p158_p3)   ;;  %v1490_v13 = vld [vmem:[%s1902_s1 + $0x28] sm:$0xff] (!%p158_p3)  }
   0xd   : > { %v1491_v14 = vld [vmem:[%s1902_s1 + $0x70] sm:$0xff] (!%p158_p3)   ;;  %v1493_v16 = vld [vmem:[%s1902_s1 + $0x78] sm:$0xff] (!%p158_p3)   ;;  %v1501_v18 = vld [vmem:[%s1902_s1 + $0x80] sm:$0xff] (!%p158_p3)  }
   0xe   : > { %v1492_v15 = vld [vmem:[%s1902_s1 + $0x30] sm:$0xff] (!%p158_p3)   ;;  %v1494_v17 = vld [vmem:[%s1902_s1 + $0x38] sm:$0xff] (!%p158_p3)   ;;  %v1514_v23 = vld [vmem:[%s1902_s1 + $0x88] sm:$0xff] (!%p158_p3)  }
   0xf   : > { %1258 = vmatpush3.bf16.msra.mxu0 (!%p158_p3), %v1482_v3  ;;  %1430 = vmatpush3.bf16.msra.mxu1 (!%p158_p3), %v1482_v3 }
  0x10   : > { %s1916_s13 = smov (!%p189_p5, %s1587_s13), 1  ;;  %s1918_s12 = smov (!%p191_p6, %s1583_s12), 7  ;;  %1259 = vmatprep.subr.bf16.mxu0 %v1483_v4  ;;  %1423 = vmatprep.subr.bf16.mxu1 %v1483_v4 }
  0x11   : > { %s1438_s29 = smul.u32 768, %s1916_s13  ;;  %s1167_s22 = sshll.u32 %s1918_s12, 5 }
  0x12   : > { %s1437_s30 = smul.u32 96, %s1918_s12 }
  0x13   : > { %1260 = vmatpush3.bf16.msra.mxu0 %v1484_v5  ;;  %1431 = vmatpush3.bf16.msra.mxu1 %v1484_v5 }
  0x14   : > { %s195_s8 = sadd.s32 %s1438_s29, %s1437_s30  ;;  %1261 = vmatprep.subr.bf16.mxu0 %v1485_v6  ;;  %1424 = vmatprep.subr.bf16.mxu1 %v1485_v6 }
  0x15   : > { %s1166_s11 = sshll.u32 %s195_s8, 2 }
  0x16   : > { %s1687_s23 = scalar_lea.vmem %s1901_s0, %s1166_s11 }
  0x17   : > { %1262 = vmatpush3.bf16.msra.mxu0 %v1486_v7  ;;  %1432 = vmatpush3.bf16.msra.mxu1 %v1486_v7  ;;  %v1497_v11 = vld [vmem:[%s1687_s23 + $0x4] ss:$12 sps:$4 sm:$0xff]   ;;  %v1495_v19 = vld [vmem:[%s1687_s23] ss:$12 sps:$4 sm:$0xff]   ;;  %v1502_v21 = vld [vmem:[%s1687_s23 + $0x1c] ss:$12 sps:$4 sm:$0xff]  }
  0x18   : > { %1263 = vmatprep.subr.bf16.mxu0 %v1487_v8  ;;  %1425 = vmatprep.subr.bf16.mxu1 %v1487_v8  ;;  %v1500_v12 = vld [vmem:[%s1687_s23 + $0x124] ss:$12 sps:$4 sm:$0xff]   ;;  %v1498_v20 = vld [vmem:[%s1687_s23 + $0x120] ss:$12 sps:$4 sm:$0xff]   ;;  %v1504_v22 = vld [vmem:[%s1687_s23 + $0x13c] ss:$12 sps:$4 sm:$0xff]  }
  0x19   : > { %744 = vmatprep.mubr.bf16.mxu0 %v1497_v11  ;;  %840 = vmatprep.mubr.bf16.mxu1 %v1500_v12  ;;  %v1506_v24 = vld [vmem:[%s1687_s23 + $0x18] ss:$12 sps:$4 sm:$0xff]   ;;  %v1508_v26 = vld [vmem:[%s1687_s23 + $0x34] ss:$12 sps:$4 sm:$0xff]   ;;  %v1512_v28 = vld [vmem:[%s1687_s23 + $0x30] ss:$12 sps:$4 sm:$0xff]  }
  0x1a   : > { %v1507_v25 = vld [vmem:[%s1687_s23 + $0x138] ss:$12 sps:$4 sm:$0xff]   ;;  %v1510_v27 = vld [vmem:[%s1687_s23 + $0x154] ss:$12 sps:$4 sm:$0xff]   ;;  %v1513_v29 = vld [vmem:[%s1687_s23 + $0x150] ss:$12 sps:$4 sm:$0xff]  }
  0x1b   : > { %1264 = vmatpush3.bf16.msra.mxu0 %v1488_v9  ;;  %1433 = vmatpush3.bf16.msra.mxu1 %v1488_v9  ;;  %v1515_v30 = vld [vmem:[%s1687_s23 + $0x4c] ss:$12 sps:$4 sm:$0xff]   ;;  %v1519_v32 = vld [vmem:[%s1687_s23 + $0x48] ss:$12 sps:$4 sm:$0xff]   ;;  %v1521_v34 = vld [vmem:[%s1687_s23 + $0x64] ss:$12 sps:$4 sm:$0xff]  }
  0x1c   : > { %1265 = vmatprep.subr.bf16.mxu0 %v1489_v10  ;;  %1426 = vmatprep.subr.bf16.mxu1 %v1489_v10  ;;  %v1517_v31 = vld [vmem:[%s1687_s23 + $0x16c] ss:$12 sps:$4 sm:$0xff]   ;;  %v1520_v33 = vld [vmem:[%s1687_s23 + $0x168] ss:$12 sps:$4 sm:$0xff]   ;;  %v1530_v41 = vld [vmem:[%s1687_s23 + $0x50] ss:$12 sps:$4 sm:$0xff]  }
  0x1d   : > { %v1523_v35 = vld [vmem:[%s1687_s23 + $0x8] ss:$12 sps:$4 sm:$0xff]   ;;  %v1524_v36 = vld [vmem:[%s1687_s23 + $0x60] ss:$12 sps:$4 sm:$0xff]   ;;  %v1528_v39 = vld [vmem:[%s1687_s23 + $0x38] ss:$12 sps:$4 sm:$0xff]  }
  0x1e   : > { %v1525_v37 = vld [vmem:[%s1687_s23 + $0x20] ss:$12 sps:$4 sm:$0xff]   ;;  %v1526_v38 = vld [vmem:[%s1687_s23 + $0x7c] ss:$12 sps:$4 sm:$0xff]   ;;  %v1529_v40 = vld [vmem:[%s1687_s23 + $0x78] ss:$12 sps:$4 sm:$0xff]  }
  0x1f   : > { %1266 = vmatpush3.bf16.msra.mxu0 %v1490_v13  ;;  %1434 = vmatpush3.bf16.msra.mxu1 %v1490_v13  ;;  %v1531_v42 = vld [vmem:[%s1687_s23 + $0x94] ss:$12 sps:$4 sm:$0xff]   ;;  %v1534_v44 = vld [vmem:[%s1687_s23 + $0x90] ss:$12 sps:$4 sm:$0xff]   ;;  %v1536_v46 = vld [vmem:[%s1687_s23 + $0xac] ss:$12 sps:$4 sm:$0xff]  }
  0x20   : > { %1267 = vmatprep.subr.bf16.mxu0 %v1491_v14  ;;  %1427 = vmatprep.subr.bf16.mxu1 %v1491_v14  ;;  %v1533_v43 = vld [vmem:[%s1687_s23 + $0x68] ss:$12 sps:$4 sm:$0xff]   ;;  %v1535_v45 = vld [vmem:[%s1687_s23 + $0x80] ss:$12 sps:$4 sm:$0xff]   ;;  %v1538_v47 = vld [vmem:[%s1687_s23 + $0x98] ss:$12 sps:$4 sm:$0xff]  }
  0x21   : > { %v1539_v48 = vld [vmem:[%s1687_s23 + $0xa8] ss:$12 sps:$4 sm:$0xff]   ;;  %v1540_v49 = vld [vmem:[%s1687_s23 + $0xb0] ss:$12 sps:$4 sm:$0xff]   ;;  %v1544_v52 = vld [vmem:[%s1687_s23 + $0xc0] ss:$12 sps:$4 sm:$0xff]  }
  0x22   : > { %v1541_v50 = vld [vmem:[%s1687_s23 + $0xc4] ss:$12 sps:$4 sm:$0xff]   ;;  %v1543_v51 = vld [vmem:[%s1687_s23 + $0xc8] ss:$12 sps:$4 sm:$0xff]   ;;  %v1545_v53 = vld [vmem:[%s1687_s23 + $0xe0] ss:$12 sps:$4 sm:$0xff]  }
  0x23   : > { %1268 = vmatpush3.bf16.msra.mxu0 %v1492_v15  ;;  %1435 = vmatpush3.bf16.msra.mxu1 %v1492_v15  ;;  %v1546_v54 = vld [vmem:[%s1687_s23 + $0xdc] ss:$12 sps:$4 sm:$0xff]   ;;  %v1548_v55 = vld [vmem:[%s1687_s23 + $0xf8] ss:$12 sps:$4 sm:$0xff]   ;;  %v1551_v58 = vld [vmem:[%s1687_s23 + $0xf4] ss:$12 sps:$4 sm:$0xff]  }
  0x24   : > { %1269 = vmatprep.subr.bf16.mxu0 %v1493_v16  ;;  %1428 = vmatprep.subr.bf16.mxu1 %v1493_v16  ;;  %v1549_v56 = vld [vmem:[%s1687_s23 + $0xd8] ss:$12 sps:$4 sm:$0xff]   ;;  %v1550_v57 = vld [vmem:[%s1687_s23 + $0x110] ss:$12 sps:$4 sm:$0xff]   ;;  %v1553_v59 = vld [vmem:[%s1687_s23 + $0x128] ss:$12 sps:$4 sm:$0xff]  }
  0x25   : > { %v1554_v60 = vld [vmem:[%s1687_s23 + $0xf0] ss:$12 sps:$4 sm:$0xff]   ;;  %v1555_v61 = vld [vmem:[%s1687_s23 + $0x140] ss:$12 sps:$4 sm:$0xff]   ;;  %v1558_v63 = vld [vmem:[%s1687_s23 + $0x158] ss:$12 sps:$4 sm:$0xff]  }
  0x26   : > { %v1556_v62 = vld [vmem:[%s1687_s23 + $0x10c] ss:$12 sps:$4 sm:$0xff]   ;;  %v1559_v0 = vld [vmem:[%s1687_s23 + $0x108] ss:$12 sps:$4 sm:$0xff]   ;;  %v1560_v1 = vld [vmem:[%s1687_s23 + $0x170] ss:$12 sps:$4 sm:$0xff]  }
  0x27   : > { %1270 = vmatpush3.bf16.msra.mxu0 %v1494_v17  ;;  %1436 = vmatpush3.bf16.msra.mxu1 %v1494_v17  ;;  %s1168_s23 = sshll.u32 %s1916_s13, 8 }
  0x28   : > { %1385 = vmatprep.subr.bf16.mxu1 %v1501_v18  ;;  %s204_s24 = sadd.s32 %s1168_s23, %s1167_s22 }
  0x29   : > { %s1169_s25 = sshll.u32 %s204_s24, 3 }
  0x2a   : > { %745 = vmatmul.mubr.bf16.vlgmr.msra.gmra.mrb[0].mxu0 %v1495_v19  ;;  %841 = vmatmul.mubr.bf16.vlgmr.msra.gmra.mrb[0].mxu1 %v1498_v20  ;;  %s1807_s28 = scalar_lea.vmem %s1904_s3, %s1169_s25 }
  0x2b   : > { %1386 = vmatpush3.bf16.msra.mxu1 %v1501_v18  ;;  %752 = vmatprep.mubr.bf16.mxu0 %v1502_v21 }
  0x2c   : > { %848 = vmatprep.mubr.bf16.mxu1 %v1504_v22  ;;  %1387 = vmatprep.subr.bf16.mxu1 %v1514_v23 }
  0x2f   : > { %1388 = vmatpush3.bf16.msra.mxu1 %v1514_v23 }
  0x32   : > { %753 = vmatmul.mubr.bf16.gmra.mrb[4].mxu0 %v1506_v24  ;;  %849 = vmatmul.mubr.bf16.gmra.mrb[4].mxu1 %v1507_v25 }
  0x33   : > { %760 = vmatprep.mubr.bf16.mxu0 %v1508_v26  ;;  %856 = vmatprep.mubr.bf16.mxu1 %v1510_v27 }
  0x3a   : > { %761 = vmatmul.mubr.bf16.gmra.mrb[8].mxu0 %v1512_v28  ;;  %857 = vmatmul.mubr.bf16.gmra.mrb[8].mxu1 %v1513_v29 }
  0x3b   : > { %768 = vmatprep.mubr.bf16.mxu0 %v1515_v30  ;;  %864 = vmatprep.mubr.bf16.mxu1 %v1517_v31 }
  0x42   : > { %769 = vmatmul.mubr.bf16.gmra.mrb[12].mxu0 %v1519_v32  ;;  %865 = vmatmul.mubr.bf16.gmra.mrb[12].mxu1 %v1520_v33 }
  0x43   : > { %776 = vmatprep.mubr.bf16.mxu0 %v1521_v34  ;;  %1389 = vmatprep.mubr.msk.bf16.mxu1 %vm663_vm0, %v1523_v35 }
  0x4a   : > { %777 = vmatmul.mubr.bf16.gmra.mrb[16].mxu0 %v1524_v36  ;;  %1390 = vmatmul.mubr.msk.bf16.vlgmr.msra.gmra.mrb[16].mxu1 %vm663_vm0, %v1525_v37 }
  0x4b   : > { %784 = vmatprep.mubr.bf16.mxu0 %v1526_v38  ;;  %1393 = vmatprep.mubr.msk.bf16.mxu1 %vm663_vm0, %v1528_v39 }
  0x52   : > { %785 = vmatmul.mubr.bf16.gmra.mrb[20].mxu0 %v1529_v40  ;;  %1394 = vmatmul.mubr.msk.bf16.gmra.mrb[20].mxu1 %vm663_vm0, %v1530_v41 }
  0x53   : > { %792 = vmatprep.mubr.bf16.mxu0 %v1531_v42  ;;  %1397 = vmatprep.mubr.msk.bf16.mxu1 %vm663_vm0, %v1533_v43 }
  0x5a   : > { %793 = vmatmul.mubr.bf16.gmra.mrb[24].mxu0 %v1534_v44  ;;  %1398 = vmatmul.mubr.msk.bf16.gmra.mrb[24].mxu1 %vm663_vm0, %v1535_v45 }
  0x5b   : > { %800 = vmatprep.mubr.bf16.mxu0 %v1536_v46  ;;  %1401 = vmatprep.mubr.msk.bf16.mxu1 %vm663_vm0, %v1538_v47 }
  0x62   : > { %801 = vmatmul.mubr.bf16.gmra.mrb[28].mxu0 %v1539_v48  ;;  %1402 = vmatmul.mubr.msk.bf16.gmra.mrb[28].mxu1 %vm663_vm0, %v1540_v49 }
  0x63   : > { %808 = vmatprep.mubr.bf16.mxu0 %v1541_v50  ;;  %1405 = vmatprep.mubr.msk.bf16.mxu1 %vm663_vm0, %v1543_v51  ;;  %v1801_v50 = vld [vmem:[%s1903_s2] ss:$0 sm:$0xff] }
  0x6a   : > { %809 = vmatmul.mubr.bf16.gmra.mrb[32].mxu0 %v1544_v52  ;;  %1406 = vmatmul.mubr.msk.bf16.gmra.mrb[32].mxu1 %vm663_vm0, %v1545_v53 }
  0x6b   : > { %816 = vmatprep.mubr.bf16.mxu0 %v1546_v54  ;;  %1409 = vmatprep.mubr.msk.bf16.mxu1 %vm663_vm0, %v1548_v55 }
  0x72   : > { %817 = vmatmul.mubr.bf16.gmra.mrb[36].mxu0 %v1549_v56  ;;  %1410 = vmatmul.mubr.msk.bf16.gmra.mrb[36].mxu1 %vm663_vm0, %v1550_v57 }
  0x73   : > { %824 = vmatprep.mubr.bf16.mxu0 %v1551_v58  ;;  %1413 = vmatprep.mubr.msk.bf16.mxu1 %vm663_vm0, %v1553_v59 }
  0x7a   : > { %825 = vmatmul.mubr.bf16.gmra.mrb[40].mxu0 %v1554_v60  ;;  %1414 = vmatmul.mubr.msk.bf16.gmra.mrb[40].mxu1 %vm663_vm0, %v1555_v61 }
  0x7b   : > { %832 = vmatprep.mubr.bf16.mxu0 %v1556_v62  ;;  %1417 = vmatprep.mubr.msk.bf16.mxu1 %vm663_vm0, %v1558_v63 }
  0x82   : > { %833 = vmatmul.mubr.bf16.gmra.mrb[44].mxu0 %v1559_v0  ;;  %1418 = vmatmul.mubr.msk.bf16.gmra.mrb[44].mxu1 %vm663_vm0, %v1560_v1 }
  0xfd   : > { %v1271_v2 = vpop.f32.mrb[0].mxu0  ;;  %v1343_v3 = vpop.f32.mrb[0].mxu1 }
  0xfe   : > { %v1272_v4 = vpop.f32.mrb[1].mxu0  ;;  %v1344_v5 = vpop.f32.mrb[1].mxu1 }
  0xff   : > { %v1273_v6 = vadd.f32 %v1272_v4, %v1271_v2  ;;  %v1274_v7 = vpop.f32.mrb[2].mxu0  ;;  %v1780_v8 = vadd.f32 %v1344_v5, %v1343_v3  ;;  %v1346_v9 = vpop.f32.mrb[2].mxu1 }
 0x100   : > { %v1275_v10 = vpop.f32.mrb[3].mxu0  ;;  %v1347_v11 = vpop.f32.mrb[3].mxu1 }
 0x101   : > { %v1276_v12 = vadd.f32 %v1275_v10, %v1274_v7  ;;  %v1782_v13 = vadd.f32 %v1347_v11, %v1346_v9  ;;  %v747_v54 = vadd.f32 %v1273_v6, %v1801_v50 }
 0x103   : > { %v750_v63 = vadd.f32 %v1276_v12, %v1801_v50 }
 0x105   : > { %v1277_v14 = vpop.f32.mrb[4].mxu0  ;;  %v1349_v15 = vpop.f32.mrb[4].mxu1 }
 0x106   : > { %v1278_v16 = vpop.f32.mrb[5].mxu0  ;;  %v1350_v17 = vpop.f32.mrb[5].mxu1 }
 0x107   : > { %v1279_v18 = vadd.f32 %v1278_v16, %v1277_v14  ;;  %v1280_v19 = vpop.f32.mrb[6].mxu0  ;;  %v1784_v20 = vadd.f32 %v1350_v17, %v1349_v15  ;;  %v1352_v21 = vpop.f32.mrb[6].mxu1 }
 0x108   : > { %v1281_v22 = vpop.f32.mrb[7].mxu0  ;;  %v1353_v23 = vpop.f32.mrb[7].mxu1 }
 0x109   : > { %v1282_v24 = vadd.f32 %v1281_v22, %v1280_v19  ;;  %v1786_v25 = vadd.f32 %v1353_v23, %v1352_v21  ;;  %v755_v51 = vadd.f32 %v1279_v18, %v1801_v50 }
 0x10b   : > { %v758_v58 = vadd.f32 %v1282_v24, %v1801_v50 }
 0x10d   : > { %v1283_v26 = vpop.f32.mrb[8].mxu0  ;;  %v1355_v27 = vpop.f32.mrb[8].mxu1 }
 0x10e   : > { %v1284_v28 = vpop.f32.mrb[9].mxu0  ;;  %v1356_v29 = vpop.f32.mrb[9].mxu1 }
 0x10f   : > { %v1285_v30 = vadd.f32 %v1284_v28, %v1283_v26  ;;  %v1286_v31 = vpop.f32.mrb[10].mxu0  ;;  %v1788_v32 = vadd.f32 %v1356_v29, %v1355_v27  ;;  %v1358_v33 = vpop.f32.mrb[10].mxu1 }
 0x110   : > { %v1287_v34 = vpop.f32.mrb[11].mxu0  ;;  %v1359_v35 = vpop.f32.mrb[11].mxu1 }
 0x111   : > { %v1288_v36 = vadd.f32 %v1287_v34, %v1286_v31  ;;  %v1790_v37 = vadd.f32 %v1359_v35, %v1358_v33  ;;  %v763_v9 = vadd.f32 %v1285_v30, %v1801_v50 }
 0x113   : > { %v766_v19 = vadd.f32 %v1288_v36, %v1801_v50 }
 0x115   : > { %v1289_v38 = vpop.f32.mrb[12].mxu0  ;;  %v1361_v39 = vpop.f32.mrb[12].mxu1 }
 0x116   : > { %v1290_v40 = vpop.f32.mrb[13].mxu0  ;;  %v1362_v41 = vpop.f32.mrb[13].mxu1 }
 0x117   : > { %v1291_v42 = vadd.f32 %v1290_v40, %v1289_v38  ;;  %v1292_v43 = vpop.f32.mrb[14].mxu0  ;;  %v1794_v44 = vadd.f32 %v1362_v41, %v1361_v39  ;;  %v1364_v45 = vpop.f32.mrb[14].mxu1 }
 0x118   : > { %v1293_v46 = vpop.f32.mrb[15].mxu0  ;;  %v1365_v47 = vpop.f32.mrb[15].mxu1 }
 0x119   : > { %v1294_v48 = vadd.f32 %v1293_v46, %v1292_v43  ;;  %v1796_v49 = vadd.f32 %v1365_v47, %v1364_v45  ;;  %v771_v5 = vadd.f32 %v1291_v42, %v1801_v50 }
 0x11b   : > { %v774_v14 = vadd.f32 %v1294_v48, %v1801_v50 }
 0x11d   : > { %v1295_v52 = vpop.f32.mrb[16].mxu0  ;;  %v1391_v53 = vpop.f32.mrb[16].mxu1 }
 0x11e   : > { %v916_v55 = vadd.f32 %v1391_v53, %v755_v51  ;;  %v1296_v56 = vpop.f32.mrb[17].mxu0  ;;  %v907_v57 = vpop.f32.mrb[17].mxu1 }
 0x11f   : > { %v1297_v59 = vadd.f32 %v1296_v56, %v1295_v52  ;;  %v908_v60 = vadd.f32 %v907_v57, %v747_v54  ;;  %v1298_v61 = vpop.f32.mrb[18].mxu0  ;;  %v1392_v62 = vpop.f32.mrb[18].mxu1 }
 0x120   : > { %1036 = vst [vmem:[%s1807_s28 + $0x10] sm:$0xff] %v916_v55  ;;  %v919_v0 = vadd.f32 %v1392_v62, %v758_v58  ;;  %v1299_v1 = vpop.f32.mrb[19].mxu0  ;;  %v910_v2 = vpop.f32.mrb[19].mxu1 }
 0x121   : > { %1034 = vst [vmem:[%s1807_s28] sm:$0xff] %v908_v60  ;;  %v1300_v3 = vadd.f32 %v1299_v1, %v1298_v61  ;;  %v911_v4 = vadd.f32 %v910_v2, %v750_v63  ;;  %v779_v30 = vadd.f32 %v1297_v59, %v1801_v50 }
 0x122   : > { %1037 = vst [vmem:[%s1807_s28 + $0x18] sm:$0xff] %v919_v0 }
 0x123   : > { %1035 = vst [vmem:[%s1807_s28 + $0x8] sm:$0xff] %v911_v4  ;;  %v782_v41 = vadd.f32 %v1300_v3, %v1801_v50 }
 0x125   : > { %v1301_v6 = vpop.f32.mrb[20].mxu0  ;;  %v1395_v7 = vpop.f32.mrb[20].mxu1 }
 0x126   : > { %v932_v10 = vadd.f32 %v1395_v7, %v771_v5  ;;  %v1302_v11 = vpop.f32.mrb[21].mxu0  ;;  %v923_v12 = vpop.f32.mrb[21].mxu1 }
 0x127   : > { %v1303_v15 = vadd.f32 %v1302_v11, %v1301_v6  ;;  %v924_v16 = vadd.f32 %v923_v12, %v763_v9  ;;  %v1304_v17 = vpop.f32.mrb[22].mxu0  ;;  %v1396_v18 = vpop.f32.mrb[22].mxu1 }
 0x128   : > { %1040 = vst [vmem:[%s1807_s28 + $0x30] sm:$0xff] %v932_v10  ;;  %v935_v21 = vadd.f32 %v1396_v18, %v774_v14  ;;  %v1305_v22 = vpop.f32.mrb[23].mxu0  ;;  %v926_v23 = vpop.f32.mrb[23].mxu1 }
 0x129   : > { %1038 = vst [vmem:[%s1807_s28 + $0x20] sm:$0xff] %v924_v16  ;;  %v1306_v24 = vadd.f32 %v1305_v22, %v1304_v17  ;;  %v927_v26 = vadd.f32 %v926_v23, %v766_v19  ;;  %v787_v27 = vadd.f32 %v1303_v15, %v1801_v50 }
 0x12a   : > { %1041 = vst [vmem:[%s1807_s28 + $0x38] sm:$0xff] %v935_v21 }
 0x12b   : > { %1039 = vst [vmem:[%s1807_s28 + $0x28] sm:$0xff] %v927_v26  ;;  %v790_v35 = vadd.f32 %v1306_v24, %v1801_v50 }
 0x12d   : > { %v1307_v28 = vpop.f32.mrb[24].mxu0  ;;  %v1399_v29 = vpop.f32.mrb[24].mxu1 }
 0x12e   : > { %v948_v31 = vadd.f32 %v1399_v29, %v787_v27  ;;  %v1308_v33 = vpop.f32.mrb[25].mxu0  ;;  %v939_v34 = vpop.f32.mrb[25].mxu1 }
 0x12f   : > { %v1309_v36 = vadd.f32 %v1308_v33, %v1307_v28  ;;  %v940_v38 = vadd.f32 %v939_v34, %v779_v30  ;;  %v1310_v39 = vpop.f32.mrb[26].mxu0  ;;  %v1400_v40 = vpop.f32.mrb[26].mxu1 }
 0x130   : > { %1044 = vst [vmem:[%s1807_s28 + $0x50] sm:$0xff] %v948_v31  ;;  %v951_v42 = vadd.f32 %v1400_v40, %v790_v35  ;;  %v1311_v43 = vpop.f32.mrb[27].mxu0  ;;  %v942_v45 = vpop.f32.mrb[27].mxu1 }
 0x131   : > { %1042 = vst [vmem:[%s1807_s28 + $0x40] sm:$0xff] %v940_v38  ;;  %v1312_v46 = vadd.f32 %v1311_v43, %v1310_v39  ;;  %v943_v47 = vadd.f32 %v942_v45, %v782_v41  ;;  %v795_v52 = vadd.f32 %v1309_v36, %v1801_v50  ;;  %v851_v36 = vadd.f32 %v1784_v20, %v1801_v50 }
 0x132   : > { %1045 = vst [vmem:[%s1807_s28 + $0x58] sm:$0xff] %v951_v42  ;;  %v843_v41 = vadd.f32 %v1780_v8, %v1801_v50 }
 0x133   : > { %1043 = vst [vmem:[%s1807_s28 + $0x48] sm:$0xff] %v943_v47  ;;  %v798_v59 = vadd.f32 %v1312_v46, %v1801_v50  ;;  %v854_v46 = vadd.f32 %v1786_v25, %v1801_v50 }
 0x135   : > { %v1313_v48 = vpop.f32.mrb[28].mxu0  ;;  %v1403_v51 = vpop.f32.mrb[28].mxu1 }
 0x136   : > { %v1314_v53 = vpop.f32.mrb[29].mxu0  ;;  %v955_v54 = vpop.f32.mrb[29].mxu1 }
 0x137   : > { %v1315_v55 = vadd.f32 %v1314_v53, %v1313_v48  ;;  %v956_v56 = vadd.f32 %v955_v54, %v795_v52  ;;  %v1316_v57 = vpop.f32.mrb[30].mxu0  ;;  %v1404_v58 = vpop.f32.mrb[30].mxu1  ;;  %v846_v52 = vadd.f32 %v1782_v13, %v1801_v50 }
 0x138   : > { %v1317_v60 = vpop.f32.mrb[31].mxu0  ;;  %v958_v61 = vpop.f32.mrb[31].mxu1 }
 0x139   : > { %v803_v62 = vadd.f32 %v1315_v55, %v1801_v50  ;;  %1046 = vst [vmem:[%s1807_s28 + $0x60] sm:$0xff] %v956_v56  ;;  %v1318_v63 = vadd.f32 %v1317_v60, %v1316_v57  ;;  %v959_v0 = vadd.f32 %v958_v61, %v798_v59  ;;  %v867_v59 = vadd.f32 %v1794_v44, %v1801_v50 }
 0x13b   : > { %v964_v1 = vadd.f32 %v1403_v51, %v803_v62  ;;  %v806_v2 = vadd.f32 %v1318_v63, %v1801_v50  ;;  %1047 = vst [vmem:[%s1807_s28 + $0x68] sm:$0xff] %v959_v0  ;;  %v859_v62 = vadd.f32 %v1788_v32, %v1801_v50 }
 0x13d   : > { %1048 = vst [vmem:[%s1807_s28 + $0x70] sm:$0xff] %v964_v1  ;;  %v967_v3 = vadd.f32 %v1404_v58, %v806_v2  ;;  %v1319_v4 = vpop.f32.mrb[32].mxu0  ;;  %v1407_v5 = vpop.f32.mrb[32].mxu1  ;;  %v870_v2 = vadd.f32 %v1796_v49, %v1801_v50 }
 0x13e   : > { %v1320_v6 = vpop.f32.mrb[33].mxu0  ;;  %v971_v7 = vpop.f32.mrb[33].mxu1 }
 0x13f   : > { %1049 = vst [vmem:[%s1807_s28 + $0x78] sm:$0xff] %v967_v3  ;;  %v1321_v9 = vadd.f32 %v1320_v6, %v1319_v4  ;;  %v1322_v10 = vpop.f32.mrb[34].mxu0  ;;  %v1408_v11 = vpop.f32.mrb[34].mxu1  ;;  %v862_v6 = vadd.f32 %v1790_v37, %v1801_v50 }
 0x140   : > { %v1323_v12 = vpop.f32.mrb[35].mxu0  ;;  %v974_v14 = vpop.f32.mrb[35].mxu1 }
 0x141   : > { %v811_v15 = vadd.f32 %v1321_v9, %v1801_v50  ;;  %v1324_v16 = vadd.f32 %v1323_v12, %v1322_v10 }
 0x143   : > { %v972_v17 = vadd.f32 %v971_v7, %v811_v15  ;;  %v814_v18 = vadd.f32 %v1324_v16, %v1801_v50 }
 0x145   : > { %1050 = vst [vmem:[%s1807_s28 + $0x80] sm:$0xff] %v972_v17  ;;  %v975_v19 = vadd.f32 %v974_v14, %v814_v18  ;;  %v1325_v21 = vpop.f32.mrb[36].mxu0  ;;  %v1843_v22 = vpop.f32.mrb[36].mxu1 }
 0x146   : > { %v1326_v23 = vpop.f32.mrb[37].mxu0  ;;  %v987_v24 = vpop.f32.mrb[37].mxu1 }
 0x147   : > { %1051 = vst [vmem:[%s1807_s28 + $0x88] sm:$0xff] %v975_v19  ;;  %v1327_v26 = vadd.f32 %v1326_v23, %v1325_v21  ;;  %v1328_v27 = vpop.f32.mrb[38].mxu0  ;;  %v1846_v28 = vpop.f32.mrb[38].mxu1 }
 0x148   : > { %v1329_v29 = vpop.f32.mrb[39].mxu0  ;;  %v990_v30 = vpop.f32.mrb[39].mxu1 }
 0x149   : > { %v819_v31 = vadd.f32 %v1327_v26, %v1801_v50  ;;  %v1330_v33 = vadd.f32 %v1329_v29, %v1328_v27 }
 0x14b   : > { %v980_v34 = vadd.f32 %v1407_v5, %v819_v31  ;;  %v822_v35 = vadd.f32 %v1330_v33, %v1801_v50 }
 0x14d   : > { %1052 = vst [vmem:[%s1807_s28 + $0x90] sm:$0xff] %v980_v34  ;;  %v983_v38 = vadd.f32 %v1408_v11, %v822_v35  ;;  %v1331_v39 = vpop.f32.mrb[40].mxu0  ;;  %v1415_v40 = vpop.f32.mrb[40].mxu1 }
 0x14e   : > { %v1012_v42 = vadd.f32 %v1415_v40, %v851_v36  ;;  %v1332_v43 = vpop.f32.mrb[41].mxu0  ;;  %v1003_v45 = vpop.f32.mrb[41].mxu1 }
 0x14f   : > { %1053 = vst [vmem:[%s1807_s28 + $0x98] sm:$0xff] %v983_v38  ;;  %v1333_v47 = vadd.f32 %v1332_v43, %v1331_v39  ;;  %v1004_v20 = vadd.f32 %v1003_v45, %v843_v41  ;;  %v1334_v48 = vpop.f32.mrb[42].mxu0  ;;  %v1416_v51 = vpop.f32.mrb[42].mxu1 }
 0x150   : > { %1060 = vst [vmem:[%s1807_s28 + $0xd0] sm:$0xff] %v1012_v42  ;;  %v1015_v8 = vadd.f32 %v1416_v51, %v854_v46  ;;  %v1335_v53 = vpop.f32.mrb[43].mxu0  ;;  %v1006_v54 = vpop.f32.mrb[43].mxu1 }
 0x151   : > { %v827_v55 = vadd.f32 %v1333_v47, %v1801_v50  ;;  %1058 = vst [vmem:[%s1807_s28 + $0xc0] sm:$0xff] %v1004_v20  ;;  %v1336_v56 = vadd.f32 %v1335_v53, %v1334_v48  ;;  %v1007_v25 = vadd.f32 %v1006_v54, %v846_v52 }
 0x152   : > { %1061 = vst [vmem:[%s1807_s28 + $0xd8] sm:$0xff] %v1015_v8 }
 0x153   : > { %v988_v57 = vadd.f32 %v987_v24, %v827_v55  ;;  %v830_v58 = vadd.f32 %v1336_v56, %v1801_v50  ;;  %1059 = vst [vmem:[%s1807_s28 + $0xc8] sm:$0xff] %v1007_v25 }
 0x155   : > { %1054 = vst [vmem:[%s1807_s28 + $0xa0] sm:$0xff] %v988_v57  ;;  %v991_v13 = vadd.f32 %v990_v30, %v830_v58  ;;  %v1337_v60 = vpop.f32.mrb[44].mxu0  ;;  %v1419_v61 = vpop.f32.mrb[44].mxu1 }
 0x156   : > { %v1028_v63 = vadd.f32 %v1419_v61, %v867_v59  ;;  %v1338_v0 = vpop.f32.mrb[45].mxu0  ;;  %v1019_v1 = vpop.f32.mrb[45].mxu1 }
 0x157   : > { %1055 = vst [vmem:[%s1807_s28 + $0xa8] sm:$0xff] %v991_v13  ;;  %v1339_v3 = vadd.f32 %v1338_v0, %v1337_v60  ;;  %v1020_v44 = vadd.f32 %v1019_v1, %v859_v62  ;;  %v1340_v4 = vpop.f32.mrb[46].mxu0  ;;  %v1420_v5 = vpop.f32.mrb[46].mxu1 }
 0x158   : > { %1064 = vst [vmem:[%s1807_s28 + $0xf0] sm:$0xff] %v1028_v63  ;;  %v1031_v32 = vadd.f32 %v1420_v5, %v870_v2  ;;  %v1341_v7 = vpop.f32.mrb[47].mxu0  ;;  %v1022_v9 = vpop.f32.mrb[47].mxu1 }
 0x159   : > { %v835_v10 = vadd.f32 %v1339_v3, %v1801_v50  ;;  %1062 = vst [vmem:[%s1807_s28 + $0xe0] sm:$0xff] %v1020_v44  ;;  %v1342_v11 = vadd.f32 %v1341_v7, %v1340_v4  ;;  %v1023_v49 = vadd.f32 %v1022_v9, %v862_v6 }
 0x15a   : > { %1065 = vst [vmem:[%s1807_s28 + $0xf8] sm:$0xff] %v1031_v32 }
 0x15b   : > { %v996_v12 = vadd.f32 %v1843_v22, %v835_v10  ;;  %v838_v14 = vadd.f32 %v1342_v11, %v1801_v50  ;;  %1063 = vst [vmem:[%s1807_s28 + $0xe8] sm:$0xff] %v1023_v49 }
 0x15d   : > { %1056 = vst [vmem:[%s1807_s28 + $0xb0] sm:$0xff] %v996_v12  ;;  %v999_v15 = vadd.f32 %v1846_v28, %v838_v14 }
 0x15f   : > { %1057 = vst [vmem:[%s1807_s28 + $0xb8] sm:$0xff] %v999_v15 }
 0x160 PF: > { %s13_s16 = sadd.s32 1, %s1599_s16   ;;  %s1905_s12 = smov %s1591_s14 }
 0x161   : > { %p10_p7 = scmp.ge.s32.totalorder %s13_s16, 18   ;;  %s1906_s13 = smov %s1595_s15 }
 0x162   : > { %s1907_s14 = smov %s1910_s17  ;;  %s1908_s15 = smov %s1914_s18 }
 0x163   :  { %12 = sbr.rel (!%p10_p7) target bundleno = 3 (0x3), region = 62 }

</bundles_post_ra>
